<compile_context>
chip_gen: v6e
topology: v6e:2x2x1
jax: 0.10.0
libtpu: 0.0.40
codegen_flags: <defaults>
</compile_context>

<pallas_src>
import functools

import jax
import jax.numpy as jnp
from jax.experimental import pallas as pl
from jax.experimental.pallas import tpu as pltpu


def _row_tile(n):
    """Largest row tile (multiple of 8, <=256) dividing n; else the full n."""
    for t in (256, 128, 64, 32, 16, 8):
        if n % t == 0:
            return t
    return n


def _ceil_to(n, m):
    return ((n + m - 1) // m) * m


# ---------------------------------------------------------------------------
# Pallas kernel 1: batched affine projection  out = X @ W + b
# Used for the hoisted LSTM input projection (all timesteps, both directions).
# ---------------------------------------------------------------------------
def proj_kernel(x_ref, w_ref, b_ref, out_ref):
    out_ref[...] = (jnp.dot(x_ref[...], w_ref[...],
                            preferred_element_type=jnp.float32)
                    + b_ref[...]).astype(out_ref.dtype)


def project(x, w_t, bias):
    """x: (N, In), w_t: (In, G), bias: (1, G) -> (N, G)."""
    N, In = x.shape
    G = w_t.shape[1]
    tile = _row_tile(N)
    return pl.pallas_call(
        proj_kernel,
        out_shape=jax.ShapeDtypeStruct((N, G), jnp.float32),
        grid_spec=pltpu.PrefetchScalarGridSpec(
            num_scalar_prefetch=0,
            grid=(N // tile,),
            in_specs=[pl.BlockSpec((tile, In), lambda i: (i, 0)),
                      pl.BlockSpec((In, G), lambda i: (0, 0)),
                      pl.BlockSpec((1, G), lambda i: (0, 0))],
            out_specs=pl.BlockSpec((tile, G), lambda i: (i, 0))),
        compiler_params=pltpu.CompilerParams(
            dimension_semantics=("parallel",)),   # row tiles -> megacore on v7x
    )(x, w_t, bias)


# ---------------------------------------------------------------------------
# Pallas kernel 2: one bidirectional LSTM layer (both directions fused).
# gates_x already contains x @ W_ih^T + b for both directions: (T, B, 8H) with
# [..., :4H] = forward gates, [..., 4H:] = backward gates.
# Only h @ W_hh^T remains on the serial critical path.
# ---------------------------------------------------------------------------
def bilstm_layer_kernel(gates_ref, whh_f_ref, whh_b_ref, h0_ref, c0_ref,
                        y_ref, hT_ref, cT_ref,
                        hf_sc, cf_sc, hb_sc, cb_sc):
    T = gates_ref.shape[0]
    H = whh_f_ref.shape[0]
    G4 = 4 * H

    hf_sc[...] = h0_ref[0].astype(jnp.float32)
    cf_sc[...] = c0_ref[0].astype(jnp.float32)
    hb_sc[...] = h0_ref[1].astype(jnp.float32)
    cb_sc[...] = c0_ref[1].astype(jnp.float32)

    def cell(gx, h, c, whh_ref):
        gates = gx + jnp.dot(h, whh_ref[...], preferred_element_type=jnp.float32)
        i = jax.nn.sigmoid(gates[:, 0:H])          # PyTorch gate order: i,f,g,o
        f = jax.nn.sigmoid(gates[:, H:2 * H])
        g = jnp.tanh(gates[:, 2 * H:3 * H])
        o = jax.nn.sigmoid(gates[:, 3 * H:4 * H])
        c_new = f * c + i * g
        h_new = o * jnp.tanh(c_new)
        return h_new, c_new

    # Fully static (unrolled) time loop: no per-step grid overhead.
    # TODO(synk): for large T, switch to lax.fori_loop with dynamic indexing.
    for k in range(T):
        tb = T - 1 - k                              # backward direction's timestep
        gx_f = gates_ref[k][:, 0:G4]                # (B, 4H)
        gx_b = gates_ref[tb][:, G4:2 * G4]          # (B, 4H)
        hf, cf = cell(gx_f, hf_sc[...], cf_sc[...], whh_f_ref)
        hb, cb = cell(gx_b, hb_sc[...], cb_sc[...], whh_b_ref)
        hf_sc[...] = hf
        cf_sc[...] = cf
        hb_sc[...] = hb
        cb_sc[...] = cb
        y_ref[k, :, 0:H] = hf.astype(y_ref.dtype)       # fwd half of output
        y_ref[tb, :, H:2 * H] = hb.astype(y_ref.dtype)  # bwd half of output

    # final states written once (fwd index 0, bwd index 1, as in PyTorch)
    hT_ref[0] = hf_sc[...].astype(hT_ref.dtype)
    hT_ref[1] = hb_sc[...].astype(hT_ref.dtype)
    cT_ref[0] = cf_sc[...].astype(cT_ref.dtype)
    cT_ref[1] = cb_sc[...].astype(cT_ref.dtype)


def bilstm_layer(gates_x, whh_f_t, whh_b_t, h0, c0):
    """gates_x: (T, B, 8H); whh_*_t: (H, 4H); h0/c0: (2, B, H)."""
    T, B, G8 = gates_x.shape
    H = whh_f_t.shape[0]
    return pl.pallas_call(
        bilstm_layer_kernel,
        out_shape=(jax.ShapeDtypeStruct((T, B, 2 * H), jnp.float32),
                   jax.ShapeDtypeStruct((2, B, H), jnp.float32),
                   jax.ShapeDtypeStruct((2, B, H), jnp.float32)),
        grid_spec=pltpu.PrefetchScalarGridSpec(
            num_scalar_prefetch=0,
            grid=(1,),
            in_specs=[pl.BlockSpec((T, B, G8), lambda i: (0, 0, 0)),
                      pl.BlockSpec((H, 4 * H), lambda i: (0, 0)),
                      pl.BlockSpec((H, 4 * H), lambda i: (0, 0)),
                      pl.BlockSpec((2, B, H), lambda i: (0, 0, 0)),
                      pl.BlockSpec((2, B, H), lambda i: (0, 0, 0))],
            out_specs=[pl.BlockSpec((T, B, 2 * H), lambda i: (0, 0, 0)),
                       pl.BlockSpec((2, B, H), lambda i: (0, 0, 0)),
                       pl.BlockSpec((2, B, H), lambda i: (0, 0, 0))],
            scratch_shapes=[pltpu.VMEM((B, H), jnp.float32)] * 4),
        compiler_params=pltpu.CompilerParams(
            dimension_semantics=("arbitrary",)),
    )(gates_x, whh_f_t, whh_b_t, h0, c0)


# ---------------------------------------------------------------------------
# Pallas kernel 3: fused dual decoder + average + log_softmax
#   logits = flat @ (0.5*[W1^T; W2^T]) + 0.5*(b1+b2)   (vocab padded to 128)
#   out    = log_softmax(logits, axis=-1)
# ---------------------------------------------------------------------------
def decoder_kernel(x_ref, w_ref, b_ref, out_ref):
    logits = (jnp.dot(x_ref[...], w_ref[...], preferred_element_type=jnp.float32)
              + b_ref[...])                              # (tile, V_pad)
    m = jnp.max(logits, axis=-1, keepdims=True)
    z = logits - m
    lse = jnp.log(jnp.sum(jnp.exp(z), axis=-1, keepdims=True))
    out_ref[...] = (z - lse).astype(out_ref.dtype)


def decode_logprobs(flat, w_cat, b_cat):
    N, D2 = flat.shape
    Vp = w_cat.shape[1]
    tile = _row_tile(N)
    return pl.pallas_call(
        decoder_kernel,
        out_shape=jax.ShapeDtypeStruct((N, Vp), jnp.float32),
        grid_spec=pltpu.PrefetchScalarGridSpec(
            num_scalar_prefetch=0,
            grid=(N // tile,),
            in_specs=[pl.BlockSpec((tile, D2), lambda i: (i, 0)),
                      pl.BlockSpec((D2, Vp), lambda i: (0, 0)),
                      pl.BlockSpec((1, Vp), lambda i: (0, 0))],
            out_specs=pl.BlockSpec((tile, Vp), lambda i: (i, 0))),
        compiler_params=pltpu.CompilerParams(
            dimension_semantics=("parallel",)),
    )(flat, w_cat, b_cat)


# ---------------------------------------------------------------------------
# Parameter construction (mirrors PyTorch __init__ shapes, pre-fused layout)
# ---------------------------------------------------------------------------
def init_params(key, ntoken, ninp, nhid, nlayers):
    initrange = 0.1
    k_lstm = 1.0 / float(nhid) ** 0.5
    params = {}
    key, sub = jax.random.split(key)
    params["embedding"] = jax.random.uniform(sub, (ntoken, ninp), jnp.float32,
                                             -initrange, initrange)
    for layer in range(nlayers):
        in_size = ninp if layer == 0 else 2 * nhid
        dirs = []
        for _ in range(2):  # fwd, bwd
            key, k1, k2, k3, k4 = jax.random.split(key, 5)
            w_ih = jax.random.uniform(k1, (4 * nhid, in_size), jnp.float32, -k_lstm, k_lstm)
            w_hh = jax.random.uniform(k2, (4 * nhid, nhid), jnp.float32, -k_lstm, k_lstm)
            b_ih = jax.random.uniform(k3, (4 * nhid,), jnp.float32, -k_lstm, k_lstm)
            b_hh = jax.random.uniform(k4, (4 * nhid,), jnp.float32, -k_lstm, k_lstm)
            dirs.append((w_ih, w_hh, b_ih + b_hh))
        (wih_f, whh_f, b_f), (wih_b, whh_b, b_b) = dirs
        params[f"layer{layer}"] = {
            # both directions' input projections fused along the gate axis
            "wih_cat_t": jnp.concatenate([wih_f.T, wih_b.T], axis=1),        # (in, 8H)
            "bias_cat": jnp.concatenate([b_f, b_b]).reshape(1, 8 * nhid),    # (1, 8H)
            "whh_f_t": whh_f.T,                                              # (H, 4H)
            "whh_b_t": whh_b.T,                                              # (H, 4H)
        }
    key, k1, k2 = jax.random.split(key, 3)
    dec1_w = jax.random.uniform(k1, (ntoken, nhid), jnp.float32, -initrange, initrange)
    dec2_w = jax.random.uniform(k2, (ntoken, nhid), jnp.float32, -initrange, initrange)
    dec1_b = jnp.zeros((ntoken,), jnp.float32)
    dec2_b = jnp.zeros((ntoken,), jnp.float32)
    # (decoded1 + decoded2)/2  ==  [x_f, x_b] @ (0.5*[W1^T; W2^T]) + 0.5*(b1+b2)
    w_cat = 0.5 * jnp.concatenate([dec1_w.T, dec2_w.T], axis=0)              # (2H, ntoken)
    b_cat = 0.5 * (dec1_b + dec2_b)                                          # (ntoken,)
    vpad = _ceil_to(ntoken, 128)                        # lane-dense padded vocab
    params["dec_w_cat"] = jnp.zeros((2 * nhid, vpad), jnp.float32).at[:, :ntoken].set(w_cat)
    params["dec_b_cat"] = jnp.full((1, vpad), -1e30, jnp.float32).at[0, :ntoken].set(b_cat)
    return params


# ---------------------------------------------------------------------------
# Full forward pass (glue in plain JAX, hot loops in Pallas)
# ---------------------------------------------------------------------------
@functools.partial(jax.jit, static_argnames=("nlayers",))
def bilstm_forward(params, input_ids, h0_all, c0_all, nlayers):
    T, B = input_ids.shape
    ntoken = params["embedding"].shape[0]
    # Embedding lookup (gather) — glue.
    # TODO(synk): could be fused into the first projection via scalar-prefetched
    # ids + pl.Element row gather; kept as XLA glue for clarity at small sizes.
    x = jnp.take(params["embedding"], input_ids, axis=0)         # (T, B, ninp)

    h_n, c_n = [], []
    for layer in range(nlayers):
        p = params[f"layer{layer}"]
        H = p["whh_f_t"].shape[0]
        In = x.shape[-1]
        # (1) hoisted input projection: all timesteps, both directions, one matmul
        gx = project(x.reshape(T * B, In), p["wih_cat_t"], p["bias_cat"])
        gx = gx.reshape(T, B, 8 * H)
        h0 = h0_all[2 * layer:2 * layer + 2]                     # (2, B, H)
        c0 = c0_all[2 * layer:2 * layer + 2]
        # (2) fused bidirectional recurrence; output already (T, B, 2H)
        x, hT, cT = bilstm_layer(gx, p["whh_f_t"], p["whh_b_t"], h0, c0)
        h_n.append(hT)
        c_n.append(cT)

    flat = x.reshape(T * B, x.shape[-1])                         # (T*B, 2H)
    logp_pad = decode_logprobs(flat, params["dec_w_cat"], params["dec_b_cat"])
    log_probs = logp_pad[:, :ntoken]                             # drop padded vocab
    hidden_out = (jnp.concatenate(h_n, axis=0), jnp.concatenate(c_n, axis=0))
    return log_probs, hidden_out


# ---------------------------------------------------------------------------
if __name__ == "__main__":
    ntoken, ninp, nhid, nlayers = 50, 16, 32, 2
    seq_len, batch = 8, 2

    key = jax.random.PRNGKey(0)
    kp, kx = jax.random.split(key)
    params = init_params(kp, ntoken, ninp, nhid, nlayers)

    input_ids = jax.random.randint(kx, (seq_len, batch), 0, ntoken, dtype=jnp.int32)
    h0 = jnp.zeros((2 * nlayers, batch, nhid), jnp.float32)      # init_hidden
    c0 = jnp.zeros((2 * nlayers, batch, nhid), jnp.float32)

    log_probs, (h_n, c_n) = bilstm_forward(params, input_ids, h0, c0, nlayers)
    jax.block_until_ready((log_probs, h_n, c_n))

    assert log_probs.shape == (seq_len * batch, ntoken)
    assert h_n.shape == (2 * nlayers, batch, nhid)
    assert c_n.shape == (2 * nlayers, batch, nhid)
    # log_softmax rows must (approximately) sum to 1 in prob space
    row_sums = jnp.sum(jnp.exp(log_probs), axis=-1)
    assert bool(jnp.all(jnp.abs(row_sums - 1.0) < 1e-4))
    assert bool(jnp.all(jnp.isfinite(log_probs)))

    print("KERNEL_OK")
</pallas_src>

<mosaic_0001>
module attributes {stable_mosaic.version = 11 : i64} {
  func.func @proj_kernel(%arg0: i32, %arg1: memref<16x16xf32, #tpu.memory_space<vmem>>, %arg2: memref<16x256xf32, #tpu.memory_space<vmem>>, %arg3: memref<1x256xf32, #tpu.memory_space<vmem>>, %arg4: memref<16x256xf32, #tpu.memory_space<vmem>>) attributes {dimension_semantics = [#tpu.dimension_semantics<parallel>], iteration_bounds = array<i64: 1>, scalar_prefetch = 0 : i64, scratch_operands = 0 : i64, tpu.core_type = #tpu.core_type<tc>, window_params = [{transform_indices = @transform_0, window_bounds = array<i64: 16, 16>}, {pipeline_mode = #tpu.pipeline_mode<synchronous>, transform_indices = @transform_1, window_bounds = array<i64: 16, 256>}, {pipeline_mode = #tpu.pipeline_mode<synchronous>, transform_indices = @transform_2, window_bounds = array<i64: 1, 256>}, {transform_indices = @transform_3, window_bounds = array<i64: 16, 256>}]} {
    %c0 = arith.constant 0 : index
    %c0_0 = arith.constant 0 : index
    %0 = vector.load %arg1[%c0, %c0_0] : memref<16x16xf32, #tpu.memory_space<vmem>>, vector<16x16xf32>
    %c0_1 = arith.constant 0 : index
    %c0_2 = arith.constant 0 : index
    %1 = vector.load %arg2[%c0_1, %c0_2] : memref<16x256xf32, #tpu.memory_space<vmem>>, vector<16x256xf32>
    %cst = arith.constant dense<0.000000e+00> : vector<16x256xf32>
    %2 = tpu.matmul %0, %1, %cst {dimension_numbers = #tpu.dot_dimension_numbers<[1], [0], [0], [1], [0, 0, 1, 1], [], []>} : vector<16x16xf32>, vector<16x256xf32>, vector<16x256xf32> -> vector<16x256xf32>
    %c0_3 = arith.constant 0 : index
    %c0_4 = arith.constant 0 : index
    %3 = vector.load %arg3[%c0_3, %c0_4] : memref<1x256xf32, #tpu.memory_space<vmem>>, vector<1x256xf32>
    %4 = vector.broadcast %3 : vector<1x256xf32> to vector<16x256xf32>
    %5 = arith.addf %2, %4 : vector<16x256xf32>
    %c0_5 = arith.constant 0 : index
    %c0_6 = arith.constant 0 : index
    %6 = vector.load %arg4[%c0_5, %c0_6] : memref<16x256xf32, #tpu.memory_space<vmem>>, vector<16x256xf32>
    tpu.vector_store %arg4[%c0_5, %c0_6], %5 {strides = array<i32>} : memref<16x256xf32, #tpu.memory_space<vmem>>, vector<16x256xf32>,
    return
  }
  func.func @transform_0(%arg0: i32) -> (i32, i32) {
    %c0_i32 = arith.constant 0 : i32
    %c0_i32_0 = arith.constant 0 : i32
    return %arg0, %c0_i32 : i32, i32
  }
  func.func @transform_1(%arg0: i32) -> (i32, i32) {
    %c0_i32 = arith.constant 0 : i32
    %c0_i32_0 = arith.constant 0 : i32
    %c0_i32_1 = arith.constant 0 : i32
    return %c0_i32, %c0_i32_0 : i32, i32
  }
  func.func @transform_2(%arg0: i32) -> (i32, i32) {
    %c0_i32 = arith.constant 0 : i32
    %c0_i32_0 = arith.constant 0 : i32
    %c0_i32_1 = arith.constant 0 : i32
    return %c0_i32, %c0_i32_0 : i32, i32
  }
  func.func @transform_3(%arg0: i32) -> (i32, i32) {
    %c0_i32 = arith.constant 0 : i32
    %c0_i32_0 = arith.constant 0 : i32
    return %arg0, %c0_i32 : i32, i32
  }
}

module attributes {stable_mosaic.version = 11 : i64} {
  func.func @proj_kernel(%arg0: i32, %arg1: memref<16x64xf32, #tpu.memory_space<vmem>>, %arg2: memref<64x256xf32, #tpu.memory_space<vmem>>, %arg3: memref<1x256xf32, #tpu.memory_space<vmem>>, %arg4: memref<16x256xf32, #tpu.memory_space<vmem>>) attributes {dimension_semantics = [#tpu.dimension_semantics<parallel>], iteration_bounds = array<i64: 1>, scalar_prefetch = 0 : i64, scratch_operands = 0 : i64, tpu.core_type = #tpu.core_type<tc>, window_params = [{transform_indices = @transform_0, window_bounds = array<i64: 16, 64>}, {pipeline_mode = #tpu.pipeline_mode<synchronous>, transform_indices = @transform_1, window_bounds = array<i64: 64, 256>}, {pipeline_mode = #tpu.pipeline_mode<synchronous>, transform_indices = @transform_2, window_bounds = array<i64: 1, 256>}, {transform_indices = @transform_3, window_bounds = array<i64: 16, 256>}]} {
    %c0 = arith.constant 0 : index
    %c0_0 = arith.constant 0 : index
    %0 = vector.load %arg1[%c0, %c0_0] : memref<16x64xf32, #tpu.memory_space<vmem>>, vector<16x64xf32>
    %c0_1 = arith.constant 0 : index
    %c0_2 = arith.constant 0 : index
    %1 = vector.load %arg2[%c0_1, %c0_2] : memref<64x256xf32, #tpu.memory_space<vmem>>, vector<64x256xf32>
    %cst = arith.constant dense<0.000000e+00> : vector<16x256xf32>
    %2 = tpu.matmul %0, %1, %cst {dimension_numbers = #tpu.dot_dimension_numbers<[1], [0], [0], [1], [0, 0, 1, 1], [], []>} : vector<16x64xf32>, vector<64x256xf32>, vector<16x256xf32> -> vector<16x256xf32>
    %c0_3 = arith.constant 0 : index
    %c0_4 = arith.constant 0 : index
    %3 = vector.load %arg3[%c0_3, %c0_4] : memref<1x256xf32, #tpu.memory_space<vmem>>, vector<1x256xf32>
    %4 = vector.broadcast %3 : vector<1x256xf32> to vector<16x256xf32>
    %5 = arith.addf %2, %4 : vector<16x256xf32>
    %c0_5 = arith.constant 0 : index
    %c0_6 = arith.constant 0 : index
    %6 = vector.load %arg4[%c0_5, %c0_6] : memref<16x256xf32, #tpu.memory_space<vmem>>, vector<16x256xf32>
    tpu.vector_store %arg4[%c0_5, %c0_6], %5 {strides = array<i32>} : memref<16x256xf32, #tpu.memory_space<vmem>>, vector<16x256xf32>,
    return
  }
  func.func @transform_0(%arg0: i32) -> (i32, i32) {
    %c0_i32 = arith.constant 0 : i32
    %c0_i32_0 = arith.constant 0 : i32
    return %arg0, %c0_i32 : i32, i32
  }
  func.func @transform_1(%arg0: i32) -> (i32, i32) {
    %c0_i32 = arith.constant 0 : i32
    %c0_i32_0 = arith.constant 0 : i32
    %c0_i32_1 = arith.constant 0 : i32
    return %c0_i32, %c0_i32_0 : i32, i32
  }
  func.func @transform_2(%arg0: i32) -> (i32, i32) {
    %c0_i32 = arith.constant 0 : i32
    %c0_i32_0 = arith.constant 0 : i32
    %c0_i32_1 = arith.constant 0 : i32
    return %c0_i32, %c0_i32_0 : i32, i32
  }
  func.func @transform_3(%arg0: i32) -> (i32, i32) {
    %c0_i32 = arith.constant 0 : i32
    %c0_i32_0 = arith.constant 0 : i32
    return %arg0, %c0_i32 : i32, i32
  }
}

module attributes {stable_mosaic.version = 11 : i64} {
  func.func @decoder_kernel(%arg0: i32, %arg1: memref<16x64xf32, #tpu.memory_space<vmem>>, %arg2: memref<64x128xf32, #tpu.memory_space<vmem>>, %arg3: memref<1x128xf32, #tpu.memory_space<vmem>>, %arg4: memref<16x128xf32, #tpu.memory_space<vmem>>) attributes {dimension_semantics = [#tpu.dimension_semantics<parallel>], iteration_bounds = array<i64: 1>, scalar_prefetch = 0 : i64, scratch_operands = 0 : i64, tpu.core_type = #tpu.core_type<tc>, window_params = [{transform_indices = @transform_0, window_bounds = array<i64: 16, 64>}, {pipeline_mode = #tpu.pipeline_mode<synchronous>, transform_indices = @transform_1, window_bounds = array<i64: 64, 128>}, {pipeline_mode = #tpu.pipeline_mode<synchronous>, transform_indices = @transform_2, window_bounds = array<i64: 1, 128>}, {transform_indices = @transform_3, window_bounds = array<i64: 16, 128>}]} {
    %c0 = arith.constant 0 : index
    %c0_0 = arith.constant 0 : index
    %0 = vector.load %arg1[%c0, %c0_0] : memref<16x64xf32, #tpu.memory_space<vmem>>, vector<16x64xf32>
    %c0_1 = arith.constant 0 : index
    %c0_2 = arith.constant 0 : index
    %1 = vector.load %arg2[%c0_1, %c0_2] : memref<64x128xf32, #tpu.memory_space<vmem>>, vector<64x128xf32>
    %cst = arith.constant dense<0.000000e+00> : vector<16x128xf32>
    %2 = tpu.matmul %0, %1, %cst {dimension_numbers = #tpu.dot_dimension_numbers<[1], [0], [0], [1], [0, 0, 1, 1], [], []>} : vector<16x64xf32>, vector<64x128xf32>, vector<16x128xf32> -> vector<16x128xf32>
    %c0_3 = arith.constant 0 : index
    %c0_4 = arith.constant 0 : index
    %3 = vector.load %arg3[%c0_3, %c0_4] : memref<1x128xf32, #tpu.memory_space<vmem>>, vector<1x128xf32>
    %4 = vector.broadcast %3 : vector<1x128xf32> to vector<16x128xf32>
    %5 = arith.addf %2, %4 : vector<16x128xf32>
    %cst_5 = arith.constant dense<0xFF800000> : vector<16xf32>
    %6 = vector.multi_reduction <maximumf>, %5, %cst_5 [1] : vector<16x128xf32> to vector<16xf32>
    %7 = vector.shape_cast %6 : vector<16xf32> to vector<16x1xf32>
    %8 = vector.broadcast %7 : vector<16x1xf32> to vector<16x128xf32>
    %9 = arith.subf %5, %8 : vector<16x128xf32>
    %10 = math.exp %9 : vector<16x128xf32>
    %cst_6 = arith.constant dense<0.000000e+00> : vector<16xf32>
    %11 = vector.multi_reduction <add>, %10, %cst_6 [1] : vector<16x128xf32> to vector<16xf32>
    %12 = vector.shape_cast %11 : vector<16xf32> to vector<16x1xf32>
    %13 = math.log %12 : vector<16x1xf32>
    %14 = vector.broadcast %13 : vector<16x1xf32> to vector<16x128xf32>
    %15 = arith.subf %9, %14 : vector<16x128xf32>
    %c0_7 = arith.constant 0 : index
    %c0_8 = arith.constant 0 : index
    %16 = vector.load %arg4[%c0_7, %c0_8] : memref<16x128xf32, #tpu.memory_space<vmem>>, vector<16x128xf32>
    tpu.vector_store %arg4[%c0_7, %c0_8], %15 {strides = array<i32>} : memref<16x128xf32, #tpu.memory_space<vmem>>, vector<16x128xf32>,
    return
  }
  func.func @transform_0(%arg0: i32) -> (i32, i32) {
    %c0_i32 = arith.constant 0 : i32
    %c0_i32_0 = arith.constant 0 : i32
    return %arg0, %c0_i32 : i32, i32
  }
  func.func @transform_1(%arg0: i32) -> (i32, i32) {
    %c0_i32 = arith.constant 0 : i32
    %c0_i32_0 = arith.constant 0 : i32
    %c0_i32_1 = arith.constant 0 : i32
    return %c0_i32, %c0_i32_0 : i32, i32
  }
  func.func @transform_2(%arg0: i32) -> (i32, i32) {
    %c0_i32 = arith.constant 0 : i32
    %c0_i32_0 = arith.constant 0 : i32
    %c0_i32_1 = arith.constant 0 : i32
    return %c0_i32, %c0_i32_0 : i32, i32
  }
  func.func @transform_3(%arg0: i32) -> (i32, i32) {
    %c0_i32 = arith.constant 0 : i32
    %c0_i32_0 = arith.constant 0 : i32
    return %arg0, %c0_i32 : i32, i32
  }
}

module attributes {stable_mosaic.version = 11 : i64} {
  func.func @bilstm_layer_kernel(%arg0: i32, %arg1: memref<8x2x256xf32, #tpu.memory_space<vmem>>, %arg2: memref<32x128xf32, #tpu.memory_space<vmem>>, %arg3: memref<32x128xf32, #tpu.memory_space<vmem>>, %arg4: memref<2x2x32xf32, #tpu.memory_space<vmem>>, %arg5: memref<2x2x32xf32, #tpu.memory_space<vmem>>, %arg6: memref<8x2x64xf32, #tpu.memory_space<vmem>>, %arg7: memref<2x2x32xf32, #tpu.memory_space<vmem>>, %arg8: memref<2x2x32xf32, #tpu.memory_space<vmem>>, %arg9: memref<2x32xf32, #tpu.memory_space<vmem>>, %arg10: memref<2x32xf32, #tpu.memory_space<vmem>>, %arg11: memref<2x32xf32, #tpu.memory_space<vmem>>, %arg12: memref<2x32xf32, #tpu.memory_space<vmem>>) attributes {dimension_semantics = [#tpu.dimension_semantics<arbitrary>], iteration_bounds = array<i64: 1>, scalar_prefetch = 0 : i64, scratch_operands = 4 : i64, tpu.core_type = #tpu.core_type<tc>, window_params = [{pipeline_mode = #tpu.pipeline_mode<synchronous>, transform_indices = @transform_0, window_bounds = array<i64: 8, 2, 256>}, {pipeline_mode = #tpu.pipeline_mode<synchronous>, transform_indices = @transform_1, window_bounds = array<i64: 32, 128>}, {pipeline_mode = #tpu.pipeline_mode<synchronous>, transform_indices = @transform_2, window_bounds = array<i64: 32, 128>}, {pipeline_mode = #tpu.pipeline_mode<synchronous>, transform_indices = @transform_3, window_bounds = array<i64: 2, 2, 32>}, {pipeline_mode = #tpu.pipeline_mode<synchronous>, transform_indices = @transform_4, window_bounds = array<i64: 2, 2, 32>}, {pipeline_mode = #tpu.pipeline_mode<synchronous>, transform_indices = @transform_5, window_bounds = array<i64: 8, 2, 64>}, {pipeline_mode = #tpu.pipeline_mode<synchronous>, transform_indices = @transform_6, window_bounds = array<i64: 2, 2, 32>}, {pipeline_mode = #tpu.pipeline_mode<synchronous>, transform_indices = @transform_7, window_bounds = array<i64: 2, 2, 32>}]} {
    %c0 = arith.constant 0 : index
    %c0_0 = arith.constant 0 : index
    %c0_1 = arith.constant 0 : index
    %0 = vector.load %arg4[%c0, %c0_0, %c0_1] : memref<2x2x32xf32, #tpu.memory_space<vmem>>, vector<1x2x32xf32>
    %1 = vector.shape_cast %0 : vector<1x2x32xf32> to vector<2x32xf32>
    %c0_2 = arith.constant 0 : index
    %c0_3 = arith.constant 0 : index
    %2 = vector.load %arg9[%c0_2, %c0_3] : memref<2x32xf32, #tpu.memory_space<vmem>>, vector<2x32xf32>
    tpu.vector_store %arg9[%c0_2, %c0_3], %1 {strides = array<i32>} : memref<2x32xf32, #tpu.memory_space<vmem>>, vector<2x32xf32>,
    %c0_4 = arith.constant 0 : index
    %c0_5 = arith.constant 0 : index
    %c0_6 = arith.constant 0 : index
    %3 = vector.load %arg5[%c0_4, %c0_5, %c0_6] : memref<2x2x32xf32, #tpu.memory_space<vmem>>, vector<1x2x32xf32>
    %4 = vector.shape_cast %3 : vector<1x2x32xf32> to vector<2x32xf32>
    %c0_7 = arith.constant 0 : index
    %c0_8 = arith.constant 0 : index
    %5 = vector.load %arg10[%c0_7, %c0_8] : memref<2x32xf32, #tpu.memory_space<vmem>>, vector<2x32xf32>
    tpu.vector_store %arg10[%c0_7, %c0_8], %4 {strides = array<i32>} : memref<2x32xf32, #tpu.memory_space<vmem>>, vector<2x32xf32>,
    %c1 = arith.constant 1 : index
    %c0_9 = arith.constant 0 : index
    %c0_10 = arith.constant 0 : index
    %6 = vector.load %arg4[%c1, %c0_9, %c0_10] : memref<2x2x32xf32, #tpu.memory_space<vmem>>, vector<1x2x32xf32>
    %7 = vector.shape_cast %6 : vector<1x2x32xf32> to vector<2x32xf32>
    %c0_11 = arith.constant 0 : index
    %c0_12 = arith.constant 0 : index
    %8 = vector.load %arg11[%c0_11, %c0_12] : memref<2x32xf32, #tpu.memory_space<vmem>>, vector<2x32xf32>
    tpu.vector_store %arg11[%c0_11, %c0_12], %7 {strides = array<i32>} : memref<2x32xf32, #tpu.memory_space<vmem>>, vector<2x32xf32>,
    %c1_13 = arith.constant 1 : index
    %c0_14 = arith.constant 0 : index
    %c0_15 = arith.constant 0 : index
    %9 = vector.load %arg5[%c1_13, %c0_14, %c0_15] : memref<2x2x32xf32, #tpu.memory_space<vmem>>, vector<1x2x32xf32>
    %10 = vector.shape_cast %9 : vector<1x2x32xf32> to vector<2x32xf32>
    %c0_16 = arith.constant 0 : index
    %c0_17 = arith.constant 0 : index
    %11 = vector.load %arg12[%c0_16, %c0_17] : memref<2x32xf32, #tpu.memory_space<vmem>>, vector<2x32xf32>
    tpu.vector_store %arg12[%c0_16, %c0_17], %10 {strides = array<i32>} : memref<2x32xf32, #tpu.memory_space<vmem>>, vector<2x32xf32>,
    %c0_18 = arith.constant 0 : index
    %c0_19 = arith.constant 0 : index
    %c0_20 = arith.constant 0 : index
    %12 = vector.load %arg1[%c0_18, %c0_19, %c0_20] : memref<8x2x256xf32, #tpu.memory_space<vmem>>, vector<1x2x256xf32>
    %13 = vector.shape_cast %12 : vector<1x2x256xf32> to vector<2x256xf32>
    %14 = vector.extract_strided_slice %13 {offsets = [0, 0], sizes = [2, 128], strides = [1, 1]} : vector<2x256xf32> to vector<2x128xf32>
    %c7 = arith.constant 7 : index
    %c0_21 = arith.constant 0 : index
    %c0_22 = arith.constant 0 : index
    %15 = vector.load %arg1[%c7, %c0_21, %c0_22] : memref<8x2x256xf32, #tpu.memory_space<vmem>>, vector<1x2x256xf32>
    %16 = vector.shape_cast %15 : vector<1x2x256xf32> to vector<2x256xf32>
    %17 = vector.extract_strided_slice %16 {offsets = [0, 128], sizes = [2, 128], strides = [1, 1]} : vector<2x256xf32> to vector<2x128xf32>
    %c0_23 = arith.constant 0 : index
    %c0_24 = arith.constant 0 : index
    %18 = vector.load %arg9[%c0_23, %c0_24] : memref<2x32xf32, #tpu.memory_space<vmem>>, vector<2x32xf32>
    %c0_25 = arith.constant 0 : index
    %c0_26 = arith.constant 0 : index
    %19 = vector.load %arg10[%c0_25, %c0_26] : memref<2x32xf32, #tpu.memory_space<vmem>>, vector<2x32xf32>
    %c0_27 = arith.constant 0 : index
    %c0_28 = arith.constant 0 : index
    %20 = vector.load %arg2[%c0_27, %c0_28] : memref<32x128xf32, #tpu.memory_space<vmem>>, vector<32x128xf32>
    %cst = arith.constant dense<0.000000e+00> : vector<2x128xf32>
    %21 = tpu.matmul %18, %20, %cst {dimension_numbers = #tpu.dot_dimension_numbers<[1], [0], [0], [1], [0, 0, 1, 1], [], []>} : vector<2x32xf32>, vector<32x128xf32>, vector<2x128xf32> -> vector<2x128xf32>
    %22 = arith.addf %14, %21 : vector<2x128xf32>
    %23 = vector.extract_strided_slice %22 {offsets = [0, 0], sizes = [2, 32], strides = [1, 1]} : vector<2x128xf32> to vector<2x32xf32>
    %24 = arith.negf %23 : vector<2x32xf32>
    %25 = math.exp %24 : vector<2x32xf32>
    %cst_29 = arith.constant 1.000000e+00 : f32
    %26 = vector.broadcast %cst_29 : f32 to vector<2x32xf32>
    %27 = arith.addf %26, %25 : vector<2x32xf32>
    %28 = arith.divf %26, %27 : vector<2x32xf32>
    %29 = vector.extract_strided_slice %22 {offsets = [0, 32], sizes = [2, 32], strides = [1, 1]} : vector<2x128xf32> to vector<2x32xf32>
    %30 = arith.negf %29 : vector<2x32xf32>
    %31 = math.exp %30 : vector<2x32xf32>
    %cst_30 = arith.constant 1.000000e+00 : f32
    %32 = vector.broadcast %cst_30 : f32 to vector<2x32xf32>
    %33 = arith.addf %32, %31 : vector<2x32xf32>
    %34 = arith.divf %32, %33 : vector<2x32xf32>
    %35 = vector.extract_strided_slice %22 {offsets = [0, 64], sizes = [2, 32], strides = [1, 1]} : vector<2x128xf32> to vector<2x32xf32>
    %36 = math.tanh %35 : vector<2x32xf32>
    %37 = vector.extract_strided_slice %22 {offsets = [0, 96], sizes = [2, 32], strides = [1, 1]} : vector<2x128xf32> to vector<2x32xf32>
    %38 = arith.negf %37 : vector<2x32xf32>
    %39 = math.exp %38 : vector<2x32xf32>
    %cst_31 = arith.constant 1.000000e+00 : f32
    %40 = vector.broadcast %cst_31 : f32 to vector<2x32xf32>
    %41 = arith.addf %40, %39 : vector<2x32xf32>
    %42 = arith.divf %40, %41 : vector<2x32xf32>
    %43 = arith.mulf %34, %19 : vector<2x32xf32>
    %44 = arith.mulf %28, %36 : vector<2x32xf32>
    %45 = arith.addf %43, %44 : vector<2x32xf32>
    %46 = math.tanh %45 : vector<2x32xf32>
    %47 = arith.mulf %42, %46 : vector<2x32xf32>
    %c0_32 = arith.constant 0 : index
    %c0_33 = arith.constant 0 : index
    %48 = vector.load %arg11[%c0_32, %c0_33] : memref<2x32xf32, #tpu.memory_space<vmem>>, vector<2x32xf32>
    %c0_34 = arith.constant 0 : index
    %c0_35 = arith.constant 0 : index
    %49 = vector.load %arg12[%c0_34, %c0_35] : memref<2x32xf32, #tpu.memory_space<vmem>>, vector<2x32xf32>
    %c0_36 = arith.constant 0 : index
    %c0_37 = arith.constant 0 : index
    %50 = vector.load %arg3[%c0_36, %c0_37] : memref<32x128xf32, #tpu.memory_space<vmem>>, vector<32x128xf32>
    %cst_38 = arith.constant dense<0.000000e+00> : vector<2x128xf32>
    %51 = tpu.matmul %48, %50, %cst_38 {dimension_numbers = #tpu.dot_dimension_numbers<[1], [0], [0], [1], [0, 0, 1, 1], [], []>} : vector<2x32xf32>, vector<32x128xf32>, vector<2x128xf32> -> vector<2x128xf32>
    %52 = arith.addf %17, %51 : vector<2x128xf32>
    %53 = vector.extract_strided_slice %52 {offsets = [0, 0], sizes = [2, 32], strides = [1, 1]} : vector<2x128xf32> to vector<2x32xf32>
    %54 = arith.negf %53 : vector<2x32xf32>
    %55 = math.exp %54 : vector<2x32xf32>
    %cst_39 = arith.constant 1.000000e+00 : f32
    %56 = vector.broadcast %cst_39 : f32 to vector<2x32xf32>
    %57 = arith.addf %56, %55 : vector<2x32xf32>
    %58 = arith.divf %56, %57 : vector<2x32xf32>
    %59 = vector.extract_strided_slice %52 {offsets = [0, 32], sizes = [2, 32], strides = [1, 1]} : vector<2x128xf32> to vector<2x32xf32>
    %60 = arith.negf %59 : vector<2x32xf32>
    %61 = math.exp %60 : vector<2x32xf32>
    %cst_40 = arith.constant 1.000000e+00 : f32
    %62 = vector.broadcast %cst_40 : f32 to vector<2x32xf32>
    %63 = arith.addf %62, %61 : vector<2x32xf32>
    %64 = arith.divf %62, %63 : vector<2x32xf32>
    %65 = vector.extract_strided_slice %52 {offsets = [0, 64], sizes = [2, 32], strides = [1, 1]} : vector<2x128xf32> to vector<2x32xf32>
    %66 = math.tanh %65 : vector<2x32xf32>
    %67 = vector.extract_strided_slice %52 {offsets = [0, 96], sizes = [2, 32], strides = [1, 1]} : vector<2x128xf32> to vector<2x32xf32>
    %68 = arith.negf %67 : vector<2x32xf32>
    %69 = math.exp %68 : vector<2x32xf32>
    %cst_41 = arith.constant 1.000000e+00 : f32
    %70 = vector.broadcast %cst_41 : f32 to vector<2x32xf32>
    %71 = arith.addf %70, %69 : vector<2x32xf32>
    %72 = arith.divf %70, %71 : vector<2x32xf32>
    %73 = arith.mulf %64, %49 : vector<2x32xf32>
    %74 = arith.mulf %58, %66 : vector<2x32xf32>
    %75 = arith.addf %73, %74 : vector<2x32xf32>
    %76 = math.tanh %75 : vector<2x32xf32>
    %77 = arith.mulf %72, %76 : vector<2x32xf32>
    %c0_42 = arith.constant 0 : index
    %c0_43 = arith.constant 0 : index
    %78 = vector.load %arg9[%c0_42, %c0_43] : memref<2x32xf32, #tpu.memory_space<vmem>>, vector<2x32xf32>
    tpu.vector_store %arg9[%c0_42, %c0_43], %47 {strides = array<i32>} : memref<2x32xf32, #tpu.memory_space<vmem>>, vector<2x32xf32>,
    %c0_44 = arith.constant 0 : index
    %c0_45 = arith.constant 0 : index
    %79 = vector.load %arg10[%c0_44, %c0_45] : memref<2x32xf32, #tpu.memory_space<vmem>>, vector<2x32xf32>
    tpu.vector_store %arg10[%c0_44, %c0_45], %45 {strides = array<i32>} : memref<2x32xf32, #tpu.memory_space<vmem>>, vector<2x32xf32>,
    %c0_46 = arith.constant 0 : index
    %c0_47 = arith.constant 0 : index
    %80 = vector.load %arg11[%c0_46, %c0_47] : memref<2x32xf32, #tpu.memory_space<vmem>>, vector<2x32xf32>
    tpu.vector_store %arg11[%c0_46, %c0_47], %77 {strides = array<i32>} : memref<2x32xf32, #tpu.memory_space<vmem>>, vector<2x32xf32>,
    %c0_48 = arith.constant 0 : index
    %c0_49 = arith.constant 0 : index
    %81 = vector.load %arg12[%c0_48, %c0_49] : memref<2x32xf32, #tpu.memory_space<vmem>>, vector<2x32xf32>
    tpu.vector_store %arg12[%c0_48, %c0_49], %75 {strides = array<i32>} : memref<2x32xf32, #tpu.memory_space<vmem>>, vector<2x32xf32>,
    %c0_50 = arith.constant 0 : index
    %c0_51 = arith.constant 0 : index
    %c0_52 = arith.constant 0 : index
    %82 = vector.load %arg6[%c0_50, %c0_51, %c0_52] : memref<8x2x64xf32, #tpu.memory_space<vmem>>, vector<1x2x32xf32>
    %83 = vector.shape_cast %82 : vector<1x2x32xf32> to vector<2x32xf32>
    %84 = vector.shape_cast %47 : vector<2x32xf32> to vector<1x2x32xf32>
    tpu.vector_store %arg6[%c0_50, %c0_51, %c0_52], %84 {strides = array<i32>} : memref<8x2x64xf32, #tpu.memory_space<vmem>>, vector<1x2x32xf32>,
    %c7_53 = arith.constant 7 : index
    %c0_54 = arith.constant 0 : index
    %c32 = arith.constant 32 : index
    %85 = vector.load %arg6[%c7_53, %c0_54, %c32] : memref<8x2x64xf32, #tpu.memory_space<vmem>>, vector<1x2x32xf32>
    %86 = vector.shape_cast %85 : vector<1x2x32xf32> to vector<2x32xf32>
    %87 = vector.shape_cast %77 : vector<2x32xf32> to vector<1x2x32xf32>
    tpu.vector_store %arg6[%c7_53, %c0_54, %c32], %87 {strides = array<i32>} : memref<8x2x64xf32, #tpu.memory_space<vmem>>, vector<1x2x32xf32>,
    %c1_55 = arith.constant 1 : index
    %c0_56 = arith.constant 0 : index
    %c0_57 = arith.constant 0 : index
    %88 = vector.load %arg1[%c1_55, %c0_56, %c0_57] : memref<8x2x256xf32, #tpu.memory_space<vmem>>, vector<1x2x256xf32>
    %89 = vector.shape_cast %88 : vector<1x2x256xf32> to vector<2x256xf32>
    %90 = vector.extract_strided_slice %89 {offsets = [0, 0], sizes = [2, 128], strides = [1, 1]} : vector<2x256xf32> to vector<2x128xf32>
    %c6 = arith.constant 6 : index
    %c0_58 = arith.constant 0 : index
    %c0_59 = arith.constant 0 : index
    %91 = vector.load %arg1[%c6, %c0_58, %c0_59] : memref<8x2x256xf32, #tpu.memory_space<vmem>>, vector<1x2x256xf32>
    %92 = vector.shape_cast %91 : vector<1x2x256xf32> to vector<2x256xf32>
    %93 = vector.extract_strided_slice %92 {offsets = [0, 128], sizes = [2, 128], strides = [1, 1]} : vector<2x256xf32> to vector<2x128xf32>
    %c0_60 = arith.constant 0 : index
    %c0_61 = arith.constant 0 : index
    %94 = vector.load %arg9[%c0_60, %c0_61] : memref<2x32xf32, #tpu.memory_space<vmem>>, vector<2x32xf32>
    %c0_62 = arith.constant 0 : index
    %c0_63 = arith.constant 0 : index
    %95 = vector.load %arg10[%c0_62, %c0_63] : memref<2x32xf32, #tpu.memory_space<vmem>>, vector<2x32xf32>
    %c0_64 = arith.constant 0 : index
    %c0_65 = arith.constant 0 : index
    %96 = vector.load %arg2[%c0_64, %c0_65] : memref<32x128xf32, #tpu.memory_space<vmem>>, vector<32x128xf32>
    %cst_66 = arith.constant dense<0.000000e+00> : vector<2x128xf32>
    %97 = tpu.matmul %94, %96, %cst_66 {dimension_numbers = #tpu.dot_dimension_numbers<[1], [0], [0], [1], [0, 0, 1, 1], [], []>} : vector<2x32xf32>, vector<32x128xf32>, vector<2x128xf32> -> vector<2x128xf32>
    %98 = arith.addf %90, %97 : vector<2x128xf32>
    %99 = vector.extract_strided_slice %98 {offsets = [0, 0], sizes = [2, 32], strides = [1, 1]} : vector<2x128xf32> to vector<2x32xf32>
    %100 = arith.negf %99 : vector<2x32xf32>
    %101 = math.exp %100 : vector<2x32xf32>
    %cst_67 = arith.constant 1.000000e+00 : f32
    %102 = vector.broadcast %cst_67 : f32 to vector<2x32xf32>
    %103 = arith.addf %102, %101 : vector<2x32xf32>
    %104 = arith.divf %102, %103 : vector<2x32xf32>
    %105 = vector.extract_strided_slice %98 {offsets = [0, 32], sizes = [2, 32], strides = [1, 1]} : vector<2x128xf32> to vector<2x32xf32>
    %106 = arith.negf %105 : vector<2x32xf32>
    %107 = math.exp %106 : vector<2x32xf32>
    %cst_68 = arith.constant 1.000000e+00 : f32
    %108 = vector.broadcast %cst_68 : f32 to vector<2x32xf32>
    %109 = arith.addf %108, %107 : vector<2x32xf32>
    %110 = arith.divf %108, %109 : vector<2x32xf32>
    %111 = vector.extract_strided_slice %98 {offsets = [0, 64], sizes = [2, 32], strides = [1, 1]} : vector<2x128xf32> to vector<2x32xf32>
    %112 = math.tanh %111 : vector<2x32xf32>
    %113 = vector.extract_strided_slice %98 {offsets = [0, 96], sizes = [2, 32], strides = [1, 1]} : vector<2x128xf32> to vector<2x32xf32>
    %114 = arith.negf %113 : vector<2x32xf32>
    %115 = math.exp %114 : vector<2x32xf32>
    %cst_69 = arith.constant 1.000000e+00 : f32
    %116 = vector.broadcast %cst_69 : f32 to vector<2x32xf32>
    %117 = arith.addf %116, %115 : vector<2x32xf32>
    %118 = arith.divf %116, %117 : vector<2x32xf32>
    %119 = arith.mulf %110, %95 : vector<2x32xf32>
    %120 = arith.mulf %104, %112 : vector<2x32xf32>
    %121 = arith.addf %119, %120 : vector<2x32xf32>
    %122 = math.tanh %121 : vector<2x32xf32>
    %123 = arith.mulf %118, %122 : vector<2x32xf32>
    %c0_70 = arith.constant 0 : index
    %c0_71 = arith.constant 0 : index
    %124 = vector.load %arg11[%c0_70, %c0_71] : memref<2x32xf32, #tpu.memory_space<vmem>>, vector<2x32xf32>
    %c0_72 = arith.constant 0 : index
    %c0_73 = arith.constant 0 : index
    %125 = vector.load %arg12[%c0_72, %c0_73] : memref<2x32xf32, #tpu.memory_space<vmem>>, vector<2x32xf32>
    %c0_74 = arith.constant 0 : index
    %c0_75 = arith.constant 0 : index
    %126 = vector.load %arg3[%c0_74, %c0_75] : memref<32x128xf32, #tpu.memory_space<vmem>>, vector<32x128xf32>
    %cst_76 = arith.constant dense<0.000000e+00> : vector<2x128xf32>
    %127 = tpu.matmul %124, %126, %cst_76 {dimension_numbers = #tpu.dot_dimension_numbers<[1], [0], [0], [1], [0, 0, 1, 1], [], []>} : vector<2x32xf32>, vector<32x128xf32>, vector<2x128xf32> -> vector<2x128xf32>
    %128 = arith.addf %93, %127 : vector<2x128xf32>
    %129 = vector.extract_strided_slice %128 {offsets = [0, 0], sizes = [2, 32], strides = [1, 1]} : vector<2x128xf32> to vector<2x32xf32>
    %130 = arith.negf %129 : vector<2x32xf32>
    %131 = math.exp %130 : vector<2x32xf32>
    %cst_77 = arith.constant 1.000000e+00 : f32
    %132 = vector.broadcast %cst_77 : f32 to vector<2x32xf32>
    %133 = arith.addf %132, %131 : vector<2x32xf32>
    %134 = arith.divf %132, %133 : vector<2x32xf32>
    %135 = vector.extract_strided_slice %128 {offsets = [0, 32], sizes = [2, 32], strides = [1, 1]} : vector<2x128xf32> to vector<2x32xf32>
    %136 = arith.negf %135 : vector<2x32xf32>
    %137 = math.exp %136 : vector<2x32xf32>
    %cst_78 = arith.constant 1.000000e+00 : f32
    %138 = vector.broadcast %cst_78 : f32 to vector<2x32xf32>
    %139 = arith.addf %138, %137 : vector<2x32xf32>
    %140 = arith.divf %138, %139 : vector<2x32xf32>
    %141 = vector.extract_strided_slice %128 {offsets = [0, 64], sizes = [2, 32], strides = [1, 1]} : vector<2x128xf32> to vector<2x32xf32>
    %142 = math.tanh %141 : vector<2x32xf32>
    %143 = vector.extract_strided_slice %128 {offsets = [0, 96], sizes = [2, 32], strides = [1, 1]} : vector<2x128xf32> to vector<2x32xf32>
    %144 = arith.negf %143 : vector<2x32xf32>
    %145 = math.exp %144 : vector<2x32xf32>
    %cst_79 = arith.constant 1.000000e+00 : f32
    %146 = vector.broadcast %cst_79 : f32 to vector<2x32xf32>
    %147 = arith.addf %146, %145 : vector<2x32xf32>
    %148 = arith.divf %146, %147 : vector<2x32xf32>
    %149 = arith.mulf %140, %125 : vector<2x32xf32>
    %150 = arith.mulf %134, %142 : vector<2x32xf32>
    %151 = arith.addf %149, %150 : vector<2x32xf32>
    %152 = math.tanh %151 : vector<2x32xf32>
    %153 = arith.mulf %148, %152 : vector<2x32xf32>
    %c0_80 = arith.constant 0 : index
    %c0_81 = arith.constant 0 : index
    %154 = vector.load %arg9[%c0_80, %c0_81] : memref<2x32xf32, #tpu.memory_space<vmem>>, vector<2x32xf32>
    tpu.vector_store %arg9[%c0_80, %c0_81], %123 {strides = array<i32>} : memref<2x32xf32, #tpu.memory_space<vmem>>, vector<2x32xf32>,
    %c0_82 = arith.constant 0 : index
    %c0_83 = arith.constant 0 : index
    %155 = vector.load %arg10[%c0_82, %c0_83] : memref<2x32xf32, #tpu.memory_space<vmem>>, vector<2x32xf32>
    tpu.vector_store %arg10[%c0_82, %c0_83], %121 {strides = array<i32>} : memref<2x32xf32, #tpu.memory_space<vmem>>, vector<2x32xf32>,
    %c0_84 = arith.constant 0 : index
    %c0_85 = arith.constant 0 : index
    %156 = vector.load %arg11[%c0_84, %c0_85] : memref<2x32xf32, #tpu.memory_space<vmem>>, vector<2x32xf32>
    tpu.vector_store %arg11[%c0_84, %c0_85], %153 {strides = array<i32>} : memref<2x32xf32, #tpu.memory_space<vmem>>, vector<2x32xf32>,
    %c0_86 = arith.constant 0 : index
    %c0_87 = arith.constant 0 : index
    %157 = vector.load %arg12[%c0_86, %c0_87] : memref<2x32xf32, #tpu.memory_space<vmem>>, vector<2x32xf32>
    tpu.vector_store %arg12[%c0_86, %c0_87], %151 {strides = array<i32>} : memref<2x32xf32, #tpu.memory_space<vmem>>, vector<2x32xf32>,
    %c1_88 = arith.constant 1 : index
    %c0_89 = arith.constant 0 : index
    %c0_90 = arith.constant 0 : index
    %158 = vector.load %arg6[%c1_88, %c0_89, %c0_90] : memref<8x2x64xf32, #tpu.memory_space<vmem>>, vector<1x2x32xf32>
    %159 = vector.shape_cast %158 : vector<1x2x32xf32> to vector<2x32xf32>
    %160 = vector.shape_cast %123 : vector<2x32xf32> to vector<1x2x32xf32>
    tpu.vector_store %arg6[%c1_88, %c0_89, %c0_90], %160 {strides = array<i32>} : memref<8x2x64xf32, #tpu.memory_space<vmem>>, vector<1x2x32xf32>,
    %c6_91 = arith.constant 6 : index
    %c0_92 = arith.constant 0 : index
    %c32_93 = arith.constant 32 : index
    %161 = vector.load %arg6[%c6_91, %c0_92, %c32_93] : memref<8x2x64xf32, #tpu.memory_space<vmem>>, vector<1x2x32xf32>
    %162 = vector.shape_cast %161 : vector<1x2x32xf32> to vector<2x32xf32>
    %163 = vector.shape_cast %153 : vector<2x32xf32> to vector<1x2x32xf32>
    tpu.vector_store %arg6[%c6_91, %c0_92, %c32_93], %163 {strides = array<i32>} : memref<8x2x64xf32, #tpu.memory_space<vmem>>, vector<1x2x32xf32>,
    %c2 = arith.constant 2 : index
    %c0_94 = arith.constant 0 : index
    %c0_95 = arith.constant 0 : index
    %164 = vector.load %arg1[%c2, %c0_94, %c0_95] : memref<8x2x256xf32, #tpu.memory_space<vmem>>, vector<1x2x256xf32>
    %165 = vector.shape_cast %164 : vector<1x2x256xf32> to vector<2x256xf32>
    %166 = vector.extract_strided_slice %165 {offsets = [0, 0], sizes = [2, 128], strides = [1, 1]} : vector<2x256xf32> to vector<2x128xf32>
    %c5 = arith.constant 5 : index
    %c0_96 = arith.constant 0 : index
    %c0_97 = arith.constant 0 : index
    %167 = vector.load %arg1[%c5, %c0_96, %c0_97] : memref<8x2x256xf32, #tpu.memory_space<vmem>>, vector<1x2x256xf32>
    %168 = vector.shape_cast %167 : vector<1x2x256xf32> to vector<2x256xf32>
    %169 = vector.extract_strided_slice %168 {offsets = [0, 128], sizes = [2, 128], strides = [1, 1]} : vector<2x256xf32> to vector<2x128xf32>
    %c0_98 = arith.constant 0 : index
    %c0_99 = arith.constant 0 : index
    %170 = vector.load %arg9[%c0_98, %c0_99] : memref<2x32xf32, #tpu.memory_space<vmem>>, vector<2x32xf32>
    %c0_100 = arith.constant 0 : index
    %c0_101 = arith.constant 0 : index
    %171 = vector.load %arg10[%c0_100, %c0_101] : memref<2x32xf32, #tpu.memory_space<vmem>>, vector<2x32xf32>
    %c0_102 = arith.constant 0 : index
    %c0_103 = arith.constant 0 : index
    %172 = vector.load %arg2[%c0_102, %c0_103] : memref<32x128xf32, #tpu.memory_space<vmem>>, vector<32x128xf32>
    %cst_104 = arith.constant dense<0.000000e+00> : vector<2x128xf32>
    %173 = tpu.matmul %170, %172, %cst_104 {dimension_numbers = #tpu.dot_dimension_numbers<[1], [0], [0], [1], [0, 0, 1, 1], [], []>} : vector<2x32xf32>, vector<32x128xf32>, vector<2x128xf32> -> vector<2x128xf32>
    %174 = arith.addf %166, %173 : vector<2x128xf32>
    %175 = vector.extract_strided_slice %174 {offsets = [0, 0], sizes = [2, 32], strides = [1, 1]} : vector<2x128xf32> to vector<2x32xf32>
    %176 = arith.negf %175 : vector<2x32xf32>
    %177 = math.exp %176 : vector<2x32xf32>
    %cst_105 = arith.constant 1.000000e+00 : f32
    %178 = vector.broadcast %cst_105 : f32 to vector<2x32xf32>
    %179 = arith.addf %178, %177 : vector<2x32xf32>
    %180 = arith.divf %178, %179 : vector<2x32xf32>
    %181 = vector.extract_strided_slice %174 {offsets = [0, 32], sizes = [2, 32], strides = [1, 1]} : vector<2x128xf32> to vector<2x32xf32>
    %182 = arith.negf %181 : vector<2x32xf32>
    %183 = math.exp %182 : vector<2x32xf32>
    %cst_106 = arith.constant 1.000000e+00 : f32
    %184 = vector.broadcast %cst_106 : f32 to vector<2x32xf32>
    %185 = arith.addf %184, %183 : vector<2x32xf32>
    %186 = arith.divf %184, %185 : vector<2x32xf32>
    %187 = vector.extract_strided_slice %174 {offsets = [0, 64], sizes = [2, 32], strides = [1, 1]} : vector<2x128xf32> to vector<2x32xf32>
    %188 = math.tanh %187 : vector<2x32xf32>
    %189 = vector.extract_strided_slice %174 {offsets = [0, 96], sizes = [2, 32], strides = [1, 1]} : vector<2x128xf32> to vector<2x32xf32>
    %190 = arith.negf %189 : vector<2x32xf32>
    %191 = math.exp %190 : vector<2x32xf32>
    %cst_107 = arith.constant 1.000000e+00 : f32
    %192 = vector.broadcast %cst_107 : f32 to vector<2x32xf32>
    %193 = arith.addf %192, %191 : vector<2x32xf32>
    %194 = arith.divf %192, %193 : vector<2x32xf32>
    %195 = arith.mulf %186, %171 : vector<2x32xf32>
    %196 = arith.mulf %180, %188 : vector<2x32xf32>
    %197 = arith.addf %195, %196 : vector<2x32xf32>
    %198 = math.tanh %197 : vector<2x32xf32>
    %199 = arith.mulf %194, %198 : vector<2x32xf32>
    %c0_108 = arith.constant 0 : index
    %c0_109 = arith.constant 0 : index
    %200 = vector.load %arg11[%c0_108, %c0_109] : memref<2x32xf32, #tpu.memory_space<vmem>>, vector<2x32xf32>
    %c0_110 = arith.constant 0 : index
    %c0_111 = arith.constant 0 : index
    %201 = vector.load %arg12[%c0_110, %c0_111] : memref<2x32xf32, #tpu.memory_space<vmem>>, vector<2x32xf32>
    %c0_112 = arith.constant 0 : index
    %c0_113 = arith.constant 0 : index
    %202 = vector.load %arg3[%c0_112, %c0_113] : memref<32x128xf32, #tpu.memory_space<vmem>>, vector<32x128xf32>
    %cst_114 = arith.constant dense<0.000000e+00> : vector<2x128xf32>
    %203 = tpu.matmul %200, %202, %cst_114 {dimension_numbers = #tpu.dot_dimension_numbers<[1], [0], [0], [1], [0, 0, 1, 1], [], []>} : vector<2x32xf32>, vector<32x128xf32>, vector<2x128xf32> -> vector<2x128xf32>
    %204 = arith.addf %169, %203 : vector<2x128xf32>
    %205 = vector.extract_strided_slice %204 {offsets = [0, 0], sizes = [2, 32], strides = [1, 1]} : vector<2x128xf32> to vector<2x32xf32>
    %206 = arith.negf %205 : vector<2x32xf32>
    %207 = math.exp %206 : vector<2x32xf32>
    %cst_115 = arith.constant 1.000000e+00 : f32
    %208 = vector.broadcast %cst_115 : f32 to vector<2x32xf32>
    %209 = arith.addf %208, %207 : vector<2x32xf32>
    %210 = arith.divf %208, %209 : vector<2x32xf32>
    %211 = vector.extract_strided_slice %204 {offsets = [0, 32], sizes = [2, 32], strides = [1, 1]} : vector<2x128xf32> to vector<2x32xf32>
    %212 = arith.negf %211 : vector<2x32xf32>
    %213 = math.exp %212 : vector<2x32xf32>
    %cst_116 = arith.constant 1.000000e+00 : f32
    %214 = vector.broadcast %cst_116 : f32 to vector<2x32xf32>
    %215 = arith.addf %214, %213 : vector<2x32xf32>
    %216 = arith.divf %214, %215 : vector<2x32xf32>
    %217 = vector.extract_strided_slice %204 {offsets = [0, 64], sizes = [2, 32], strides = [1, 1]} : vector<2x128xf32> to vector<2x32xf32>
    %218 = math.tanh %217 : vector<2x32xf32>
    %219 = vector.extract_strided_slice %204 {offsets = [0, 96], sizes = [2, 32], strides = [1, 1]} : vector<2x128xf32> to vector<2x32xf32>
    %220 = arith.negf %219 : vector<2x32xf32>
    %221 = math.exp %220 : vector<2x32xf32>
    %cst_117 = arith.constant 1.000000e+00 : f32
    %222 = vector.broadcast %cst_117 : f32 to vector<2x32xf32>
    %223 = arith.addf %222, %221 : vector<2x32xf32>
    %224 = arith.divf %222, %223 : vector<2x32xf32>
    %225 = arith.mulf %216, %201 : vector<2x32xf32>
    %226 = arith.mulf %210, %218 : vector<2x32xf32>
    %227 = arith.addf %225, %226 : vector<2x32xf32>
    %228 = math.tanh %227 : vector<2x32xf32>
    %229 = arith.mulf %224, %228 : vector<2x32xf32>
    %c0_118 = arith.constant 0 : index
    %c0_119 = arith.constant 0 : index
    %230 = vector.load %arg9[%c0_118, %c0_119] : memref<2x32xf32, #tpu.memory_space<vmem>>, vector<2x32xf32>
    tpu.vector_store %arg9[%c0_118, %c0_119], %199 {strides = array<i32>} : memref<2x32xf32, #tpu.memory_space<vmem>>, vector<2x32xf32>,
    %c0_120 = arith.constant 0 : index
    %c0_121 = arith.constant 0 : index
    %231 = vector.load %arg10[%c0_120, %c0_121] : memref<2x32xf32, #tpu.memory_space<vmem>>, vector<2x32xf32>
    tpu.vector_store %arg10[%c0_120, %c0_121], %197 {strides = array<i32>} : memref<2x32xf32, #tpu.memory_space<vmem>>, vector<2x32xf32>,
    %c0_122 = arith.constant 0 : index
    %c0_123 = arith.constant 0 : index
    %232 = vector.load %arg11[%c0_122, %c0_123] : memref<2x32xf32, #tpu.memory_space<vmem>>, vector<2x32xf32>
    tpu.vector_store %arg11[%c0_122, %c0_123], %229 {strides = array<i32>} : memref<2x32xf32, #tpu.memory_space<vmem>>, vector<2x32xf32>,
    %c0_124 = arith.constant 0 : index
    %c0_125 = arith.constant 0 : index
    %233 = vector.load %arg12[%c0_124, %c0_125] : memref<2x32xf32, #tpu.memory_space<vmem>>, vector<2x32xf32>
    tpu.vector_store %arg12[%c0_124, %c0_125], %227 {strides = array<i32>} : memref<2x32xf32, #tpu.memory_space<vmem>>, vector<2x32xf32>,
    %c2_126 = arith.constant 2 : index
    %c0_127 = arith.constant 0 : index
    %c0_128 = arith.constant 0 : index
    %234 = vector.load %arg6[%c2_126, %c0_127, %c0_128] : memref<8x2x64xf32, #tpu.memory_space<vmem>>, vector<1x2x32xf32>
    %235 = vector.shape_cast %234 : vector<1x2x32xf32> to vector<2x32xf32>
    %236 = vector.shape_cast %199 : vector<2x32xf32> to vector<1x2x32xf32>
    tpu.vector_store %arg6[%c2_126, %c0_127, %c0_128], %236 {strides = array<i32>} : memref<8x2x64xf32, #tpu.memory_space<vmem>>, vector<1x2x32xf32>,
    %c5_129 = arith.constant 5 : index
    %c0_130 = arith.constant 0 : index
    %c32_131 = arith.constant 32 : index
    %237 = vector.load %arg6[%c5_129, %c0_130, %c32_131] : memref<8x2x64xf32, #tpu.memory_space<vmem>>, vector<1x2x32xf32>
    %238 = vector.shape_cast %237 : vector<1x2x32xf32> to vector<2x32xf32>
    %239 = vector.shape_cast %229 : vector<2x32xf32> to vector<1x2x32xf32>
    tpu.vector_store %arg6[%c5_129, %c0_130, %c32_131], %239 {strides = array<i32>} : memref<8x2x64xf32, #tpu.memory_space<vmem>>, vector<1x2x32xf32>,
    %c3 = arith.constant 3 : index
    %c0_132 = arith.constant 0 : index
    %c0_133 = arith.constant 0 : index
    %240 = vector.load %arg1[%c3, %c0_132, %c0_133] : memref<8x2x256xf32, #tpu.memory_space<vmem>>, vector<1x2x256xf32>
    %241 = vector.shape_cast %240 : vector<1x2x256xf32> to vector<2x256xf32>
    %242 = vector.extract_strided_slice %241 {offsets = [0, 0], sizes = [2, 128], strides = [1, 1]} : vector<2x256xf32> to vector<2x128xf32>
    %c4 = arith.constant 4 : index
    %c0_134 = arith.constant 0 : index
    %c0_135 = arith.constant 0 : index
    %243 = vector.load %arg1[%c4, %c0_134, %c0_135] : memref<8x2x256xf32, #tpu.memory_space<vmem>>, vector<1x2x256xf32>
    %244 = vector.shape_cast %243 : vector<1x2x256xf32> to vector<2x256xf32>
    %245 = vector.extract_strided_slice %244 {offsets = [0, 128], sizes = [2, 128], strides = [1, 1]} : vector<2x256xf32> to vector<2x128xf32>
    %c0_136 = arith.constant 0 : index
    %c0_137 = arith.constant 0 : index
    %246 = vector.load %arg9[%c0_136, %c0_137] : memref<2x32xf32, #tpu.memory_space<vmem>>, vector<2x32xf32>
    %c0_138 = arith.constant 0 : index
    %c0_139 = arith.constant 0 : index
    %247 = vector.load %arg10[%c0_138, %c0_139] : memref<2x32xf32, #tpu.memory_space<vmem>>, vector<2x32xf32>
    %c0_140 = arith.constant 0 : index
    %c0_141 = arith.constant 0 : index
    %248 = vector.load %arg2[%c0_140, %c0_141] : memref<32x128xf32, #tpu.memory_space<vmem>>, vector<32x128xf32>
    %cst_142 = arith.constant dense<0.000000e+00> : vector<2x128xf32>
    %249 = tpu.matmul %246, %248, %cst_142 {dimension_numbers = #tpu.dot_dimension_numbers<[1], [0], [0], [1], [0, 0, 1, 1], [], []>} : vector<2x32xf32>, vector<32x128xf32>, vector<2x128xf32> -> vector<2x128xf32>
    %250 = arith.addf %242, %249 : vector<2x128xf32>
    %251 = vector.extract_strided_slice %250 {offsets = [0, 0], sizes = [2, 32], strides = [1, 1]} : vector<2x128xf32> to vector<2x32xf32>
    %252 = arith.negf %251 : vector<2x32xf32>
    %253 = math.exp %252 : vector<2x32xf32>
    %cst_143 = arith.constant 1.000000e+00 : f32
    %254 = vector.broadcast %cst_143 : f32 to vector<2x32xf32>
    %255 = arith.addf %254, %253 : vector<2x32xf32>
    %256 = arith.divf %254, %255 : vector<2x32xf32>
    %257 = vector.extract_strided_slice %250 {offsets = [0, 32], sizes = [2, 32], strides = [1, 1]} : vector<2x128xf32> to vector<2x32xf32>
    %258 = arith.negf %257 : vector<2x32xf32>
    %259 = math.exp %258 : vector<2x32xf32>
    %cst_144 = arith.constant 1.000000e+00 : f32
    %260 = vector.broadcast %cst_144 : f32 to vector<2x32xf32>
    %261 = arith.addf %260, %259 : vector<2x32xf32>
    %262 = arith.divf %260, %261 : vector<2x32xf32>
    %263 = vector.extract_strided_slice %250 {offsets = [0, 64], sizes = [2, 32], strides = [1, 1]} : vector<2x128xf32> to vector<2x32xf32>
    %264 = math.tanh %263 : vector<2x32xf32>
    %265 = vector.extract_strided_slice %250 {offsets = [0, 96], sizes = [2, 32], strides = [1, 1]} : vector<2x128xf32> to vector<2x32xf32>
    %266 = arith.negf %265 : vector<2x32xf32>
    %267 = math.exp %266 : vector<2x32xf32>
    %cst_145 = arith.constant 1.000000e+00 : f32
    %268 = vector.broadcast %cst_145 : f32 to vector<2x32xf32>
    %269 = arith.addf %268, %267 : vector<2x32xf32>
    %270 = arith.divf %268, %269 : vector<2x32xf32>
    %271 = arith.mulf %262, %247 : vector<2x32xf32>
    %272 = arith.mulf %256, %264 : vector<2x32xf32>
    %273 = arith.addf %271, %272 : vector<2x32xf32>
    %274 = math.tanh %273 : vector<2x32xf32>
    %275 = arith.mulf %270, %274 : vector<2x32xf32>
    %c0_146 = arith.constant 0 : index
    %c0_147 = arith.constant 0 : index
    %276 = vector.load %arg11[%c0_146, %c0_147] : memref<2x32xf32, #tpu.memory_space<vmem>>, vector<2x32xf32>
    %c0_148 = arith.constant 0 : index
    %c0_149 = arith.constant 0 : index
    %277 = vector.load %arg12[%c0_148, %c0_149] : memref<2x32xf32, #tpu.memory_space<vmem>>, vector<2x32xf32>
    %c0_150 = arith.constant 0 : index
    %c0_151 = arith.constant 0 : index
    %278 = vector.load %arg3[%c0_150, %c0_151] : memref<32x128xf32, #tpu.memory_space<vmem>>, vector<32x128xf32>
    %cst_152 = arith.constant dense<0.000000e+00> : vector<2x128xf32>
    %279 = tpu.matmul %276, %278, %cst_152 {dimension_numbers = #tpu.dot_dimension_numbers<[1], [0], [0], [1], [0, 0, 1, 1], [], []>} : vector<2x32xf32>, vector<32x128xf32>, vector<2x128xf32> -> vector<2x128xf32>
    %280 = arith.addf %245, %279 : vector<2x128xf32>
    %281 = vector.extract_strided_slice %280 {offsets = [0, 0], sizes = [2, 32], strides = [1, 1]} : vector<2x128xf32> to vector<2x32xf32>
    %282 = arith.negf %281 : vector<2x32xf32>
    %283 = math.exp %282 : vector<2x32xf32>
    %cst_153 = arith.constant 1.000000e+00 : f32
    %284 = vector.broadcast %cst_153 : f32 to vector<2x32xf32>
    %285 = arith.addf %284, %283 : vector<2x32xf32>
    %286 = arith.divf %284, %285 : vector<2x32xf32>
    %287 = vector.extract_strided_slice %280 {offsets = [0, 32], sizes = [2, 32], strides = [1, 1]} : vector<2x128xf32> to vector<2x32xf32>
    %288 = arith.negf %287 : vector<2x32xf32>
    %289 = math.exp %288 : vector<2x32xf32>
    %cst_154 = arith.constant 1.000000e+00 : f32
    %290 = vector.broadcast %cst_154 : f32 to vector<2x32xf32>
    %291 = arith.addf %290, %289 : vector<2x32xf32>
    %292 = arith.divf %290, %291 : vector<2x32xf32>
    %293 = vector.extract_strided_slice %280 {offsets = [0, 64], sizes = [2, 32], strides = [1, 1]} : vector<2x128xf32> to vector<2x32xf32>
    %294 = math.tanh %293 : vector<2x32xf32>
    %295 = vector.extract_strided_slice %280 {offsets = [0, 96], sizes = [2, 32], strides = [1, 1]} : vector<2x128xf32> to vector<2x32xf32>
    %296 = arith.negf %295 : vector<2x32xf32>
    %297 = math.exp %296 : vector<2x32xf32>
    %cst_155 = arith.constant 1.000000e+00 : f32
    %298 = vector.broadcast %cst_155 : f32 to vector<2x32xf32>
    %299 = arith.addf %298, %297 : vector<2x32xf32>
    %300 = arith.divf %298, %299 : vector<2x32xf32>
    %301 = arith.mulf %292, %277 : vector<2x32xf32>
    %302 = arith.mulf %286, %294 : vector<2x32xf32>
    %303 = arith.addf %301, %302 : vector<2x32xf32>
    %304 = math.tanh %303 : vector<2x32xf32>
    %305 = arith.mulf %300, %304 : vector<2x32xf32>
    %c0_156 = arith.constant 0 : index
    %c0_157 = arith.constant 0 : index
    %306 = vector.load %arg9[%c0_156, %c0_157] : memref<2x32xf32, #tpu.memory_space<vmem>>, vector<2x32xf32>
    tpu.vector_store %arg9[%c0_156, %c0_157], %275 {strides = array<i32>} : memref<2x32xf32, #tpu.memory_space<vmem>>, vector<2x32xf32>,
    %c0_158 = arith.constant 0 : index
    %c0_159 = arith.constant 0 : index
    %307 = vector.load %arg10[%c0_158, %c0_159] : memref<2x32xf32, #tpu.memory_space<vmem>>, vector<2x32xf32>
    tpu.vector_store %arg10[%c0_158, %c0_159], %273 {strides = array<i32>} : memref<2x32xf32, #tpu.memory_space<vmem>>, vector<2x32xf32>,
    %c0_160 = arith.constant 0 : index
    %c0_161 = arith.constant 0 : index
    %308 = vector.load %arg11[%c0_160, %c0_161] : memref<2x32xf32, #tpu.memory_space<vmem>>, vector<2x32xf32>
    tpu.vector_store %arg11[%c0_160, %c0_161], %305 {strides = array<i32>} : memref<2x32xf32, #tpu.memory_space<vmem>>, vector<2x32xf32>,
    %c0_162 = arith.constant 0 : index
    %c0_163 = arith.constant 0 : index
    %309 = vector.load %arg12[%c0_162, %c0_163] : memref<2x32xf32, #tpu.memory_space<vmem>>, vector<2x32xf32>
    tpu.vector_store %arg12[%c0_162, %c0_163], %303 {strides = array<i32>} : memref<2x32xf32, #tpu.memory_space<vmem>>, vector<2x32xf32>,
    %c3_164 = arith.constant 3 : index
    %c0_165 = arith.constant 0 : index
    %c0_166 = arith.constant 0 : index
    %310 = vector.load %arg6[%c3_164, %c0_165, %c0_166] : memref<8x2x64xf32, #tpu.memory_space<vmem>>, vector<1x2x32xf32>
    %311 = vector.shape_cast %310 : vector<1x2x32xf32> to vector<2x32xf32>
    %312 = vector.shape_cast %275 : vector<2x32xf32> to vector<1x2x32xf32>
    tpu.vector_store %arg6[%c3_164, %c0_165, %c0_166], %312 {strides = array<i32>} : memref<8x2x64xf32, #tpu.memory_space<vmem>>, vector<1x2x32xf32>,
    %c4_167 = arith.constant 4 : index
    %c0_168 = arith.constant 0 : index
    %c32_169 = arith.constant 32 : index
    %313 = vector.load %arg6[%c4_167, %c0_168, %c32_169] : memref<8x2x64xf32, #tpu.memory_space<vmem>>, vector<1x2x32xf32>
    %314 = vector.shape_cast %313 : vector<1x2x32xf32> to vector<2x32xf32>
    %315 = vector.shape_cast %305 : vector<2x32xf32> to vector<1x2x32xf32>
    tpu.vector_store %arg6[%c4_167, %c0_168, %c32_169], %315 {strides = array<i32>} : memref<8x2x64xf32, #tpu.memory_space<vmem>>, vector<1x2x32xf32>,
    %c4_170 = arith.constant 4 : index
    %c0_171 = arith.constant 0 : index
    %c0_172 = arith.constant 0 : index
    %316 = vector.load %arg1[%c4_170, %c0_171, %c0_172] : memref<8x2x256xf32, #tpu.memory_space<vmem>>, vector<1x2x256xf32>
    %317 = vector.shape_cast %316 : vector<1x2x256xf32> to vector<2x256xf32>
    %318 = vector.extract_strided_slice %317 {offsets = [0, 0], sizes = [2, 128], strides = [1, 1]} : vector<2x256xf32> to vector<2x128xf32>
    %c3_173 = arith.constant 3 : index
    %c0_174 = arith.constant 0 : index
    %c0_175 = arith.constant 0 : index
    %319 = vector.load %arg1[%c3_173, %c0_174, %c0_175] : memref<8x2x256xf32, #tpu.memory_space<vmem>>, vector<1x2x256xf32>
    %320 = vector.shape_cast %319 : vector<1x2x256xf32> to vector<2x256xf32>
    %321 = vector.extract_strided_slice %320 {offsets = [0, 128], sizes = [2, 128], strides = [1, 1]} : vector<2x256xf32> to vector<2x128xf32>
    %c0_176 = arith.constant 0 : index
    %c0_177 = arith.constant 0 : index
    %322 = vector.load %arg9[%c0_176, %c0_177] : memref<2x32xf32, #tpu.memory_space<vmem>>, vector<2x32xf32>
    %c0_178 = arith.constant 0 : index
    %c0_179 = arith.constant 0 : index
    %323 = vector.load %arg10[%c0_178, %c0_179] : memref<2x32xf32, #tpu.memory_space<vmem>>, vector<2x32xf32>
    %c0_180 = arith.constant 0 : index
    %c0_181 = arith.constant 0 : index
    %324 = vector.load %arg2[%c0_180, %c0_181] : memref<32x128xf32, #tpu.memory_space<vmem>>, vector<32x128xf32>
    %cst_182 = arith.constant dense<0.000000e+00> : vector<2x128xf32>
    %325 = tpu.matmul %322, %324, %cst_182 {dimension_numbers = #tpu.dot_dimension_numbers<[1], [0], [0], [1], [0, 0, 1, 1], [], []>} : vector<2x32xf32>, vector<32x128xf32>, vector<2x128xf32> -> vector<2x128xf32>
    %326 = arith.addf %318, %325 : vector<2x128xf32>
    %327 = vector.extract_strided_slice %326 {offsets = [0, 0], sizes = [2, 32], strides = [1, 1]} : vector<2x128xf32> to vector<2x32xf32>
    %328 = arith.negf %327 : vector<2x32xf32>
    %329 = math.exp %328 : vector<2x32xf32>
    %cst_183 = arith.constant 1.000000e+00 : f32
    %330 = vector.broadcast %cst_183 : f32 to vector<2x32xf32>
    %331 = arith.addf %330, %329 : vector<2x32xf32>
    %332 = arith.divf %330, %331 : vector<2x32xf32>
    %333 = vector.extract_strided_slice %326 {offsets = [0, 32], sizes = [2, 32], strides = [1, 1]} : vector<2x128xf32> to vector<2x32xf32>
    %334 = arith.negf %333 : vector<2x32xf32>
    %335 = math.exp %334 : vector<2x32xf32>
    %cst_184 = arith.constant 1.000000e+00 : f32
    %336 = vector.broadcast %cst_184 : f32 to vector<2x32xf32>
    %337 = arith.addf %336, %335 : vector<2x32xf32>
    %338 = arith.divf %336, %337 : vector<2x32xf32>
    %339 = vector.extract_strided_slice %326 {offsets = [0, 64], sizes = [2, 32], strides = [1, 1]} : vector<2x128xf32> to vector<2x32xf32>
    %340 = math.tanh %339 : vector<2x32xf32>
    %341 = vector.extract_strided_slice %326 {offsets = [0, 96], sizes = [2, 32], strides = [1, 1]} : vector<2x128xf32> to vector<2x32xf32>
    %342 = arith.negf %341 : vector<2x32xf32>
    %343 = math.exp %342 : vector<2x32xf32>
    %cst_185 = arith.constant 1.000000e+00 : f32
    %344 = vector.broadcast %cst_185 : f32 to vector<2x32xf32>
    %345 = arith.addf %344, %343 : vector<2x32xf32>
    %346 = arith.divf %344, %345 : vector<2x32xf32>
    %347 = arith.mulf %338, %323 : vector<2x32xf32>
    %348 = arith.mulf %332, %340 : vector<2x32xf32>
    %349 = arith.addf %347, %348 : vector<2x32xf32>
    %350 = math.tanh %349 : vector<2x32xf32>
    %351 = arith.mulf %346, %350 : vector<2x32xf32>
    %c0_186 = arith.constant 0 : index
    %c0_187 = arith.constant 0 : index
    %352 = vector.load %arg11[%c0_186, %c0_187] : memref<2x32xf32, #tpu.memory_space<vmem>>, vector<2x32xf32>
    %c0_188 = arith.constant 0 : index
    %c0_189 = arith.constant 0 : index
    %353 = vector.load %arg12[%c0_188, %c0_189] : memref<2x32xf32, #tpu.memory_space<vmem>>, vector<2x32xf32>
    %c0_190 = arith.constant 0 : index
    %c0_191 = arith.constant 0 : index
    %354 = vector.load %arg3[%c0_190, %c0_191] : memref<32x128xf32, #tpu.memory_space<vmem>>, vector<32x128xf32>
    %cst_192 = arith.constant dense<0.000000e+00> : vector<2x128xf32>
    %355 = tpu.matmul %352, %354, %cst_192 {dimension_numbers = #tpu.dot_dimension_numbers<[1], [0], [0], [1], [0, 0, 1, 1], [], []>} : vector<2x32xf32>, vector<32x128xf32>, vector<2x128xf32> -> vector<2x128xf32>
    %356 = arith.addf %321, %355 : vector<2x128xf32>
    %357 = vector.extract_strided_slice %356 {offsets = [0, 0], sizes = [2, 32], strides = [1, 1]} : vector<2x128xf32> to vector<2x32xf32>
    %358 = arith.negf %357 : vector<2x32xf32>
    %359 = math.exp %358 : vector<2x32xf32>
    %cst_193 = arith.constant 1.000000e+00 : f32
    %360 = vector.broadcast %cst_193 : f32 to vector<2x32xf32>
    %361 = arith.addf %360, %359 : vector<2x32xf32>
    %362 = arith.divf %360, %361 : vector<2x32xf32>
    %363 = vector.extract_strided_slice %356 {offsets = [0, 32], sizes = [2, 32], strides = [1, 1]} : vector<2x128xf32> to vector<2x32xf32>
    %364 = arith.negf %363 : vector<2x32xf32>
    %365 = math.exp %364 : vector<2x32xf32>
    %cst_194 = arith.constant 1.000000e+00 : f32
    %366 = vector.broadcast %cst_194 : f32 to vector<2x32xf32>
    %367 = arith.addf %366, %365 : vector<2x32xf32>
    %368 = arith.divf %366, %367 : vector<2x32xf32>
    %369 = vector.extract_strided_slice %356 {offsets = [0, 64], sizes = [2, 32], strides = [1, 1]} : vector<2x128xf32> to vector<2x32xf32>
    %370 = math.tanh %369 : vector<2x32xf32>
    %371 = vector.extract_strided_slice %356 {offsets = [0, 96], sizes = [2, 32], strides = [1, 1]} : vector<2x128xf32> to vector<2x32xf32>
    %372 = arith.negf %371 : vector<2x32xf32>
    %373 = math.exp %372 : vector<2x32xf32>
    %cst_195 = arith.constant 1.000000e+00 : f32
    %374 = vector.broadcast %cst_195 : f32 to vector<2x32xf32>
    %375 = arith.addf %374, %373 : vector<2x32xf32>
    %376 = arith.divf %374, %375 : vector<2x32xf32>
    %377 = arith.mulf %368, %353 : vector<2x32xf32>
    %378 = arith.mulf %362, %370 : vector<2x32xf32>
    %379 = arith.addf %377, %378 : vector<2x32xf32>
    %380 = math.tanh %379 : vector<2x32xf32>
    %381 = arith.mulf %376, %380 : vector<2x32xf32>
    %c0_196 = arith.constant 0 : index
    %c0_197 = arith.constant 0 : index
    %382 = vector.load %arg9[%c0_196, %c0_197] : memref<2x32xf32, #tpu.memory_space<vmem>>, vector<2x32xf32>
    tpu.vector_store %arg9[%c0_196, %c0_197], %351 {strides = array<i32>} : memref<2x32xf32, #tpu.memory_space<vmem>>, vector<2x32xf32>,
    %c0_198 = arith.constant 0 : index
    %c0_199 = arith.constant 0 : index
    %383 = vector.load %arg10[%c0_198, %c0_199] : memref<2x32xf32, #tpu.memory_space<vmem>>, vector<2x32xf32>
    tpu.vector_store %arg10[%c0_198, %c0_199], %349 {strides = array<i32>} : memref<2x32xf32, #tpu.memory_space<vmem>>, vector<2x32xf32>,
    %c0_200 = arith.constant 0 : index
    %c0_201 = arith.constant 0 : index
    %384 = vector.load %arg11[%c0_200, %c0_201] : memref<2x32xf32, #tpu.memory_space<vmem>>, vector<2x32xf32>
    tpu.vector_store %arg11[%c0_200, %c0_201], %381 {strides = array<i32>} : memref<2x32xf32, #tpu.memory_space<vmem>>, vector<2x32xf32>,
    %c0_202 = arith.constant 0 : index
    %c0_203 = arith.constant 0 : index
    %385 = vector.load %arg12[%c0_202, %c0_203] : memref<2x32xf32, #tpu.memory_space<vmem>>, vector<2x32xf32>
    tpu.vector_store %arg12[%c0_202, %c0_203], %379 {strides = array<i32>} : memref<2x32xf32, #tpu.memory_space<vmem>>, vector<2x32xf32>,
    %c4_204 = arith.constant 4 : index
    %c0_205 = arith.constant 0 : index
    %c0_206 = arith.constant 0 : index
    %386 = vector.load %arg6[%c4_204, %c0_205, %c0_206] : memref<8x2x64xf32, #tpu.memory_space<vmem>>, vector<1x2x32xf32>
    %387 = vector.shape_cast %386 : vector<1x2x32xf32> to vector<2x32xf32>
    %388 = vector.shape_cast %351 : vector<2x32xf32> to vector<1x2x32xf32>
    tpu.vector_store %arg6[%c4_204, %c0_205, %c0_206], %388 {strides = array<i32>} : memref<8x2x64xf32, #tpu.memory_space<vmem>>, vector<1x2x32xf32>,
    %c3_207 = arith.constant 3 : index
    %c0_208 = arith.constant 0 : index
    %c32_209 = arith.constant 32 : index
    %389 = vector.load %arg6[%c3_207, %c0_208, %c32_209] : memref<8x2x64xf32, #tpu.memory_space<vmem>>, vector<1x2x32xf32>
    %390 = vector.shape_cast %389 : vector<1x2x32xf32> to vector<2x32xf32>
    %391 = vector.shape_cast %381 : vector<2x32xf32> to vector<1x2x32xf32>
    tpu.vector_store %arg6[%c3_207, %c0_208, %c32_209], %391 {strides = array<i32>} : memref<8x2x64xf32, #tpu.memory_space<vmem>>, vector<1x2x32xf32>,
    %c5_210 = arith.constant 5 : index
    %c0_211 = arith.constant 0 : index
    %c0_212 = arith.constant 0 : index
    %392 = vector.load %arg1[%c5_210, %c0_211, %c0_212] : memref<8x2x256xf32, #tpu.memory_space<vmem>>, vector<1x2x256xf32>
    %393 = vector.shape_cast %392 : vector<1x2x256xf32> to vector<2x256xf32>
    %394 = vector.extract_strided_slice %393 {offsets = [0, 0], sizes = [2, 128], strides = [1, 1]} : vector<2x256xf32> to vector<2x128xf32>
    %c2_213 = arith.constant 2 : index
    %c0_214 = arith.constant 0 : index
    %c0_215 = arith.constant 0 : index
    %395 = vector.load %arg1[%c2_213, %c0_214, %c0_215] : memref<8x2x256xf32, #tpu.memory_space<vmem>>, vector<1x2x256xf32>
    %396 = vector.shape_cast %395 : vector<1x2x256xf32> to vector<2x256xf32>
    %397 = vector.extract_strided_slice %396 {offsets = [0, 128], sizes = [2, 128], strides = [1, 1]} : vector<2x256xf32> to vector<2x128xf32>
    %c0_216 = arith.constant 0 : index
    %c0_217 = arith.constant 0 : index
    %398 = vector.load %arg9[%c0_216, %c0_217] : memref<2x32xf32, #tpu.memory_space<vmem>>, vector<2x32xf32>
    %c0_218 = arith.constant 0 : index
    %c0_219 = arith.constant 0 : index
    %399 = vector.load %arg10[%c0_218, %c0_219] : memref<2x32xf32, #tpu.memory_space<vmem>>, vector<2x32xf32>
    %c0_220 = arith.constant 0 : index
    %c0_221 = arith.constant 0 : index
    %400 = vector.load %arg2[%c0_220, %c0_221] : memref<32x128xf32, #tpu.memory_space<vmem>>, vector<32x128xf32>
    %cst_222 = arith.constant dense<0.000000e+00> : vector<2x128xf32>
    %401 = tpu.matmul %398, %400, %cst_222 {dimension_numbers = #tpu.dot_dimension_numbers<[1], [0], [0], [1], [0, 0, 1, 1], [], []>} : vector<2x32xf32>, vector<32x128xf32>, vector<2x128xf32> -> vector<2x128xf32>
    %402 = arith.addf %394, %401 : vector<2x128xf32>
    %403 = vector.extract_strided_slice %402 {offsets = [0, 0], sizes = [2, 32], strides = [1, 1]} : vector<2x128xf32> to vector<2x32xf32>
    %404 = arith.negf %403 : vector<2x32xf32>
    %405 = math.exp %404 : vector<2x32xf32>
    %cst_223 = arith.constant 1.000000e+00 : f32
    %406 = vector.broadcast %cst_223 : f32 to vector<2x32xf32>
    %407 = arith.addf %406, %405 : vector<2x32xf32>
    %408 = arith.divf %406, %407 : vector<2x32xf32>
    %409 = vector.extract_strided_slice %402 {offsets = [0, 32], sizes = [2, 32], strides = [1, 1]} : vector<2x128xf32> to vector<2x32xf32>
    %410 = arith.negf %409 : vector<2x32xf32>
    %411 = math.exp %410 : vector<2x32xf32>
    %cst_224 = arith.constant 1.000000e+00 : f32
    %412 = vector.broadcast %cst_224 : f32 to vector<2x32xf32>
    %413 = arith.addf %412, %411 : vector<2x32xf32>
    %414 = arith.divf %412, %413 : vector<2x32xf32>
    %415 = vector.extract_strided_slice %402 {offsets = [0, 64], sizes = [2, 32], strides = [1, 1]} : vector<2x128xf32> to vector<2x32xf32>
    %416 = math.tanh %415 : vector<2x32xf32>
    %417 = vector.extract_strided_slice %402 {offsets = [0, 96], sizes = [2, 32], strides = [1, 1]} : vector<2x128xf32> to vector<2x32xf32>
    %418 = arith.negf %417 : vector<2x32xf32>
    %419 = math.exp %418 : vector<2x32xf32>
    %cst_225 = arith.constant 1.000000e+00 : f32
    %420 = vector.broadcast %cst_225 : f32 to vector<2x32xf32>
    %421 = arith.addf %420, %419 : vector<2x32xf32>
    %422 = arith.divf %420, %421 : vector<2x32xf32>
    %423 = arith.mulf %414, %399 : vector<2x32xf32>
    %424 = arith.mulf %408, %416 : vector<2x32xf32>
    %425 = arith.addf %423, %424 : vector<2x32xf32>
    %426 = math.tanh %425 : vector<2x32xf32>
    %427 = arith.mulf %422, %426 : vector<2x32xf32>
    %c0_226 = arith.constant 0 : index
    %c0_227 = arith.constant 0 : index
    %428 = vector.load %arg11[%c0_226, %c0_227] : memref<2x32xf32, #tpu.memory_space<vmem>>, vector<2x32xf32>
    %c0_228 = arith.constant 0 : index
    %c0_229 = arith.constant 0 : index
    %429 = vector.load %arg12[%c0_228, %c0_229] : memref<2x32xf32, #tpu.memory_space<vmem>>, vector<2x32xf32>
    %c0_230 = arith.constant 0 : index
    %c0_231 = arith.constant 0 : index
    %430 = vector.load %arg3[%c0_230, %c0_231] : memref<32x128xf32, #tpu.memory_space<vmem>>, vector<32x128xf32>
    %cst_232 = arith.constant dense<0.000000e+00> : vector<2x128xf32>
    %431 = tpu.matmul %428, %430, %cst_232 {dimension_numbers = #tpu.dot_dimension_numbers<[1], [0], [0], [1], [0, 0, 1, 1], [], []>} : vector<2x32xf32>, vector<32x128xf32>, vector<2x128xf32> -> vector<2x128xf32>
    %432 = arith.addf %397, %431 : vector<2x128xf32>
    %433 = vector.extract_strided_slice %432 {offsets = [0, 0], sizes = [2, 32], strides = [1, 1]} : vector<2x128xf32> to vector<2x32xf32>
    %434 = arith.negf %433 : vector<2x32xf32>
    %435 = math.exp %434 : vector<2x32xf32>
    %cst_233 = arith.constant 1.000000e+00 : f32
    %436 = vector.broadcast %cst_233 : f32 to vector<2x32xf32>
    %437 = arith.addf %436, %435 : vector<2x32xf32>
    %438 = arith.divf %436, %437 : vector<2x32xf32>
    %439 = vector.extract_strided_slice %432 {offsets = [0, 32], sizes = [2, 32], strides = [1, 1]} : vector<2x128xf32> to vector<2x32xf32>
    %440 = arith.negf %439 : vector<2x32xf32>
    %441 = math.exp %440 : vector<2x32xf32>
    %cst_234 = arith.constant 1.000000e+00 : f32
    %442 = vector.broadcast %cst_234 : f32 to vector<2x32xf32>
    %443 = arith.addf %442, %441 : vector<2x32xf32>
    %444 = arith.divf %442, %443 : vector<2x32xf32>
    %445 = vector.extract_strided_slice %432 {offsets = [0, 64], sizes = [2, 32], strides = [1, 1]} : vector<2x128xf32> to vector<2x32xf32>
    %446 = math.tanh %445 : vector<2x32xf32>
    %447 = vector.extract_strided_slice %432 {offsets = [0, 96], sizes = [2, 32], strides = [1, 1]} : vector<2x128xf32> to vector<2x32xf32>
    %448 = arith.negf %447 : vector<2x32xf32>
    %449 = math.exp %448 : vector<2x32xf32>
    %cst_235 = arith.constant 1.000000e+00 : f32
    %450 = vector.broadcast %cst_235 : f32 to vector<2x32xf32>
    %451 = arith.addf %450, %449 : vector<2x32xf32>
    %452 = arith.divf %450, %451 : vector<2x32xf32>
    %453 = arith.mulf %444, %429 : vector<2x32xf32>
    %454 = arith.mulf %438, %446 : vector<2x32xf32>
    %455 = arith.addf %453, %454 : vector<2x32xf32>
    %456 = math.tanh %455 : vector<2x32xf32>
    %457 = arith.mulf %452, %456 : vector<2x32xf32>
    %c0_236 = arith.constant 0 : index
    %c0_237 = arith.constant 0 : index
    %458 = vector.load %arg9[%c0_236, %c0_237] : memref<2x32xf32, #tpu.memory_space<vmem>>, vector<2x32xf32>
    tpu.vector_store %arg9[%c0_236, %c0_237], %427 {strides = array<i32>} : memref<2x32xf32, #tpu.memory_space<vmem>>, vector<2x32xf32>,
    %c0_238 = arith.constant 0 : index
    %c0_239 = arith.constant 0 : index
    %459 = vector.load %arg10[%c0_238, %c0_239] : memref<2x32xf32, #tpu.memory_space<vmem>>, vector<2x32xf32>
    tpu.vector_store %arg10[%c0_238, %c0_239], %425 {strides = array<i32>} : memref<2x32xf32, #tpu.memory_space<vmem>>, vector<2x32xf32>,
    %c0_240 = arith.constant 0 : index
    %c0_241 = arith.constant 0 : index
    %460 = vector.load %arg11[%c0_240, %c0_241] : memref<2x32xf32, #tpu.memory_space<vmem>>, vector<2x32xf32>
    tpu.vector_store %arg11[%c0_240, %c0_241], %457 {strides = array<i32>} : memref<2x32xf32, #tpu.memory_space<vmem>>, vector<2x32xf32>,
    %c0_242 = arith.constant 0 : index
    %c0_243 = arith.constant 0 : index
    %461 = vector.load %arg12[%c0_242, %c0_243] : memref<2x32xf32, #tpu.memory_space<vmem>>, vector<2x32xf32>
    tpu.vector_store %arg12[%c0_242, %c0_243], %455 {strides = array<i32>} : memref<2x32xf32, #tpu.memory_space<vmem>>, vector<2x32xf32>,
    %c5_244 = arith.constant 5 : index
    %c0_245 = arith.constant 0 : index
    %c0_246 = arith.constant 0 : index
    %462 = vector.load %arg6[%c5_244, %c0_245, %c0_246] : memref<8x2x64xf32, #tpu.memory_space<vmem>>, vector<1x2x32xf32>
    %463 = vector.shape_cast %462 : vector<1x2x32xf32> to vector<2x32xf32>
    %464 = vector.shape_cast %427 : vector<2x32xf32> to vector<1x2x32xf32>
    tpu.vector_store %arg6[%c5_244, %c0_245, %c0_246], %464 {strides = array<i32>} : memref<8x2x64xf32, #tpu.memory_space<vmem>>, vector<1x2x32xf32>,
    %c2_247 = arith.constant 2 : index
    %c0_248 = arith.constant 0 : index
    %c32_249 = arith.constant 32 : index
    %465 = vector.load %arg6[%c2_247, %c0_248, %c32_249] : memref<8x2x64xf32, #tpu.memory_space<vmem>>, vector<1x2x32xf32>
    %466 = vector.shape_cast %465 : vector<1x2x32xf32> to vector<2x32xf32>
    %467 = vector.shape_cast %457 : vector<2x32xf32> to vector<1x2x32xf32>
    tpu.vector_store %arg6[%c2_247, %c0_248, %c32_249], %467 {strides = array<i32>} : memref<8x2x64xf32, #tpu.memory_space<vmem>>, vector<1x2x32xf32>,
    %c6_250 = arith.constant 6 : index
    %c0_251 = arith.constant 0 : index
    %c0_252 = arith.constant 0 : index
    %468 = vector.load %arg1[%c6_250, %c0_251, %c0_252] : memref<8x2x256xf32, #tpu.memory_space<vmem>>, vector<1x2x256xf32>
    %469 = vector.shape_cast %468 : vector<1x2x256xf32> to vector<2x256xf32>
    %470 = vector.extract_strided_slice %469 {offsets = [0, 0], sizes = [2, 128], strides = [1, 1]} : vector<2x256xf32> to vector<2x128xf32>
    %c1_253 = arith.constant 1 : index
    %c0_254 = arith.constant 0 : index
    %c0_255 = arith.constant 0 : index
    %471 = vector.load %arg1[%c1_253, %c0_254, %c0_255] : memref<8x2x256xf32, #tpu.memory_space<vmem>>, vector<1x2x256xf32>
    %472 = vector.shape_cast %471 : vector<1x2x256xf32> to vector<2x256xf32>
    %473 = vector.extract_strided_slice %472 {offsets = [0, 128], sizes = [2, 128], strides = [1, 1]} : vector<2x256xf32> to vector<2x128xf32>
    %c0_256 = arith.constant 0 : index
    %c0_257 = arith.constant 0 : index
    %474 = vector.load %arg9[%c0_256, %c0_257] : memref<2x32xf32, #tpu.memory_space<vmem>>, vector<2x32xf32>
    %c0_258 = arith.constant 0 : index
    %c0_259 = arith.constant 0 : index
    %475 = vector.load %arg10[%c0_258, %c0_259] : memref<2x32xf32, #tpu.memory_space<vmem>>, vector<2x32xf32>
    %c0_260 = arith.constant 0 : index
    %c0_261 = arith.constant 0 : index
    %476 = vector.load %arg2[%c0_260, %c0_261] : memref<32x128xf32, #tpu.memory_space<vmem>>, vector<32x128xf32>
    %cst_262 = arith.constant dense<0.000000e+00> : vector<2x128xf32>
    %477 = tpu.matmul %474, %476, %cst_262 {dimension_numbers = #tpu.dot_dimension_numbers<[1], [0], [0], [1], [0, 0, 1, 1], [], []>} : vector<2x32xf32>, vector<32x128xf32>, vector<2x128xf32> -> vector<2x128xf32>
    %478 = arith.addf %470, %477 : vector<2x128xf32>
    %479 = vector.extract_strided_slice %478 {offsets = [0, 0], sizes = [2, 32], strides = [1, 1]} : vector<2x128xf32> to vector<2x32xf32>
    %480 = arith.negf %479 : vector<2x32xf32>
    %481 = math.exp %480 : vector<2x32xf32>
    %cst_263 = arith.constant 1.000000e+00 : f32
    %482 = vector.broadcast %cst_263 : f32 to vector<2x32xf32>
    %483 = arith.addf %482, %481 : vector<2x32xf32>
    %484 = arith.divf %482, %483 : vector<2x32xf32>
    %485 = vector.extract_strided_slice %478 {offsets = [0, 32], sizes = [2, 32], strides = [1, 1]} : vector<2x128xf32> to vector<2x32xf32>
    %486 = arith.negf %485 : vector<2x32xf32>
    %487 = math.exp %486 : vector<2x32xf32>
    %cst_264 = arith.constant 1.000000e+00 : f32
    %488 = vector.broadcast %cst_264 : f32 to vector<2x32xf32>
    %489 = arith.addf %488, %487 : vector<2x32xf32>
    %490 = arith.divf %488, %489 : vector<2x32xf32>
    %491 = vector.extract_strided_slice %478 {offsets = [0, 64], sizes = [2, 32], strides = [1, 1]} : vector<2x128xf32> to vector<2x32xf32>
    %492 = math.tanh %491 : vector<2x32xf32>
    %493 = vector.extract_strided_slice %478 {offsets = [0, 96], sizes = [2, 32], strides = [1, 1]} : vector<2x128xf32> to vector<2x32xf32>
    %494 = arith.negf %493 : vector<2x32xf32>
    %495 = math.exp %494 : vector<2x32xf32>
    %cst_265 = arith.constant 1.000000e+00 : f32
    %496 = vector.broadcast %cst_265 : f32 to vector<2x32xf32>
    %497 = arith.addf %496, %495 : vector<2x32xf32>
    %498 = arith.divf %496, %497 : vector<2x32xf32>
    %499 = arith.mulf %490, %475 : vector<2x32xf32>
    %500 = arith.mulf %484, %492 : vector<2x32xf32>
    %501 = arith.addf %499, %500 : vector<2x32xf32>
    %502 = math.tanh %501 : vector<2x32xf32>
    %503 = arith.mulf %498, %502 : vector<2x32xf32>
    %c0_266 = arith.constant 0 : index
    %c0_267 = arith.constant 0 : index
    %504 = vector.load %arg11[%c0_266, %c0_267] : memref<2x32xf32, #tpu.memory_space<vmem>>, vector<2x32xf32>
    %c0_268 = arith.constant 0 : index
    %c0_269 = arith.constant 0 : index
    %505 = vector.load %arg12[%c0_268, %c0_269] : memref<2x32xf32, #tpu.memory_space<vmem>>, vector<2x32xf32>
    %c0_270 = arith.constant 0 : index
    %c0_271 = arith.constant 0 : index
    %506 = vector.load %arg3[%c0_270, %c0_271] : memref<32x128xf32, #tpu.memory_space<vmem>>, vector<32x128xf32>
    %cst_272 = arith.constant dense<0.000000e+00> : vector<2x128xf32>
    %507 = tpu.matmul %504, %506, %cst_272 {dimension_numbers = #tpu.dot_dimension_numbers<[1], [0], [0], [1], [0, 0, 1, 1], [], []>} : vector<2x32xf32>, vector<32x128xf32>, vector<2x128xf32> -> vector<2x128xf32>
    %508 = arith.addf %473, %507 : vector<2x128xf32>
    %509 = vector.extract_strided_slice %508 {offsets = [0, 0], sizes = [2, 32], strides = [1, 1]} : vector<2x128xf32> to vector<2x32xf32>
    %510 = arith.negf %509 : vector<2x32xf32>
    %511 = math.exp %510 : vector<2x32xf32>
    %cst_273 = arith.constant 1.000000e+00 : f32
    %512 = vector.broadcast %cst_273 : f32 to vector<2x32xf32>
    %513 = arith.addf %512, %511 : vector<2x32xf32>
    %514 = arith.divf %512, %513 : vector<2x32xf32>
    %515 = vector.extract_strided_slice %508 {offsets = [0, 32], sizes = [2, 32], strides = [1, 1]} : vector<2x128xf32> to vector<2x32xf32>
    %516 = arith.negf %515 : vector<2x32xf32>
    %517 = math.exp %516 : vector<2x32xf32>
    %cst_274 = arith.constant 1.000000e+00 : f32
    %518 = vector.broadcast %cst_274 : f32 to vector<2x32xf32>
    %519 = arith.addf %518, %517 : vector<2x32xf32>
    %520 = arith.divf %518, %519 : vector<2x32xf32>
    %521 = vector.extract_strided_slice %508 {offsets = [0, 64], sizes = [2, 32], strides = [1, 1]} : vector<2x128xf32> to vector<2x32xf32>
    %522 = math.tanh %521 : vector<2x32xf32>
    %523 = vector.extract_strided_slice %508 {offsets = [0, 96], sizes = [2, 32], strides = [1, 1]} : vector<2x128xf32> to vector<2x32xf32>
    %524 = arith.negf %523 : vector<2x32xf32>
    %525 = math.exp %524 : vector<2x32xf32>
    %cst_275 = arith.constant 1.000000e+00 : f32
    %526 = vector.broadcast %cst_275 : f32 to vector<2x32xf32>
    %527 = arith.addf %526, %525 : vector<2x32xf32>
    %528 = arith.divf %526, %527 : vector<2x32xf32>
    %529 = arith.mulf %520, %505 : vector<2x32xf32>
    %530 = arith.mulf %514, %522 : vector<2x32xf32>
    %531 = arith.addf %529, %530 : vector<2x32xf32>
    %532 = math.tanh %531 : vector<2x32xf32>
    %533 = arith.mulf %528, %532 : vector<2x32xf32>
    %c0_276 = arith.constant 0 : index
    %c0_277 = arith.constant 0 : index
    %534 = vector.load %arg9[%c0_276, %c0_277] : memref<2x32xf32, #tpu.memory_space<vmem>>, vector<2x32xf32>
    tpu.vector_store %arg9[%c0_276, %c0_277], %503 {strides = array<i32>} : memref<2x32xf32, #tpu.memory_space<vmem>>, vector<2x32xf32>,
    %c0_278 = arith.constant 0 : index
    %c0_279 = arith.constant 0 : index
    %535 = vector.load %arg10[%c0_278, %c0_279] : memref<2x32xf32, #tpu.memory_space<vmem>>, vector<2x32xf32>
    tpu.vector_store %arg10[%c0_278, %c0_279], %501 {strides = array<i32>} : memref<2x32xf32, #tpu.memory_space<vmem>>, vector<2x32xf32>,
    %c0_280 = arith.constant 0 : index
    %c0_281 = arith.constant 0 : index
    %536 = vector.load %arg11[%c0_280, %c0_281] : memref<2x32xf32, #tpu.memory_space<vmem>>, vector<2x32xf32>
    tpu.vector_store %arg11[%c0_280, %c0_281], %533 {strides = array<i32>} : memref<2x32xf32, #tpu.memory_space<vmem>>, vector<2x32xf32>,
    %c0_282 = arith.constant 0 : index
    %c0_283 = arith.constant 0 : index
    %537 = vector.load %arg12[%c0_282, %c0_283] : memref<2x32xf32, #tpu.memory_space<vmem>>, vector<2x32xf32>
    tpu.vector_store %arg12[%c0_282, %c0_283], %531 {strides = array<i32>} : memref<2x32xf32, #tpu.memory_space<vmem>>, vector<2x32xf32>,
    %c6_284 = arith.constant 6 : index
    %c0_285 = arith.constant 0 : index
    %c0_286 = arith.constant 0 : index
    %538 = vector.load %arg6[%c6_284, %c0_285, %c0_286] : memref<8x2x64xf32, #tpu.memory_space<vmem>>, vector<1x2x32xf32>
    %539 = vector.shape_cast %538 : vector<1x2x32xf32> to vector<2x32xf32>
    %540 = vector.shape_cast %503 : vector<2x32xf32> to vector<1x2x32xf32>
    tpu.vector_store %arg6[%c6_284, %c0_285, %c0_286], %540 {strides = array<i32>} : memref<8x2x64xf32, #tpu.memory_space<vmem>>, vector<1x2x32xf32>,
    %c1_287 = arith.constant 1 : index
    %c0_288 = arith.constant 0 : index
    %c32_289 = arith.constant 32 : index
    %541 = vector.load %arg6[%c1_287, %c0_288, %c32_289] : memref<8x2x64xf32, #tpu.memory_space<vmem>>, vector<1x2x32xf32>
    %542 = vector.shape_cast %541 : vector<1x2x32xf32> to vector<2x32xf32>
    %543 = vector.shape_cast %533 : vector<2x32xf32> to vector<1x2x32xf32>
    tpu.vector_store %arg6[%c1_287, %c0_288, %c32_289], %543 {strides = array<i32>} : memref<8x2x64xf32, #tpu.memory_space<vmem>>, vector<1x2x32xf32>,
    %c7_290 = arith.constant 7 : index
    %c0_291 = arith.constant 0 : index
    %c0_292 = arith.constant 0 : index
    %544 = vector.load %arg1[%c7_290, %c0_291, %c0_292] : memref<8x2x256xf32, #tpu.memory_space<vmem>>, vector<1x2x256xf32>
    %545 = vector.shape_cast %544 : vector<1x2x256xf32> to vector<2x256xf32>
    %546 = vector.extract_strided_slice %545 {offsets = [0, 0], sizes = [2, 128], strides = [1, 1]} : vector<2x256xf32> to vector<2x128xf32>
    %c0_293 = arith.constant 0 : index
    %c0_294 = arith.constant 0 : index
    %c0_295 = arith.constant 0 : index
    %547 = vector.load %arg1[%c0_293, %c0_294, %c0_295] : memref<8x2x256xf32, #tpu.memory_space<vmem>>, vector<1x2x256xf32>
    %548 = vector.shape_cast %547 : vector<1x2x256xf32> to vector<2x256xf32>
    %549 = vector.extract_strided_slice %548 {offsets = [0, 128], sizes = [2, 128], strides = [1, 1]} : vector<2x256xf32> to vector<2x128xf32>
    %c0_296 = arith.constant 0 : index
    %c0_297 = arith.constant 0 : index
    %550 = vector.load %arg9[%c0_296, %c0_297] : memref<2x32xf32, #tpu.memory_space<vmem>>, vector<2x32xf32>
    %c0_298 = arith.constant 0 : index
    %c0_299 = arith.constant 0 : index
    %551 = vector.load %arg10[%c0_298, %c0_299] : memref<2x32xf32, #tpu.memory_space<vmem>>, vector<2x32xf32>
    %c0_300 = arith.constant 0 : index
    %c0_301 = arith.constant 0 : index
    %552 = vector.load %arg2[%c0_300, %c0_301] : memref<32x128xf32, #tpu.memory_space<vmem>>, vector<32x128xf32>
    %cst_302 = arith.constant dense<0.000000e+00> : vector<2x128xf32>
    %553 = tpu.matmul %550, %552, %cst_302 {dimension_numbers = #tpu.dot_dimension_numbers<[1], [0], [0], [1], [0, 0, 1, 1], [], []>} : vector<2x32xf32>, vector<32x128xf32>, vector<2x128xf32> -> vector<2x128xf32>
    %554 = arith.addf %546, %553 : vector<2x128xf32>
    %555 = vector.extract_strided_slice %554 {offsets = [0, 0], sizes = [2, 32], strides = [1, 1]} : vector<2x128xf32> to vector<2x32xf32>
    %556 = arith.negf %555 : vector<2x32xf32>
    %557 = math.exp %556 : vector<2x32xf32>
    %cst_303 = arith.constant 1.000000e+00 : f32
    %558 = vector.broadcast %cst_303 : f32 to vector<2x32xf32>
    %559 = arith.addf %558, %557 : vector<2x32xf32>
    %560 = arith.divf %558, %559 : vector<2x32xf32>
    %561 = vector.extract_strided_slice %554 {offsets = [0, 32], sizes = [2, 32], strides = [1, 1]} : vector<2x128xf32> to vector<2x32xf32>
    %562 = arith.negf %561 : vector<2x32xf32>
    %563 = math.exp %562 : vector<2x32xf32>
    %cst_304 = arith.constant 1.000000e+00 : f32
    %564 = vector.broadcast %cst_304 : f32 to vector<2x32xf32>
    %565 = arith.addf %564, %563 : vector<2x32xf32>
    %566 = arith.divf %564, %565 : vector<2x32xf32>
    %567 = vector.extract_strided_slice %554 {offsets = [0, 64], sizes = [2, 32], strides = [1, 1]} : vector<2x128xf32> to vector<2x32xf32>
    %568 = math.tanh %567 : vector<2x32xf32>
    %569 = vector.extract_strided_slice %554 {offsets = [0, 96], sizes = [2, 32], strides = [1, 1]} : vector<2x128xf32> to vector<2x32xf32>
    %570 = arith.negf %569 : vector<2x32xf32>
    %571 = math.exp %570 : vector<2x32xf32>
    %cst_305 = arith.constant 1.000000e+00 : f32
    %572 = vector.broadcast %cst_305 : f32 to vector<2x32xf32>
    %573 = arith.addf %572, %571 : vector<2x32xf32>
    %574 = arith.divf %572, %573 : vector<2x32xf32>
    %575 = arith.mulf %566, %551 : vector<2x32xf32>
    %576 = arith.mulf %560, %568 : vector<2x32xf32>
    %577 = arith.addf %575, %576 : vector<2x32xf32>
    %578 = math.tanh %577 : vector<2x32xf32>
    %579 = arith.mulf %574, %578 : vector<2x32xf32>
    %c0_306 = arith.constant 0 : index
    %c0_307 = arith.constant 0 : index
    %580 = vector.load %arg11[%c0_306, %c0_307] : memref<2x32xf32, #tpu.memory_space<vmem>>, vector<2x32xf32>
    %c0_308 = arith.constant 0 : index
    %c0_309 = arith.constant 0 : index
    %581 = vector.load %arg12[%c0_308, %c0_309] : memref<2x32xf32, #tpu.memory_space<vmem>>, vector<2x32xf32>
    %c0_310 = arith.constant 0 : index
    %c0_311 = arith.constant 0 : index
    %582 = vector.load %arg3[%c0_310, %c0_311] : memref<32x128xf32, #tpu.memory_space<vmem>>, vector<32x128xf32>
    %cst_312 = arith.constant dense<0.000000e+00> : vector<2x128xf32>
    %583 = tpu.matmul %580, %582, %cst_312 {dimension_numbers = #tpu.dot_dimension_numbers<[1], [0], [0], [1], [0, 0, 1, 1], [], []>} : vector<2x32xf32>, vector<32x128xf32>, vector<2x128xf32> -> vector<2x128xf32>
    %584 = arith.addf %549, %583 : vector<2x128xf32>
    %585 = vector.extract_strided_slice %584 {offsets = [0, 0], sizes = [2, 32], strides = [1, 1]} : vector<2x128xf32> to vector<2x32xf32>
    %586 = arith.negf %585 : vector<2x32xf32>
    %587 = math.exp %586 : vector<2x32xf32>
    %cst_313 = arith.constant 1.000000e+00 : f32
    %588 = vector.broadcast %cst_313 : f32 to vector<2x32xf32>
    %589 = arith.addf %588, %587 : vector<2x32xf32>
    %590 = arith.divf %588, %589 : vector<2x32xf32>
    %591 = vector.extract_strided_slice %584 {offsets = [0, 32], sizes = [2, 32], strides = [1, 1]} : vector<2x128xf32> to vector<2x32xf32>
    %592 = arith.negf %591 : vector<2x32xf32>
    %593 = math.exp %592 : vector<2x32xf32>
    %cst_314 = arith.constant 1.000000e+00 : f32
    %594 = vector.broadcast %cst_314 : f32 to vector<2x32xf32>
    %595 = arith.addf %594, %593 : vector<2x32xf32>
    %596 = arith.divf %594, %595 : vector<2x32xf32>
    %597 = vector.extract_strided_slice %584 {offsets = [0, 64], sizes = [2, 32], strides = [1, 1]} : vector<2x128xf32> to vector<2x32xf32>
    %598 = math.tanh %597 : vector<2x32xf32>
    %599 = vector.extract_strided_slice %584 {offsets = [0, 96], sizes = [2, 32], strides = [1, 1]} : vector<2x128xf32> to vector<2x32xf32>
    %600 = arith.negf %599 : vector<2x32xf32>
    %601 = math.exp %600 : vector<2x32xf32>
    %cst_315 = arith.constant 1.000000e+00 : f32
    %602 = vector.broadcast %cst_315 : f32 to vector<2x32xf32>
    %603 = arith.addf %602, %601 : vector<2x32xf32>
    %604 = arith.divf %602, %603 : vector<2x32xf32>
    %605 = arith.mulf %596, %581 : vector<2x32xf32>
    %606 = arith.mulf %590, %598 : vector<2x32xf32>
    %607 = arith.addf %605, %606 : vector<2x32xf32>
    %608 = math.tanh %607 : vector<2x32xf32>
    %609 = arith.mulf %604, %608 : vector<2x32xf32>
    %c0_316 = arith.constant 0 : index
    %c0_317 = arith.constant 0 : index
    %610 = vector.load %arg9[%c0_316, %c0_317] : memref<2x32xf32, #tpu.memory_space<vmem>>, vector<2x32xf32>
    tpu.vector_store %arg9[%c0_316, %c0_317], %579 {strides = array<i32>} : memref<2x32xf32, #tpu.memory_space<vmem>>, vector<2x32xf32>,
    %c0_318 = arith.constant 0 : index
    %c0_319 = arith.constant 0 : index
    %611 = vector.load %arg10[%c0_318, %c0_319] : memref<2x32xf32, #tpu.memory_space<vmem>>, vector<2x32xf32>
    tpu.vector_store %arg10[%c0_318, %c0_319], %577 {strides = array<i32>} : memref<2x32xf32, #tpu.memory_space<vmem>>, vector<2x32xf32>,
    %c0_320 = arith.constant 0 : index
    %c0_321 = arith.constant 0 : index
    %612 = vector.load %arg11[%c0_320, %c0_321] : memref<2x32xf32, #tpu.memory_space<vmem>>, vector<2x32xf32>
    tpu.vector_store %arg11[%c0_320, %c0_321], %609 {strides = array<i32>} : memref<2x32xf32, #tpu.memory_space<vmem>>, vector<2x32xf32>,
    %c0_322 = arith.constant 0 : index
    %c0_323 = arith.constant 0 : index
    %613 = vector.load %arg12[%c0_322, %c0_323] : memref<2x32xf32, #tpu.memory_space<vmem>>, vector<2x32xf32>
    tpu.vector_store %arg12[%c0_322, %c0_323], %607 {strides = array<i32>} : memref<2x32xf32, #tpu.memory_space<vmem>>, vector<2x32xf32>,
    %c7_324 = arith.constant 7 : index
    %c0_325 = arith.constant 0 : index
    %c0_326 = arith.constant 0 : index
    %614 = vector.load %arg6[%c7_324, %c0_325, %c0_326] : memref<8x2x64xf32, #tpu.memory_space<vmem>>, vector<1x2x32xf32>
    %615 = vector.shape_cast %614 : vector<1x2x32xf32> to vector<2x32xf32>
    %616 = vector.shape_cast %579 : vector<2x32xf32> to vector<1x2x32xf32>
    tpu.vector_store %arg6[%c7_324, %c0_325, %c0_326], %616 {strides = array<i32>} : memref<8x2x64xf32, #tpu.memory_space<vmem>>, vector<1x2x32xf32>,
    %c0_327 = arith.constant 0 : index
    %c0_328 = arith.constant 0 : index
    %c32_329 = arith.constant 32 : index
    %617 = vector.load %arg6[%c0_327, %c0_328, %c32_329] : memref<8x2x64xf32, #tpu.memory_space<vmem>>, vector<1x2x32xf32>
    %618 = vector.shape_cast %617 : vector<1x2x32xf32> to vector<2x32xf32>
    %619 = vector.shape_cast %609 : vector<2x32xf32> to vector<1x2x32xf32>
    tpu.vector_store %arg6[%c0_327, %c0_328, %c32_329], %619 {strides = array<i32>} : memref<8x2x64xf32, #tpu.memory_space<vmem>>, vector<1x2x32xf32>,
    %c0_330 = arith.constant 0 : index
    %c0_331 = arith.constant 0 : index
    %620 = vector.load %arg9[%c0_330, %c0_331] : memref<2x32xf32, #tpu.memory_space<vmem>>, vector<2x32xf32>
    %c0_332 = arith.constant 0 : index
    %c0_333 = arith.constant 0 : index
    %c0_334 = arith.constant 0 : index
    %621 = vector.load %arg7[%c0_332, %c0_333, %c0_334] : memref<2x2x32xf32, #tpu.memory_space<vmem>>, vector<1x2x32xf32>
    %622 = vector.shape_cast %621 : vector<1x2x32xf32> to vector<2x32xf32>
    %623 = vector.shape_cast %620 : vector<2x32xf32> to vector<1x2x32xf32>
    tpu.vector_store %arg7[%c0_332, %c0_333, %c0_334], %623 {strides = array<i32>} : memref<2x2x32xf32, #tpu.memory_space<vmem>>, vector<1x2x32xf32>,
    %c0_335 = arith.constant 0 : index
    %c0_336 = arith.constant 0 : index
    %624 = vector.load %arg11[%c0_335, %c0_336] : memref<2x32xf32, #tpu.memory_space<vmem>>, vector<2x32xf32>
    %c1_337 = arith.constant 1 : index
    %c0_338 = arith.constant 0 : index
    %c0_339 = arith.constant 0 : index
    %625 = vector.load %arg7[%c1_337, %c0_338, %c0_339] : memref<2x2x32xf32, #tpu.memory_space<vmem>>, vector<1x2x32xf32>
    %626 = vector.shape_cast %625 : vector<1x2x32xf32> to vector<2x32xf32>
    %627 = vector.shape_cast %624 : vector<2x32xf32> to vector<1x2x32xf32>
    tpu.vector_store %arg7[%c1_337, %c0_338, %c0_339], %627 {strides = array<i32>} : memref<2x2x32xf32, #tpu.memory_space<vmem>>, vector<1x2x32xf32>,
    %c0_340 = arith.constant 0 : index
    %c0_341 = arith.constant 0 : index
    %628 = vector.load %arg10[%c0_340, %c0_341] : memref<2x32xf32, #tpu.memory_space<vmem>>, vector<2x32xf32>
    %c0_342 = arith.constant 0 : index
    %c0_343 = arith.constant 0 : index
    %c0_344 = arith.constant 0 : index
    %629 = vector.load %arg8[%c0_342, %c0_343, %c0_344] : memref<2x2x32xf32, #tpu.memory_space<vmem>>, vector<1x2x32xf32>
    %630 = vector.shape_cast %629 : vector<1x2x32xf32> to vector<2x32xf32>
    %631 = vector.shape_cast %628 : vector<2x32xf32> to vector<1x2x32xf32>
    tpu.vector_store %arg8[%c0_342, %c0_343, %c0_344], %631 {strides = array<i32>} : memref<2x2x32xf32, #tpu.memory_space<vmem>>, vector<1x2x32xf32>,
    %c0_345 = arith.constant 0 : index
    %c0_346 = arith.constant 0 : index
    %632 = vector.load %arg12[%c0_345, %c0_346] : memref<2x32xf32, #tpu.memory_space<vmem>>, vector<2x32xf32>
    %c1_347 = arith.constant 1 : index
    %c0_348 = arith.constant 0 : index
    %c0_349 = arith.constant 0 : index
    %633 = vector.load %arg8[%c1_347, %c0_348, %c0_349] : memref<2x2x32xf32, #tpu.memory_space<vmem>>, vector<1x2x32xf32>
    %634 = vector.shape_cast %633 : vector<1x2x32xf32> to vector<2x32xf32>
    %635 = vector.shape_cast %632 : vector<2x32xf32> to vector<1x2x32xf32>
    tpu.vector_store %arg8[%c1_347, %c0_348, %c0_349], %635 {strides = array<i32>} : memref<2x2x32xf32, #tpu.memory_space<vmem>>, vector<1x2x32xf32>,
    return
  }
  func.func @transform_0(%arg0: i32) -> (i32, i32, i32) {
    %c0_i32 = arith.constant 0 : i32
    %c0_i32_0 = arith.constant 0 : i32
    %c0_i32_1 = arith.constant 0 : i32
    %c0_i32_2 = arith.constant 0 : i32
    return %c0_i32, %c0_i32_0, %c0_i32_1 : i32, i32, i32
  }
  func.func @transform_1(%arg0: i32) -> (i32, i32) {
    %c0_i32 = arith.constant 0 : i32
    %c0_i32_0 = arith.constant 0 : i32
    %c0_i32_1 = arith.constant 0 : i32
    return %c0_i32, %c0_i32_0 : i32, i32
  }
  func.func @transform_2(%arg0: i32) -> (i32, i32) {
    %c0_i32 = arith.constant 0 : i32
    %c0_i32_0 = arith.constant 0 : i32
    %c0_i32_1 = arith.constant 0 : i32
    return %c0_i32, %c0_i32_0 : i32, i32
  }
  func.func @transform_3(%arg0: i32) -> (i32, i32, i32) {
    %c0_i32 = arith.constant 0 : i32
    %c0_i32_0 = arith.constant 0 : i32
    %c0_i32_1 = arith.constant 0 : i32
    %c0_i32_2 = arith.constant 0 : i32
    return %c0_i32, %c0_i32_0, %c0_i32_1 : i32, i32, i32
  }
  func.func @transform_4(%arg0: i32) -> (i32, i32, i32) {
    %c0_i32 = arith.constant 0 : i32
    %c0_i32_0 = arith.constant 0 : i32
    %c0_i32_1 = arith.constant 0 : i32
    %c0_i32_2 = arith.constant 0 : i32
    return %c0_i32, %c0_i32_0, %c0_i32_1 : i32, i32, i32
  }
  func.func @transform_5(%arg0: i32) -> (i32, i32, i32) {
    %c0_i32 = arith.constant 0 : i32
    %c0_i32_0 = arith.constant 0 : i32
    %c0_i32_1 = arith.constant 0 : i32
    %c0_i32_2 = arith.constant 0 : i32
    return %c0_i32, %c0_i32_0, %c0_i32_1 : i32, i32, i32
  }
  func.func @transform_6(%arg0: i32) -> (i32, i32, i32) {
    %c0_i32 = arith.constant 0 : i32
    %c0_i32_0 = arith.constant 0 : i32
    %c0_i32_1 = arith.constant 0 : i32
    %c0_i32_2 = arith.constant 0 : i32
    return %c0_i32, %c0_i32_0, %c0_i32_1 : i32, i32, i32
  }
  func.func @transform_7(%arg0: i32) -> (i32, i32, i32) {
    %c0_i32 = arith.constant 0 : i32
    %c0_i32_0 = arith.constant 0 : i32
    %c0_i32_1 = arith.constant 0 : i32
    %c0_i32_2 = arith.constant 0 : i32
    return %c0_i32, %c0_i32_0, %c0_i32_1 : i32, i32, i32
  }
}

</mosaic_0001>

<bundles_post_ra>
// kernel: bilstm_forward.7
= control target key start
LH: loop header
LB: loop body
LE: loop exit
PB: predicated region body
PF: predicated region fallthrough
CT: control target
= control target key end

     0   :  { %v155_v3 = vmov 0.0   ;;  %vm44_vm0 = vcmask 523264   ;;  %v34_v19 = vlaneseq  ;;  %s245_s1 = inlined_call_operand.vmem [shape: f32[64,256], index: 1, kind: input, shape index: {}]   ;;  %s246_s0 = inlined_call_operand.vmem [shape: f32[16,64], index: 0, kind: input, shape index: {}]   ;;  %s247_s2 = inlined_call_operand.vmem [shape: f32[1,256], index: 2, kind: input, shape index: {}]   ;;  %s248_s3 = inlined_call_operand.vmem [shape: f32[16,256], index: 3, kind: output, shape index: {}]  }
   0x1   :  { %v31_v0 = vld [vmem:[%s245_s1 + $0x78] sm:$0xff]  ;;  %v30_v1 = vld [vmem:[%s245_s1 + $0x70] sm:$0xff]  ;;  %v29_v2 = vld [vmem:[%s245_s1 + $0x68] sm:$0xff]  ;;  %115 = vmatprep.mubr.f32.mxu0 %v155_v3  ;;  %121 = vmatprep.mubr.f32.mxu1 %v155_v3 }
   0x2   :  { %67 = vmatprep.subr.mxu0 %v31_v0  ;;  %138 = vmatprep.subr.mxu1 %v31_v0  ;;  %v28_v4 = vld [vmem:[%s245_s1 + $0x60] sm:$0xff]  ;;  %v27_v5 = vld [vmem:[%s245_s1 + $0x58] sm:$0xff]  ;;  %v26_v6 = vld [vmem:[%s245_s1 + $0x50] sm:$0xff]  ;;  %v35_v20 = vshrl.u32 %v34_v19, 7 }
   0x3   :  { %68 = vmatpush1.msra.mxu0 %v30_v1  ;;  %146 = vmatpush1.msra.mxu1 %v30_v1  ;;  %v25_v7 = vld [vmem:[%s245_s1 + $0x48] sm:$0xff]  ;;  %v24_v8 = vld [vmem:[%s245_s1 + $0x40] sm:$0xff]  ;;  %v23_v9 = vld [vmem:[%s245_s1 + $0x38] sm:$0xff] }
   0x4   :  { %69 = vmatprep.subr.mxu0 %v29_v2  ;;  %139 = vmatprep.subr.mxu1 %v29_v2  ;;  %v22_v10 = vld [vmem:[%s245_s1 + $0x30] sm:$0xff]  ;;  %v21_v11 = vld [vmem:[%s245_s1 + $0x28] sm:$0xff]  ;;  %v20_v12 = vld [vmem:[%s245_s1 + $0x20] sm:$0xff]  ;;  %v36_v21 = vsub.s32 0, %v35_v20  ;;  %v40_v23 = vsub.s32 1, %v35_v20 }
   0x5   :  { %70 = vmatpush1.msra.mxu0 %v28_v4  ;;  %147 = vmatpush1.msra.mxu1 %v28_v4  ;;  %v19_v13 = vld [vmem:[%s245_s1 + $0x18] sm:$0xff]  ;;  %v18_v14 = vld [vmem:[%s245_s1 + $0x10] sm:$0xff]  ;;  %v17_v15 = vld [vmem:[%s245_s1 + $0x8] sm:$0xff] }
   0x6   :  { %71 = vmatprep.subr.mxu0 %v27_v5  ;;  %140 = vmatprep.subr.mxu1 %v27_v5  ;;  %v16_v16 = vld [vmem:[%s245_s1] sm:$0xff]  ;;  %v15_v18 = vld [vmem:[%s246_s0 + $0x8] sm:$0xff] }
   0x7   :  { %72 = vmatpush1.msra.mxu0 %v26_v6  ;;  %148 = vmatpush1.msra.mxu1 %v26_v6  ;;  %v14_v17 = vld [vmem:[%s246_s0] sm:$0xff] }
   0x8   :  { %73 = vmatprep.subr.mxu0 %v25_v7  ;;  %141 = vmatprep.subr.mxu1 %v25_v7  ;;  %v32_v22 = vld [vmem:[%s247_s2] sm:$0x3] }
   0x9   :  { %74 = vmatpush1.msra.mxu0 %v24_v8  ;;  %149 = vmatpush1.msra.mxu1 %v24_v8  ;;  %v37_v24 = vrot.slane %v32_v22, %v36_v21  ;;  %v41_v25 = vrot.slane %v32_v22, %v40_v23 }
   0xa   :  { %75 = vmatprep.subr.mxu0 %v23_v9  ;;  %142 = vmatprep.subr.mxu1 %v23_v9 }
   0xb   :  { %76 = vmatpush1.msra.mxu0 %v22_v10  ;;  %150 = vmatpush1.msra.mxu1 %v22_v10 }
   0xc   :  { %77 = vmatprep.subr.mxu0 %v21_v11  ;;  %143 = vmatprep.subr.mxu1 %v21_v11 }
   0xd   :  { %78 = vmatpush1.msra.mxu0 %v20_v12  ;;  %151 = vmatpush1.msra.mxu1 %v20_v12 }
   0xe   :  { %79 = vmatprep.subr.mxu0 %v19_v13  ;;  %144 = vmatprep.subr.mxu1 %v19_v13 }
   0xf   :  { %80 = vmatpush1.msra.mxu0 %v18_v14  ;;  %152 = vmatpush1.msra.mxu1 %v18_v14 }
  0x10   :  { %81 = vmatprep.subr.mxu0 %v17_v15  ;;  %145 = vmatprep.subr.mxu1 %v17_v15 }
  0x11   :  { %82 = vmatpush1.msra.mxu0 %v16_v16  ;;  %153 = vmatpush1.msra.mxu1 %v16_v16 }
  0x12   :  { %136 = vmatmul.mubr.msk.f32.vlgmr.msra.gmra.mxu0 %vm44_vm0, %v14_v17  ;;  %137 = vmatmul.mubr.msk.f32.vlgmr.msra.gmra.mxu1 %vm44_vm0, %v15_v18 }
  0xd2   :  { %v117_v26 = vpop.f32.mrf.mxu0  ;;  %v123_v27 = vpop.f32.mrf.mxu1 }
  0xd3   :  { %v118_v28 = vadd.f32 %v117_v26, %v37_v24  ;;  %v124_v29 = vadd.f32 %v123_v27, %v37_v24 }
  0xd4   :  { %v119_v30 = vpop.f32.mrf.mxu0  ;;  %v125_v31 = vpop.f32.mrf.mxu1 }
  0xd5   :  { %128 = vst [vmem:[%s248_s3] sm:$0xff] %v118_v28  ;;  %130 = vst [vmem:[%s248_s3 + $0x10] sm:$0xff] %v124_v29  ;;  %v120_v32 = vadd.f32 %v119_v30, %v41_v25  ;;  %v126_v33 = vadd.f32 %v125_v31, %v41_v25 }
  0xd7   :  { %129 = vst [vmem:[%s248_s3 + $0x8] sm:$0xff] %v120_v32  ;;  %131 = vst [vmem:[%s248_s3 + $0x18] sm:$0xff] %v126_v33 }

// kernel: bilstm_forward.5
= control target key start
LH: loop header
LB: loop body
LE: loop exit
PB: predicated region body
PF: predicated region fallthrough
CT: control target
= control target key end

     0   :  { %v131_v3 = vmov 0.0   ;;  %vm32_vm0 = vcmask 130048   ;;  %v22_v7 = vlaneseq  ;;  %s185_s1 = inlined_call_operand.vmem [shape: f32[16,256], index: 1, kind: input, shape index: {}]   ;;  %s186_s0 = inlined_call_operand.vmem [shape: f32[16,16], index: 0, kind: input, shape index: {}]   ;;  %s187_s2 = inlined_call_operand.vmem [shape: f32[1,256], index: 2, kind: input, shape index: {}]   ;;  %s188_s3 = inlined_call_operand.vmem [shape: f32[16,256], index: 3, kind: output, shape index: {}]  }
   0x1   :  { %v19_v0 = vld [vmem:[%s185_s1 + $0x18] sm:$0xff]  ;;  %v18_v1 = vld [vmem:[%s185_s1 + $0x10] sm:$0xff]  ;;  %v17_v2 = vld [vmem:[%s185_s1 + $0x8] sm:$0xff]  ;;  %103 = vmatprep.mubr.f32.mxu0 %v131_v3  ;;  %109 = vmatprep.mubr.f32.mxu1 %v131_v3 }
   0x2   :  { %67 = vmatprep.subr.mxu0 %v19_v0  ;;  %126 = vmatprep.subr.mxu1 %v19_v0  ;;  %v16_v4 = vld [vmem:[%s185_s1] sm:$0xff]  ;;  %v15_v6 = vld [vmem:[%s186_s0 + $0x8] sm:$0xff]  ;;  %v23_v8 = vshrl.u32 %v22_v7, 7 }
   0x3   :  { %68 = vmatpush1.msra.mxu0 %v18_v1  ;;  %128 = vmatpush1.msra.mxu1 %v18_v1  ;;  %v14_v5 = vld [vmem:[%s186_s0] sm:$0xff] }
   0x4   :  { %69 = vmatprep.subr.mxu0 %v17_v2  ;;  %127 = vmatprep.subr.mxu1 %v17_v2  ;;  %v24_v9 = vsub.s32 0, %v23_v8  ;;  %v20_v10 = vld [vmem:[%s187_s2] sm:$0x3]  ;;  %v28_v11 = vsub.s32 1, %v23_v8 }
   0x5   :  { %70 = vmatpush1.msra.mxu0 %v16_v4  ;;  %129 = vmatpush1.msra.mxu1 %v16_v4 }
   0x6   :  { %124 = vmatmul.mubr.msk.f32.vlgmr.msra.gmra.mxu0 %vm32_vm0, %v14_v5  ;;  %125 = vmatmul.mubr.msk.f32.vlgmr.msra.gmra.mxu1 %vm32_vm0, %v15_v6  ;;  %v25_v12 = vrot.slane %v20_v10, %v24_v9  ;;  %v29_v13 = vrot.slane %v20_v10, %v28_v11 }
  0xc6   :  { %v105_v14 = vpop.f32.mrf.mxu0  ;;  %v111_v15 = vpop.f32.mrf.mxu1 }
  0xc7   :  { %v106_v16 = vadd.f32 %v105_v14, %v25_v12  ;;  %v112_v17 = vadd.f32 %v111_v15, %v25_v12 }
  0xc8   :  { %v107_v18 = vpop.f32.mrf.mxu0  ;;  %v113_v19 = vpop.f32.mrf.mxu1 }
  0xc9   :  { %116 = vst [vmem:[%s188_s3] sm:$0xff] %v106_v16  ;;  %118 = vst [vmem:[%s188_s3 + $0x10] sm:$0xff] %v112_v17  ;;  %v108_v20 = vadd.f32 %v107_v18, %v29_v13  ;;  %v114_v21 = vadd.f32 %v113_v19, %v29_v13 }
  0xcb   :  { %117 = vst [vmem:[%s188_s3 + $0x8] sm:$0xff] %v108_v20  ;;  %119 = vst [vmem:[%s188_s3 + $0x18] sm:$0xff] %v114_v21 }

// kernel: bilstm_forward.9
= control target key start
LH: loop header
LB: loop body
LE: loop exit
PB: predicated region body
PF: predicated region fallthrough
CT: control target
= control target key end

     0   :  { %vm32_vm0 = vcmask 523264   ;;  %s278_s0 = inlined_call_operand.vmem [shape: f32[16,64], index: 0, kind: input, shape index: {}]   ;;  %s279_s1 = inlined_call_operand.vmem [shape: f32[64,128], index: 1, kind: input, shape index: {}]   ;;  %s280_s2 = inlined_call_operand.vmem [shape: f32[1,128], index: 2, kind: input, shape index: {}]   ;;  %s281_s3 = inlined_call_operand.hbm [shape: f32[16,128], index: 3, kind: output, shape index: {}]  }
   0x1   :  { %v24_v0 = vld [vmem:[%s279_s1 + $0x38] sm:$0xff]  ;;  %v23_v1 = vld [vmem:[%s279_s1 + $0x30] sm:$0xff]  ;;  %v22_v2 = vld [vmem:[%s279_s1 + $0x28] sm:$0xff] }
   0x2   :  { %165 = vmatprep.subr.mxu0 %v24_v0  ;;  %v15_v3 = vld [vmem:[%s278_s0] sm:$0xff] }
   0x3   :  { %166 = vmatpush3.msra.mxu0 %v24_v0  ;;  %181 = vmatprep.mubr.msk.f32.mxu0 %vm32_vm0, %v15_v3 }
   0x4   :  { %167 = vmatprep.subr.mxu0 %v23_v1 }
   0x5   :  { %8 = vsyncpa [#allocation3], 0  ;;  %168 = vmatpush3.msra.mxu0 %v23_v1  ;;  %v21_v4 = vld [vmem:[%s279_s1 + $0x20] sm:$0xff]  ;;  %v20_v5 = vld [vmem:[%s279_s1 + $0x18] sm:$0xff] }
   0x6   :  { %169 = vmatprep.subr.mxu0 %v22_v2  ;;  %v19_v6 = vld [vmem:[%s279_s1 + $0x10] sm:$0xff]  ;;  %v18_v7 = vld [vmem:[%s279_s1 + $0x8] sm:$0xff]  ;;  %v17_v8 = vld [vmem:[%s279_s1] sm:$0xff] }
   0x7   :  { %170 = vmatpush3.msra.mxu0 %v22_v2  ;;  %v16_v9 = vld [vmem:[%s278_s0 + $0x8] sm:$0xff]  ;;  %v152_v11 = vld [vmem:[%s280_s2] ss:$0 sm:$0xff]  ;;  %s217_s0 = smov [#allocation2]  }
   0x8   :  { %171 = vmatprep.subr.mxu0 %v21_v4  ;;  %s141_s1 = sshll.u32 %s217_s0, 4  ;;  %s142_s1 = int_to_ptr.vmem [resolvable:$true] %s141_s1 }
   0x9   :  { %172 = vmatpush3.msra.mxu0 %v21_v4  ;;  %s195_s2 = scalar_lea.vmem %s142_s1, 256  ;;  %p200_p1 = scmp.lt.s32.totalorder %s142_s1, %s142_s1 }
   0xa   :  { %173 = vmatprep.subr.mxu0 %v20_v5  ;;  %p196_p0 = scmp.ne.s32.totalorder %s142_s1, %s195_s2  ;;  %p201_p2 = scmp.lt.s32.totalorder %s195_s2, %s195_s2 }
   0xb   :  { %174 = vmatpush3.msra.mxu0 %v20_v5 }
   0xc   :  { %175 = vmatprep.subr.mxu0 %v19_v6  ;;  %p202_p3 = por %p201_p2, %p200_p1 }
   0xd   :  { %176 = vmatpush3.msra.mxu0 %v19_v6 }
   0xe   :  { %177 = vmatprep.subr.mxu0 %v18_v7  ;;  %p203_p4 = pnand %p202_p3, %p196_p0 }
   0xf   :  { %178 = vmatpush3.msra.mxu0 %v18_v7 }
  0x10   :  { %179 = vmatprep.subr.mxu0 %v17_v8 }
  0x11   :  { %180 = vmatpush3.msra.mxu0 %v17_v8 }
  0x12   :  { %182 = vmatmul.mubr.msk.f32.vlgmr.msra.gmra.mxu0 %vm32_vm0, %v16_v9 }
  0xd2   :  { %v183_v10 = vpop.f32.mrf.mxu0 }
  0xd3   :  { %v111_v14 = vadd.f32 %v183_v10, %v152_v11 }
  0xd4   :  { %v105_v12 = vpop.f32.mrf.mxu0 }
  0xd5   :  { %v106_v13 = vadd.f32 %v152_v11, %v105_v12 }
  0xd7   :  { %114 = vmax.xlane.f32.xlu0 %v106_v13 }
  0xdb   :  { %116 = vmax.xlane.f32.xlu0 %v111_v14 }
 0x160   :  { %v115_v15 = vpop.xlane.xlu0 %114 }
 0x161   :  { %v118_v16 = vsub.f32 %v106_v13, %v115_v15 }
 0x163   :  { %v120_v17 = vmul.f32 1.442695, %v118_v16 }
 0x164   :  { %v117_v18 = vpop.xlane.xlu0 %116 }
 0x165   :  { %v119_v19 = vsub.f32 %v111_v14, %v117_v18  ;;  %187 = vpow2.f32 %v120_v17 }
 0x167   :  { %v122_v20 = vmul.f32 1.442695, %v119_v19 }
 0x169   :  { %189 = vpow2.f32 %v122_v20 }
 0x172   :  { %v188_v21 = vpop.eup %187 }
 0x173   :  { %124 = vadd.xlane.f32.xlu1 %v188_v21 }
 0x176   :  { %v190_v22 = vpop.eup %189 }
 0x177   :  { %126 = vadd.xlane.f32.xlu1 %v190_v22 }
 0x1fc   :  { %v125_v23 = vpop.xlane.xlu1 %124 }
 0x1fd   :  { %191 = vlog2.f32 %v125_v23 }
 0x200   :  { %v127_v24 = vpop.xlane.xlu1 %126 }
 0x201   :  { %193 = vlog2.f32 %v127_v24 }
 0x20a   :  { %v192_v25 = vpop.eup %191 }
 0x20b   :  { %v129_v26 = vmul.f32 0.6931472, %v192_v25 }
 0x20d   :  { %v132_v27 = vsub.f32 %v118_v16, %v129_v26 }
 0x20e   :  { %v194_v28 = vpop.eup %193 }
 0x20f   :  { %134 = vst [vmem:[#allocation2] sm:$0xff] %v132_v27  ;;  %v131_v29 = vmul.f32 0.6931472, %v194_v28 }
 0x211   :  { %v133_v30 = vsub.f32 %v119_v19, %v131_v29 }
 0x213   :  { %135 = vst [vmem:[#allocation2 + $0x8] sm:$0xff] %v133_v30 }
 0x214   :  { %206 = shalt.err (!%p203_p4)
}
 0x215   :  { %s218_s7 = smov 128   ;;  %s219_s8 = smov 8  }
 0x216   :  { %147 = dma.vmem_to_hbm [thread:$0]  %s142_s1, 256, %s281_s3, [#allocation3], %s218_s7, %s218_s7, %s219_s8  }
 0x217   :  { %215 = dma.done.wait [#allocation3], 256  }
 0x218   :  { %216 = vsyncadd [#allocation3], 4294967040 }
 0x219   :  { %151 = vsyncpa [#allocation3], 1 }

// kernel: bilstm_forward.6
= control target key start
LH: loop header
LB: loop body
LE: loop exit
PB: predicated region body
PF: predicated region fallthrough
CT: control target
= control target key end

     0   :  { %v2846_v0 = vmov 0.0   ;;  %vm24_vm0 = vcmask 254976   ;;  %vm2847_vm1 = vmmov 0   ;;  %vm43_vm2 = vcmask 261120   ;;  %s2848_s23 = smov 32   ;;  %s2849_s28 = smov 64   ;;  %s3470_s1 = inlined_call_operand.vmem [shape: f32[32,128], index: 1, kind: input, shape index: {}]   ;;  %s3471_s2 = inlined_call_operand.vmem [shape: f32[32,128], index: 2, kind: input, shape index: {}]   ;;  %s3472_s3 = inlined_call_operand.vmem [shape: f32[2,2,32], index: 3, kind: input, shape index: {}]   ;;  %s3473_s4 = inlined_call_operand.vmem [shape: f32[2,2,32], index: 4, kind: input, shape index: {}]   ;;  %s3474_s0 = inlined_call_operand.vmem [shape: f32[8,2,256], index: 0, kind: input, shape index: {}]   ;;  %s3475_s5 = inlined_call_operand.vmem [shape: f32[8,2,64], index: 5, kind: output, shape index: {0}]   ;;  %s3476_s7 = inlined_call_operand.vmem [shape: f32[2,2,32], index: 7, kind: output, shape index: {2}]   ;;  %s3477_s6 = inlined_call_operand.vmem [shape: f32[2,2,32], index: 6, kind: output, shape index: {1}]  }
   0x1   :  { %2536 = vmatprep.subr.mxu0 %v2846_v0  ;;  %v2896_v1 = vld [vmem:[%s3470_s1 + $0x18] sm:$0xff]  ;;  %2547 = vmatprep.subr.mxu1 %v2846_v0  ;;  %v2902_v2 = vld [vmem:[%s3470_s1 + $0x10] sm:$0xff]  ;;  %v2921_v5 = vld [vmem:[%s3470_s1 + $0x8] sm:$0xff]  ;;  %v2850_v50 = vmov 1983009808   ;;  %v275_v52 = vlaneseq  ;;  %s2851_s29 = smov 96  }
   0x2   :  { %v2907_v3 = vld [vmem:[%s3471_s2 + $0x18] sm:$0xff]  ;;  %2537 = vmatpush3.msra.mxu0 %v2896_v1  ;;  %v2914_v4 = vld [vmem:[%s3471_s2 + $0x10] sm:$0xff]  ;;  %v2926_v6 = vld [vmem:[%s3471_s2 + $0x8] sm:$0xff]  ;;  %2544 = vmatprep.mubr.msk.f32.mxu0 %vm2847_vm1, %v2846_v0  ;;  %v273_v51 = vunpack.c.l.s4 %v2850_v50  ;;  %vm324_vm3 = vcmask 517376  }
   0x3   :  { %2548 = vmatpush3.msra.mxu1 %v2907_v3  ;;  %2538 = vmatprep.subr.mxu0 %v2846_v0  ;;  %v23_v7 = vld [vmem:[%s3472_s3] sm:$0x3]  ;;  %v2376_v8 = vld [vmem:[%s3472_s3 + $0x2] sm:$0x3]  ;;  %v2378_v17 = vld [vmem:[%s3474_s0 + $0x1c] sm:$0xf] }
   0x4   :  { %2549 = vmatprep.subr.mxu1 %v2846_v0  ;;  %2539 = vmatpush3.msra.mxu0 %v2902_v2  ;;  %25 = vst.msk [vmem:[#allocation2] sm:$0x3] %vm24_vm0, %v23_v7  ;;  %v26_v9 = vld [vmem:[%s3473_s4] sm:$0x3]  ;;  %v2377_v10 = vld [vmem:[%s3473_s4 + $0x2] sm:$0x3]  ;;  %v274_v53 = vunpack.c.0.s8 %v273_v51 }
   0x5   :  { %2550 = vmatpush3.msra.mxu1 %v2914_v4  ;;  %2540 = vmatprep.subr.mxu0 %v2846_v0  ;;  %v2948_v11 = vld [vmem:[%s3470_s1] sm:$0xff]  ;;  %30 = vst.msk [vmem:[#allocation4] sm:$0x3] %vm24_vm0, %v2376_v8  ;;  %27 = vst.msk [vmem:[#allocation3] sm:$0x3] %vm24_vm0, %v26_v9  ;;  %v233_v19 = vrot.slane %v2378_v17, 2 }
   0x6   :  { %2551 = vmatprep.subr.mxu1 %v2846_v0  ;;  %33 = vst.msk [vmem:[#allocation5] sm:$0x3] %vm24_vm0, %v2377_v10  ;;  %2541 = vmatpush3.msra.mxu0 %v2921_v5  ;;  %v2959_v12 = vld [vmem:[%s3471_s2] sm:$0xff]  ;;  %v276_v54 = vshrl.u32 %v275_v52, 7 }
   0x7   :  { %2542 = vmatprep.subr.mxu0 %v2846_v0  ;;  %2552 = vmatpush3.msra.mxu1 %v2926_v6  ;;  %v34_v18 = vld [vmem:[%s3474_s0] sm:$0xf] }
   0x8   :  { %2543 = vmatpush3.msra.mxu0 %v2948_v11  ;;  %2553 = vmatprep.subr.mxu1 %v2846_v0  ;;  %v3006_v56 = vsub.s32 %v274_v53, %v276_v54 }
   0x9   :  { %2554 = vmatpush3.msra.mxu1 %v2959_v12  ;;  %2555 = vmatprep.mubr.msk.f32.mxu1 %vm2847_vm1, %v2846_v0 }
   0xa   :  { %2558 = vmatprep.subr.mxu0 %v2846_v0  ;;  %2569 = vmatprep.subr.mxu1 %v2846_v0 }
   0xb   :  { %v37_v13 = vld [vmem:[#allocation2] sm:$0x3] }
   0xc   :  { %2545 = vmatmul.mubr.msk.f32.vlgmr.msra.gmra.mxu0 %vm43_vm2, %v37_v13  ;;  %v153_v14 = vld [vmem:[#allocation4] sm:$0x3]  ;;  %v2381_v15 = vld.sshfl [vmem:[#allocation3] sm:$0x3 pattern:$0x76325410] }
   0xd   :  { %2556 = vmatmul.mubr.msk.f32.vlgmr.msra.gmra.mxu1 %vm43_vm2, %v153_v14  ;;  %133 = vrot.lane.b32.xlu1 %v2381_v15, %s2848_s23  ;;  %v2384_v16 = vld.sshfl [vmem:[#allocation5] sm:$0x3 pattern:$0x76325410] }
   0xe   :  { %2559 = vmatpush3.msra.mxu0 %v2896_v1  ;;  %2570 = vmatpush3.msra.mxu1 %v2907_v3  ;;  %v2386_v15 = vld [vmem:[%s3474_s0 + $0x4] sm:$0xf] }
   0xf   :  { %2560 = vmatprep.subr.mxu0 %v2846_v0  ;;  %2571 = vmatprep.subr.mxu1 %v2846_v0 }
  0x10   :  { %2561 = vmatpush3.msra.mxu0 %v2902_v2  ;;  %2566 = vmatprep.mubr.msk.f32.mxu0 %vm2847_vm1, %v2846_v0 }
  0x11   :  { %251 = vrot.lane.b32.xlu1 %v2384_v16, %s2848_s23  ;;  %2562 = vmatprep.subr.mxu0 %v2846_v0  ;;  %v2387_v16 = vld [vmem:[%s3474_s0 + $0x18] sm:$0xf] }
  0x12   :  { %2563 = vmatpush3.msra.mxu0 %v2921_v5  ;;  %2572 = vmatpush3.msra.mxu1 %v2914_v4 }
  0x13   :  { %2564 = vmatprep.subr.mxu0 %v2846_v0  ;;  %2573 = vmatprep.subr.mxu1 %v2846_v0 }
  0x14   :  { %2565 = vmatpush3.msra.mxu0 %v2948_v11  ;;  %2574 = vmatpush3.msra.mxu1 %v2926_v6 }
  0x15   :  { %2575 = vmatprep.subr.mxu1 %v2846_v0  ;;  %2577 = vmatprep.mubr.msk.f32.mxu1 %vm2847_vm1, %v2846_v0 }
  0x16   :  { %2576 = vmatpush3.msra.mxu1 %v2959_v12  ;;  %2580 = vmatprep.subr.mxu0 %v2846_v0 }
  0x17   :  { %2591 = vmatprep.subr.mxu1 %v2846_v0 }
  0x7f   :  { %v134_v40 = vpop.permute.xlu1 %133 }
  0x83   :  { %v252_v42 = vpop.permute.xlu1 %251 }
  0xcc   :  { %v113_v20 = vpop.f32.mrf.mxu0 }
  0xcd   :  { %v117_v21 = vadd.f32 %v113_v20, %v34_v18  ;;  %v228_v22 = vpop.f32.mrf.mxu1 }
  0xce   :  { %v2546_v23 = vpop.f32.mrf.mxu0  ;;  %v235_v24 = vadd.f32 %v233_v19, %v228_v22  ;;  %v525_v19 = vrot.slane %v2387_v16, 2 }
  0xcf   :  { %2718 = vtanh.f32 %v117_v21  ;;  %v2557_v25 = vpop.f32.mrf.mxu1  ;;  %v2380_v28 = vmul.f32 -1.442695, %v117_v21 }
  0xd0   :  { %2720 = vtanh.f32 %v235_v24  ;;  %v2383_v29 = vmul.f32 -1.442695, %v235_v24 }
  0xd1   :  { %2722 = vpow2.f32 %v2380_v28 }
  0xd2   :  { %2724 = vpow2.f32 %v2383_v29 }
  0xdc   :  { %v2719_v26 = vpop.eup %2718 }
  0xdd   :  { %138 = vrot.lane.b32.xlu0 %v2719_v26, %s2849_s28  ;;  %v2721_v27 = vpop.eup %2720 }
  0xde   :  { %v2723_v30 = vpop.eup %2722 }
  0xdf   :  { %v121_v31 = vadd.f32 1.0, %v2723_v30  ;;  %v2725_v32 = vpop.eup %2724 }
  0xe0   :  { %v239_v33 = vadd.f32 1.0, %v2725_v32 }
  0xe1   :  { %256 = vrot.lane.b32.xlu0 %v2721_v27, %s2849_s28  ;;  %2726 = vrcp.f32 %v121_v31 }
  0xe2   :  { %2728 = vrcp.f32 %v239_v33 }
  0xee   :  { %v2727_v34 = vpop.eup %2726 }
  0xef   :  { %v2729_v37 = vpop.eup %2728  ;;  %v136_v41 = vmul.f32 %v2727_v34, %v134_v40 }
  0xf0   :  { %v254_v45 = vmul.f32 %v2729_v37, %v252_v42 }
 0x14f   :  { %v139_v35 = vpop.permute.xlu0 %138 }
 0x150   :  { %v141_v36 = vmul.f32 %v2727_v34, %v139_v35 }
 0x152   :  { %143 = vrot.lane.b32.xlu0 %v141_v36, %s2848_s23 }
 0x153   :  { %v257_v38 = vpop.permute.xlu0 %256 }
 0x154   :  { %v259_v39 = vmul.f32 %v2729_v37, %v257_v38 }
 0x156   :  { %261 = vrot.lane.b32.xlu1 %v259_v39, %s2848_s23 }
 0x1c4   :  { %v144_v43 = vpop.permute.xlu0 %143 }
 0x1c5   :  { %v146_v44 = vadd.f32 %v144_v43, %v136_v41 }
 0x1c7   :  { %2730 = vtanh.f32 %v146_v44  ;;  %v290_v61 = vrot.slane %v146_v44, %v3006_v56 }
 0x1c8   :  { %v262_v46 = vpop.permute.xlu1 %261 }
 0x1c9   :  { %v264_v47 = vadd.f32 %v262_v46, %v254_v45 }
 0x1cb   :  { %2732 = vtanh.f32 %v264_v47  ;;  %v314_v63 = vrot.slane %v264_v47, %v3006_v56 }
 0x1d4   :  { %v2731_v48 = vpop.eup %2730 }
 0x1d5   :  { %149 = vrot.lane.b32.xlu0 %v2731_v48, %s2849_s28 }
 0x1d8   :  { %v2733_v49 = vpop.eup %2732 }
 0x1d9   :  { %267 = vrot.lane.b32.xlu1 %v2733_v49, %s2849_s28 }
 0x247   :  { %v150_v55 = vpop.permute.xlu0 %149 }
 0x248   :  { %v152_v57 = vmul.f32 %v2727_v34, %v150_v55 }
 0x24a   :  { %v278_v58 = vrot.slane %v152_v57, %v3006_v56 }
 0x24b   :  { %v268_v59 = vpop.permute.xlu1 %267 }
 0x24c   :  { %v270_v60 = vmul.f32 %v2729_v37, %v268_v59  ;;  %279 = vrot.lane.b32.xlu0 %v278_v58, %s2848_s23 }
 0x24e   :  { %v3012_v62 = vrot.slane %v270_v60, %v3006_v56 }
 0x250   :  { %303 = vrot.lane.b32.xlu1 %v3012_v62, %s2848_s23  ;;  %291 = vrot.lane.b32.xlu0 %v290_v61, %s2851_s29 }
 0x254   :  { %315 = vrot.lane.b32.xlu1 %v314_v63, %s2851_s29 }
 0x2be   :  { %v280_v7 = vpop.permute.xlu0 %279 }
 0x2bf   :  { %282 = vst.msk [vmem:[#allocation2] sm:$0x3] %vm24_vm0, %v280_v7  ;;  %319 = vst.msk [vmem:[%s3475_s5] sm:$0x3] %vm24_vm0, %v280_v7 }
 0x2c2   :  { %v304_v8 = vpop.permute.xlu1 %303  ;;  %v292_v9 = vpop.permute.xlu0 %291 }
 0x2c3   :  { %306 = vst.msk [vmem:[#allocation4] sm:$0x3] %vm24_vm0, %v304_v8  ;;  %294 = vst.msk [vmem:[#allocation3] sm:$0x3] %vm24_vm0, %v292_v9  ;;  %v2396_v9 = vld [vmem:[%s3474_s0 + $0x8] sm:$0xf] }
 0x2c6   :  { %v316_v10 = vpop.permute.xlu1 %315  ;;  %v330_v13 = vld [vmem:[#allocation2] sm:$0x3] }
 0x2c7   :  { %318 = vst.msk [vmem:[#allocation5] sm:$0x3] %vm24_vm0, %v316_v10  ;;  %2567 = vmatmul.mubr.msk.f32.vlgmr.msra.gmra.mxu0 %vm43_vm2, %v330_v13  ;;  %v2397_v10 = vld [vmem:[%s3474_s0 + $0x14] sm:$0xf] }
 0x2c8   :  { %2581 = vmatpush3.msra.mxu0 %v2896_v1  ;;  %2588 = vmatprep.mubr.msk.f32.mxu0 %vm2847_vm1, %v2846_v0 }
 0x2c9   :  { %2582 = vmatprep.subr.mxu0 %v2846_v0 }
 0x2ca   :  { %v445_v14 = vld [vmem:[#allocation4] sm:$0x3]  ;;  %2583 = vmatpush3.msra.mxu0 %v2902_v2  ;;  %v2390_v26 = vld.sshfl [vmem:[#allocation3] sm:$0x3 pattern:$0x76325410] }
 0x2cb   :  { %2578 = vmatmul.mubr.msk.f32.vlgmr.msra.gmra.mxu1 %vm43_vm2, %v445_v14  ;;  %2584 = vmatprep.subr.mxu0 %v2846_v0 }
 0x2cc   :  { %2585 = vmatpush3.msra.mxu0 %v2921_v5  ;;  %2592 = vmatpush3.msra.mxu1 %v2907_v3 }
 0x2cd   :  { %2586 = vmatprep.subr.mxu0 %v2846_v0  ;;  %2593 = vmatprep.subr.mxu1 %v2846_v0 }
 0x2ce   :  { %2594 = vmatpush3.msra.mxu1 %v2914_v4  ;;  %2587 = vmatpush3.msra.mxu0 %v2948_v11  ;;  %v2393_v27 = vld.sshfl [vmem:[#allocation5] sm:$0x3 pattern:$0x76325410] }
 0x2cf   :  { %2595 = vmatprep.subr.mxu1 %v2846_v0  ;;  %2599 = vmatprep.mubr.msk.f32.mxu1 %vm2847_vm1, %v2846_v0 }
 0x2d0   :  { %2596 = vmatpush3.msra.mxu1 %v2926_v6  ;;  %2602 = vmatprep.subr.mxu0 %v2846_v0 }
 0x2d1   :  { %2597 = vmatprep.subr.mxu1 %v2846_v0 }
 0x2d2   :  { %2598 = vmatpush3.msra.mxu1 %v2959_v12 }
 0x2d3   :  { %2613 = vmatprep.subr.mxu1 %v2846_v0 }
 0x387   :  { %v405_v17 = vpop.f32.mrf.mxu0 }
 0x388   :  { %v409_v18 = vadd.f32 %v2386_v15, %v405_v17  ;;  %v817_v15 = vrot.slane %v2397_v10, 2 }
 0x389   :  { %v2568_v20 = vpop.f32.mrf.mxu0 }
 0x38a   :  { %2734 = vtanh.f32 %v409_v18  ;;  %v2389_v28 = vmul.f32 -1.442695, %v409_v18 }
 0x38b   :  { %v520_v21 = vpop.f32.mrf.mxu1 }
 0x38c   :  { %v527_v22 = vadd.f32 %v525_v19, %v520_v21 }
 0x38d   :  { %v2579_v23 = vpop.f32.mrf.mxu1 }
 0x38e   :  { %2736 = vtanh.f32 %v527_v22  ;;  %v2392_v29 = vmul.f32 -1.442695, %v527_v22 }
 0x38f   :  { %2738 = vpow2.f32 %v2389_v28 }
 0x390   :  { %2740 = vpow2.f32 %v2392_v29 }
 0x397   :  { %v2735_v24 = vpop.eup %2734 }
 0x398   :  { %430 = vrot.lane.b32.xlu0 %v2735_v24, %s2849_s28 }
 0x39b   :  { %v2737_v25 = vpop.eup %2736 }
 0x39c   :  { %548 = vrot.lane.b32.xlu1 %v2737_v25, %s2849_s28  ;;  %425 = vrot.lane.b32.xlu0 %v2390_v26, %s2848_s23  ;;  %v2739_v30 = vpop.eup %2738 }
 0x39d   :  { %v413_v31 = vadd.f32 1.0, %v2739_v30  ;;  %v2741_v32 = vpop.eup %2740 }
 0x39e   :  { %v531_v33 = vadd.f32 1.0, %v2741_v32 }
 0x39f   :  { %2742 = vrcp.f32 %v413_v31 }
 0x3a0   :  { %543 = vrot.lane.b32.xlu1 %v2393_v27, %s2848_s23  ;;  %2744 = vrcp.f32 %v531_v33 }
 0x3ac   :  { %v2743_v34 = vpop.eup %2742 }
 0x3ad   :  { %v2745_v37 = vpop.eup %2744 }
 0x40a   :  { %v431_v35 = vpop.permute.xlu0 %430 }
 0x40b   :  { %v433_v36 = vmul.f32 %v2743_v34, %v431_v35 }
 0x40d   :  { %435 = vrot.lane.b32.xlu0 %v433_v36, %s2848_s23 }
 0x40e   :  { %v549_v38 = vpop.permute.xlu1 %548  ;;  %v426_v40 = vpop.permute.xlu0 %425 }
 0x40f   :  { %v551_v39 = vmul.f32 %v2745_v37, %v549_v38  ;;  %v428_v41 = vmul.f32 %v2743_v34, %v426_v40 }
 0x411   :  { %553 = vrot.lane.b32.xlu1 %v551_v39, %s2848_s23 }
 0x412   :  { %v544_v42 = vpop.permute.xlu1 %543 }
 0x413   :  { %v546_v45 = vmul.f32 %v2745_v37, %v544_v42 }
 0x47f   :  { %v436_v43 = vpop.permute.xlu0 %435 }
 0x480   :  { %v438_v44 = vadd.f32 %v436_v43, %v428_v41 }
 0x482   :  { %2746 = vtanh.f32 %v438_v44  ;;  %v582_v55 = vrot.slane %v438_v44, %v3006_v56 }
 0x483   :  { %v554_v46 = vpop.permute.xlu1 %553 }
 0x484   :  { %v556_v47 = vadd.f32 %v554_v46, %v546_v45 }
 0x486   :  { %2748 = vtanh.f32 %v556_v47  ;;  %v606_v58 = vrot.slane %v556_v47, %v3006_v56 }
 0x48f   :  { %v2747_v48 = vpop.eup %2746 }
 0x490   :  { %441 = vrot.lane.b32.xlu0 %v2747_v48, %s2849_s28 }
 0x493   :  { %v2749_v49 = vpop.eup %2748 }
 0x494   :  { %559 = vrot.lane.b32.xlu1 %v2749_v49, %s2849_s28 }
 0x502   :  { %v442_v50 = vpop.permute.xlu0 %441 }
 0x503   :  { %v444_v51 = vmul.f32 %v2743_v34, %v442_v50 }
 0x505   :  { %v570_v52 = vrot.slane %v444_v51, %v3006_v56 }
 0x506   :  { %v560_v53 = vpop.permute.xlu1 %559 }
 0x507   :  { %v562_v54 = vmul.f32 %v2745_v37, %v560_v53  ;;  %571 = vrot.lane.b32.xlu0 %v570_v52, %s2848_s23 }
 0x509   :  { %v3067_v57 = vrot.slane %v562_v54, %v3006_v56 }
 0x50b   :  { %595 = vrot.lane.b32.xlu1 %v3067_v57, %s2848_s23  ;;  %583 = vrot.lane.b32.xlu0 %v582_v55, %s2851_s29 }
 0x50f   :  { %607 = vrot.lane.b32.xlu1 %v606_v58, %s2851_s29 }
 0x579   :  { %v572_v59 = vpop.permute.xlu0 %571 }
 0x57a   :  { %574 = vst.msk [vmem:[#allocation2] sm:$0x3] %vm24_vm0, %v572_v59  ;;  %2394 = vst.msk [vmem:[%s3475_s5 + $0x2] sm:$0x3] %vm24_vm0, %v572_v59 }
 0x57d   :  { %v596_v60 = vpop.permute.xlu1 %595  ;;  %v584_v61 = vpop.permute.xlu0 %583 }
 0x57e   :  { %598 = vst.msk [vmem:[#allocation4] sm:$0x3] %vm24_vm0, %v596_v60  ;;  %586 = vst.msk [vmem:[#allocation3] sm:$0x3] %vm24_vm0, %v584_v61 }
 0x581   :  { %v608_v63 = vpop.permute.xlu1 %607  ;;  %v622_v7 = vld [vmem:[#allocation2] sm:$0x3] }
 0x582   :  { %610 = vst.msk [vmem:[#allocation5] sm:$0x3] %vm24_vm0, %v608_v63  ;;  %2589 = vmatmul.mubr.msk.f32.vlgmr.msra.gmra.mxu0 %vm43_vm2, %v622_v7  ;;  %v2406_v63 = vld [vmem:[%s3474_s0 + $0xc] sm:$0xf]  ;;  %v2407_v7 = vld [vmem:[%s3474_s0 + $0x10] sm:$0xf] }
 0x583   :  { %2603 = vmatpush3.msra.mxu0 %v2896_v1  ;;  %2610 = vmatprep.mubr.msk.f32.mxu0 %vm2847_vm1, %v2846_v0  ;;  %v1109_v10 = vrot.slane %v2407_v7, 2 }
 0x584   :  { %2604 = vmatprep.subr.mxu0 %v2846_v0 }
 0x585   :  { %v737_v8 = vld [vmem:[#allocation4] sm:$0x3]  ;;  %2605 = vmatpush3.msra.mxu0 %v2902_v2  ;;  %v2400_v22 = vld.sshfl [vmem:[#allocation3] sm:$0x3 pattern:$0x76325410] }
 0x586   :  { %2600 = vmatmul.mubr.msk.f32.vlgmr.msra.gmra.mxu1 %vm43_vm2, %v737_v8  ;;  %2606 = vmatprep.subr.mxu0 %v2846_v0 }
 0x587   :  { %2607 = vmatpush3.msra.mxu0 %v2921_v5  ;;  %2614 = vmatpush3.msra.mxu1 %v2907_v3 }
 0x588   :  { %2608 = vmatprep.subr.mxu0 %v2846_v0  ;;  %2615 = vmatprep.subr.mxu1 %v2846_v0 }
 0x589   :  { %2616 = vmatpush3.msra.mxu1 %v2914_v4  ;;  %2609 = vmatpush3.msra.mxu0 %v2948_v11  ;;  %v2403_v23 = vld.sshfl [vmem:[#allocation5] sm:$0x3 pattern:$0x76325410] }
 0x58a   :  { %2617 = vmatprep.subr.mxu1 %v2846_v0  ;;  %2621 = vmatprep.mubr.msk.f32.mxu1 %vm2847_vm1, %v2846_v0 }
 0x58b   :  { %2618 = vmatpush3.msra.mxu1 %v2926_v6  ;;  %2624 = vmatprep.subr.mxu0 %v2846_v0 }
 0x58c   :  { %2619 = vmatprep.subr.mxu1 %v2846_v0 }
 0x58d   :  { %2620 = vmatpush3.msra.mxu1 %v2959_v12 }
 0x58e   :  { %2635 = vmatprep.subr.mxu1 %v2846_v0 }
 0x642   :  { %v697_v13 = vpop.f32.mrf.mxu0 }
 0x643   :  { %v701_v14 = vadd.f32 %v2396_v9, %v697_v13 }
 0x644   :  { %v2590_v16 = vpop.f32.mrf.mxu0 }
 0x645   :  { %2750 = vtanh.f32 %v701_v14  ;;  %v2399_v24 = vmul.f32 -1.442695, %v701_v14 }
 0x646   :  { %v812_v17 = vpop.f32.mrf.mxu1 }
 0x647   :  { %v819_v18 = vadd.f32 %v817_v15, %v812_v17 }
 0x648   :  { %v2601_v19 = vpop.f32.mrf.mxu1 }
 0x649   :  { %2752 = vtanh.f32 %v819_v18  ;;  %v2402_v25 = vmul.f32 -1.442695, %v819_v18 }
 0x64a   :  { %2754 = vpow2.f32 %v2399_v24 }
 0x64b   :  { %2756 = vpow2.f32 %v2402_v25 }
 0x652   :  { %v2751_v20 = vpop.eup %2750 }
 0x653   :  { %722 = vrot.lane.b32.xlu0 %v2751_v20, %s2849_s28 }
 0x656   :  { %v2753_v21 = vpop.eup %2752 }
 0x657   :  { %840 = vrot.lane.b32.xlu1 %v2753_v21, %s2849_s28  ;;  %717 = vrot.lane.b32.xlu0 %v2400_v22, %s2848_s23  ;;  %v2755_v26 = vpop.eup %2754 }
 0x658   :  { %v705_v27 = vadd.f32 1.0, %v2755_v26  ;;  %v2757_v28 = vpop.eup %2756 }
 0x659   :  { %v823_v29 = vadd.f32 1.0, %v2757_v28 }
 0x65a   :  { %2758 = vrcp.f32 %v705_v27 }
 0x65b   :  { %835 = vrot.lane.b32.xlu1 %v2403_v23, %s2848_s23  ;;  %2760 = vrcp.f32 %v823_v29 }
 0x667   :  { %v2759_v30 = vpop.eup %2758 }
 0x668   :  { %v2761_v33 = vpop.eup %2760 }
 0x6c5   :  { %v723_v31 = vpop.permute.xlu0 %722 }
 0x6c6   :  { %v725_v32 = vmul.f32 %v2759_v30, %v723_v31 }
 0x6c8   :  { %727 = vrot.lane.b32.xlu0 %v725_v32, %s2848_s23 }
 0x6c9   :  { %v841_v34 = vpop.permute.xlu1 %840  ;;  %v718_v36 = vpop.permute.xlu0 %717 }
 0x6ca   :  { %v843_v35 = vmul.f32 %v2761_v33, %v841_v34  ;;  %v720_v37 = vmul.f32 %v2759_v30, %v718_v36 }
 0x6cc   :  { %845 = vrot.lane.b32.xlu1 %v843_v35, %s2848_s23 }
 0x6cd   :  { %v836_v38 = vpop.permute.xlu1 %835 }
 0x6ce   :  { %v838_v41 = vmul.f32 %v2761_v33, %v836_v38 }
 0x73a   :  { %v728_v39 = vpop.permute.xlu0 %727 }
 0x73b   :  { %v730_v40 = vadd.f32 %v728_v39, %v720_v37 }
 0x73d   :  { %2762 = vtanh.f32 %v730_v40  ;;  %v874_v51 = vrot.slane %v730_v40, %v3006_v56 }
 0x73e   :  { %v846_v42 = vpop.permute.xlu1 %845 }
 0x73f   :  { %v848_v43 = vadd.f32 %v846_v42, %v838_v41 }
 0x741   :  { %2764 = vtanh.f32 %v848_v43  ;;  %v898_v53 = vrot.slane %v848_v43, %v3006_v56 }
 0x74a   :  { %v2763_v44 = vpop.eup %2762 }
 0x74b   :  { %733 = vrot.lane.b32.xlu0 %v2763_v44, %s2849_s28 }
 0x74e   :  { %v2765_v45 = vpop.eup %2764 }
 0x74f   :  { %851 = vrot.lane.b32.xlu1 %v2765_v45, %s2849_s28 }
 0x7bd   :  { %v734_v46 = vpop.permute.xlu0 %733 }
 0x7be   :  { %v736_v47 = vmul.f32 %v2759_v30, %v734_v46 }
 0x7c0   :  { %v862_v48 = vrot.slane %v736_v47, %v3006_v56 }
 0x7c1   :  { %v852_v49 = vpop.permute.xlu1 %851 }
 0x7c2   :  { %v854_v50 = vmul.f32 %v2761_v33, %v852_v49  ;;  %863 = vrot.lane.b32.xlu0 %v862_v48, %s2848_s23 }
 0x7c4   :  { %v3122_v52 = vrot.slane %v854_v50, %v3006_v56 }
 0x7c6   :  { %887 = vrot.lane.b32.xlu1 %v3122_v52, %s2848_s23  ;;  %875 = vrot.lane.b32.xlu0 %v874_v51, %s2851_s29 }
 0x7ca   :  { %899 = vrot.lane.b32.xlu1 %v898_v53, %s2851_s29 }
 0x834   :  { %v864_v54 = vpop.permute.xlu0 %863 }
 0x835   :  { %866 = vst.msk [vmem:[#allocation2] sm:$0x3] %vm24_vm0, %v864_v54  ;;  %2404 = vst.msk [vmem:[%s3475_s5 + $0x4] sm:$0x3] %vm24_vm0, %v864_v54 }
 0x838   :  { %v888_v55 = vpop.permute.xlu1 %887  ;;  %v876_v58 = vpop.permute.xlu0 %875 }
 0x839   :  { %890 = vst.msk [vmem:[#allocation4] sm:$0x3] %vm24_vm0, %v888_v55  ;;  %878 = vst.msk [vmem:[#allocation3] sm:$0x3] %vm24_vm0, %v876_v58 }
 0x83c   :  { %v900_v59 = vpop.permute.xlu1 %899  ;;  %v914_v60 = vld [vmem:[#allocation2] sm:$0x3] }
 0x83d   :  { %902 = vst.msk [vmem:[#allocation5] sm:$0x3] %vm24_vm0, %v900_v59  ;;  %2611 = vmatmul.mubr.msk.f32.vlgmr.msra.gmra.mxu0 %vm43_vm2, %v914_v60 }
 0x83e   :  { %2625 = vmatpush3.msra.mxu0 %v2896_v1  ;;  %2632 = vmatprep.mubr.msk.f32.mxu0 %vm2847_vm1, %v2846_v0 }
 0x83f   :  { %2626 = vmatprep.subr.mxu0 %v2846_v0 }
 0x840   :  { %v1029_v61 = vld [vmem:[#allocation4] sm:$0x3]  ;;  %2627 = vmatpush3.msra.mxu0 %v2902_v2  ;;  %v2410_v19 = vld.sshfl [vmem:[#allocation3] sm:$0x3 pattern:$0x76325410] }
 0x841   :  { %2622 = vmatmul.mubr.msk.f32.vlgmr.msra.gmra.mxu1 %vm43_vm2, %v1029_v61  ;;  %2628 = vmatprep.subr.mxu0 %v2846_v0 }
 0x842   :  { %2629 = vmatpush3.msra.mxu0 %v2921_v5  ;;  %2636 = vmatpush3.msra.mxu1 %v2907_v3 }
 0x843   :  { %2630 = vmatprep.subr.mxu0 %v2846_v0  ;;  %2637 = vmatprep.subr.mxu1 %v2846_v0 }
 0x844   :  { %2638 = vmatpush3.msra.mxu1 %v2914_v4  ;;  %2631 = vmatpush3.msra.mxu0 %v2948_v11  ;;  %v2413_v20 = vld.sshfl [vmem:[#allocation5] sm:$0x3 pattern:$0x76325410] }
 0x845   :  { %2639 = vmatprep.subr.mxu1 %v2846_v0  ;;  %2643 = vmatprep.mubr.msk.f32.mxu1 %vm2847_vm1, %v2846_v0 }
 0x846   :  { %2640 = vmatpush3.msra.mxu1 %v2926_v6  ;;  %2646 = vmatprep.subr.mxu0 %v2846_v0 }
 0x847   :  { %2641 = vmatprep.subr.mxu1 %v2846_v0 }
 0x848   :  { %2642 = vmatpush3.msra.mxu1 %v2959_v12 }
 0x849   :  { %2657 = vmatprep.subr.mxu1 %v2846_v0 }
 0x8fd   :  { %v989_v8 = vpop.f32.mrf.mxu0 }
 0x8fe   :  { %v993_v9 = vadd.f32 %v2406_v63, %v989_v8 }
 0x8ff   :  { %v2612_v13 = vpop.f32.mrf.mxu0 }
 0x900   :  { %2766 = vtanh.f32 %v993_v9  ;;  %v2409_v21 = vmul.f32 -1.442695, %v993_v9 }
 0x901   :  { %v1104_v14 = vpop.f32.mrf.mxu1 }
 0x902   :  { %v1111_v15 = vadd.f32 %v1109_v10, %v1104_v14 }
 0x903   :  { %v2623_v16 = vpop.f32.mrf.mxu1 }
 0x904   :  { %2768 = vtanh.f32 %v1111_v15  ;;  %v2412_v22 = vmul.f32 -1.442695, %v1111_v15 }
 0x905   :  { %2770 = vpow2.f32 %v2409_v21 }
 0x906   :  { %2772 = vpow2.f32 %v2412_v22 }
 0x90d   :  { %v2767_v17 = vpop.eup %2766 }
 0x90e   :  { %1014 = vrot.lane.b32.xlu0 %v2767_v17, %s2849_s28 }
 0x911   :  { %v2769_v18 = vpop.eup %2768 }
 0x912   :  { %1132 = vrot.lane.b32.xlu1 %v2769_v18, %s2849_s28  ;;  %1009 = vrot.lane.b32.xlu0 %v2410_v19, %s2848_s23  ;;  %v2771_v23 = vpop.eup %2770 }
 0x913   :  { %v997_v24 = vadd.f32 1.0, %v2771_v23  ;;  %v2773_v25 = vpop.eup %2772 }
 0x914   :  { %v1115_v26 = vadd.f32 1.0, %v2773_v25 }
 0x915   :  { %2774 = vrcp.f32 %v997_v24 }
 0x916   :  { %1127 = vrot.lane.b32.xlu1 %v2413_v20, %s2848_s23  ;;  %2776 = vrcp.f32 %v1115_v26 }
 0x922   :  { %v2775_v27 = vpop.eup %2774 }
 0x923   :  { %v2777_v30 = vpop.eup %2776 }
 0x980   :  { %v1015_v28 = vpop.permute.xlu0 %1014 }
 0x981   :  { %v1017_v29 = vmul.f32 %v2775_v27, %v1015_v28 }
 0x983   :  { %1019 = vrot.lane.b32.xlu0 %v1017_v29, %s2848_s23 }
 0x984   :  { %v1133_v31 = vpop.permute.xlu1 %1132  ;;  %v1010_v33 = vpop.permute.xlu0 %1009 }
 0x985   :  { %v1135_v32 = vmul.f32 %v2777_v30, %v1133_v31  ;;  %v1012_v34 = vmul.f32 %v2775_v27, %v1010_v33 }
 0x987   :  { %1137 = vrot.lane.b32.xlu1 %v1135_v32, %s2848_s23 }
 0x988   :  { %v1128_v35 = vpop.permute.xlu1 %1127 }
 0x989   :  { %v1130_v38 = vmul.f32 %v2777_v30, %v1128_v35 }
 0x9f5   :  { %v1020_v36 = vpop.permute.xlu0 %1019 }
 0x9f6   :  { %v1022_v37 = vadd.f32 %v1020_v36, %v1012_v34 }
 0x9f8   :  { %2778 = vtanh.f32 %v1022_v37  ;;  %v1166_v48 = vrot.slane %v1022_v37, %v3006_v56 }
 0x9f9   :  { %v1138_v39 = vpop.permute.xlu1 %1137 }
 0x9fa   :  { %v1140_v40 = vadd.f32 %v1138_v39, %v1130_v38 }
 0x9fc   :  { %2780 = vtanh.f32 %v1140_v40  ;;  %v1190_v50 = vrot.slane %v1140_v40, %v3006_v56 }
 0xa05   :  { %v2779_v41 = vpop.eup %2778 }
 0xa06   :  { %1025 = vrot.lane.b32.xlu0 %v2779_v41, %s2849_s28 }
 0xa09   :  { %v2781_v42 = vpop.eup %2780 }
 0xa0a   :  { %1143 = vrot.lane.b32.xlu1 %v2781_v42, %s2849_s28 }
 0xa78   :  { %v1026_v43 = vpop.permute.xlu0 %1025 }
 0xa79   :  { %v1028_v44 = vmul.f32 %v2775_v27, %v1026_v43 }
 0xa7b   :  { %v1154_v45 = vrot.slane %v1028_v44, %v3006_v56 }
 0xa7c   :  { %v1144_v46 = vpop.permute.xlu1 %1143 }
 0xa7d   :  { %v1146_v47 = vmul.f32 %v2777_v30, %v1144_v46  ;;  %1155 = vrot.lane.b32.xlu0 %v1154_v45, %s2848_s23 }
 0xa7f   :  { %v3177_v49 = vrot.slane %v1146_v47, %v3006_v56  ;;  %v2426_v47 = vld [vmem:[%s3474_s0 + $0x14] sm:$0xf] }
 0xa81   :  { %1179 = vrot.lane.b32.xlu1 %v3177_v49, %s2848_s23  ;;  %1167 = vrot.lane.b32.xlu0 %v1166_v48, %s2851_s29  ;;  %v2427_v48 = vld [vmem:[%s3474_s0 + $0x8] sm:$0xf] }
 0xa85   :  { %1191 = vrot.lane.b32.xlu1 %v1190_v50, %s2851_s29 }
 0xaef   :  { %v1156_v51 = vpop.permute.xlu0 %1155 }
 0xaf0   :  { %1158 = vst.msk [vmem:[#allocation2] sm:$0x3] %vm24_vm0, %v1156_v51  ;;  %2414 = vst.msk [vmem:[%s3475_s5 + $0x6] sm:$0x3] %vm24_vm0, %v1156_v51 }
 0xaf3   :  { %v1180_v53 = vpop.permute.xlu1 %1179  ;;  %v1168_v54 = vpop.permute.xlu0 %1167 }
 0xaf4   :  { %1182 = vst.msk [vmem:[#allocation4] sm:$0x3] %vm24_vm0, %v1180_v53  ;;  %1170 = vst.msk [vmem:[#allocation3] sm:$0x3] %vm24_vm0, %v1168_v54  ;;  %v1687_v53 = vrot.slane %v2427_v48, 2 }
 0xaf5   :  { %v2436_v48 = vld [vmem:[%s3474_s0 + $0x18] sm:$0xf] }
 0xaf7   :  { %v1192_v55 = vpop.permute.xlu1 %1191  ;;  %v1204_v58 = vld [vmem:[#allocation2] sm:$0x3] }
 0xaf8   :  { %1194 = vst.msk [vmem:[#allocation5] sm:$0x3] %vm24_vm0, %v1192_v55  ;;  %2633 = vmatmul.mubr.msk.f32.vlgmr.msra.gmra.mxu0 %vm43_vm2, %v1204_v58 }
 0xaf9   :  { %2647 = vmatpush3.msra.mxu0 %v2896_v1  ;;  %2654 = vmatprep.mubr.msk.f32.mxu0 %vm2847_vm1, %v2846_v0  ;;  %v2416_v1 = vld [vmem:[%s3474_s0 + $0x10] sm:$0xf] }
 0xafa   :  { %2648 = vmatprep.subr.mxu0 %v2846_v0 }
 0xafb   :  { %v1319_v59 = vld [vmem:[#allocation4] sm:$0x3]  ;;  %2649 = vmatpush3.msra.mxu0 %v2902_v2  ;;  %v2417_v2 = vld [vmem:[%s3474_s0 + $0xc] sm:$0xf] }
 0xafc   :  { %2644 = vmatmul.mubr.msk.f32.vlgmr.msra.gmra.mxu1 %vm43_vm2, %v1319_v59  ;;  %2650 = vmatprep.subr.mxu0 %v2846_v0  ;;  %v2420_v7 = vld.sshfl [vmem:[#allocation3] sm:$0x3 pattern:$0x76325410] }
 0xafd   :  { %2651 = vmatpush3.msra.mxu0 %v2921_v5  ;;  %2658 = vmatpush3.msra.mxu1 %v2907_v3  ;;  %v1399_v5 = vrot.slane %v2417_v2, 2 }
 0xafe   :  { %2652 = vmatprep.subr.mxu0 %v2846_v0  ;;  %2659 = vmatprep.subr.mxu1 %v2846_v0 }
 0xaff   :  { %2660 = vmatpush3.msra.mxu1 %v2914_v4  ;;  %2653 = vmatpush3.msra.mxu0 %v2948_v11  ;;  %v2423_v8 = vld.sshfl [vmem:[#allocation5] sm:$0x3 pattern:$0x76325410] }
 0xb00   :  { %2661 = vmatprep.subr.mxu1 %v2846_v0  ;;  %2665 = vmatprep.mubr.msk.f32.mxu1 %vm2847_vm1, %v2846_v0 }
 0xb01   :  { %2662 = vmatpush3.msra.mxu1 %v2926_v6  ;;  %2668 = vmatprep.subr.mxu0 %v2846_v0 }
 0xb02   :  { %2663 = vmatprep.subr.mxu1 %v2846_v0 }
 0xb03   :  { %2664 = vmatpush3.msra.mxu1 %v2959_v12 }
 0xb04   :  { %2679 = vmatprep.subr.mxu1 %v2846_v0 }
 0xbb8   :  { %v1279_v3 = vpop.f32.mrf.mxu0 }
 0xbb9   :  { %v1283_v4 = vadd.f32 %v2416_v1, %v1279_v3 }
 0xbba   :  { %v2634_v6 = vpop.f32.mrf.mxu0 }
 0xbbb   :  { %2782 = vtanh.f32 %v1283_v4  ;;  %v2419_v9 = vmul.f32 -1.442695, %v1283_v4 }
 0xbbc   :  { %v1394_v11 = vpop.f32.mrf.mxu1 }
 0xbbd   :  { %v1401_v60 = vadd.f32 %v1399_v5, %v1394_v11 }
 0xbbe   :  { %v2645_v61 = vpop.f32.mrf.mxu1 }
 0xbbf   :  { %2784 = vtanh.f32 %v1401_v60  ;;  %v2422_v10 = vmul.f32 -1.442695, %v1401_v60 }
 0xbc0   :  { %2786 = vpow2.f32 %v2419_v9 }
 0xbc1   :  { %2788 = vpow2.f32 %v2422_v10 }
 0xbc8   :  { %v2783_v12 = vpop.eup %2782 }
 0xbc9   :  { %1304 = vrot.lane.b32.xlu0 %v2783_v12, %s2849_s28 }
 0xbcc   :  { %v2785_v63 = vpop.eup %2784 }
 0xbcd   :  { %1422 = vrot.lane.b32.xlu1 %v2785_v63, %s2849_s28  ;;  %1299 = vrot.lane.b32.xlu0 %v2420_v7, %s2848_s23  ;;  %v2787_v13 = vpop.eup %2786 }
 0xbce   :  { %v1287_v14 = vadd.f32 1.0, %v2787_v13  ;;  %v2789_v15 = vpop.eup %2788 }
 0xbcf   :  { %v1405_v16 = vadd.f32 1.0, %v2789_v15 }
 0xbd0   :  { %2790 = vrcp.f32 %v1287_v14 }
 0xbd1   :  { %1417 = vrot.lane.b32.xlu1 %v2423_v8, %s2848_s23  ;;  %2792 = vrcp.f32 %v1405_v16 }
 0xbdd   :  { %v2791_v17 = vpop.eup %2790 }
 0xbde   :  { %v2793_v20 = vpop.eup %2792 }
 0xc3b   :  { %v1305_v18 = vpop.permute.xlu0 %1304 }
 0xc3c   :  { %v1307_v19 = vmul.f32 %v2791_v17, %v1305_v18 }
 0xc3e   :  { %1309 = vrot.lane.b32.xlu0 %v1307_v19, %s2848_s23 }
 0xc3f   :  { %v1423_v21 = vpop.permute.xlu1 %1422  ;;  %v1300_v23 = vpop.permute.xlu0 %1299 }
 0xc40   :  { %v1425_v22 = vmul.f32 %v2793_v20, %v1423_v21  ;;  %v1302_v24 = vmul.f32 %v2791_v17, %v1300_v23 }
 0xc42   :  { %1427 = vrot.lane.b32.xlu1 %v1425_v22, %s2848_s23 }
 0xc43   :  { %v1418_v25 = vpop.permute.xlu1 %1417 }
 0xc44   :  { %v1420_v28 = vmul.f32 %v2793_v20, %v1418_v25  ;;  %v1784_v25 = vld [vmem:[%s3470_s1 + $0x10] sm:$0xff] }
 0xcb0   :  { %v1310_v26 = vpop.permute.xlu0 %1309 }
 0xcb1   :  { %v1312_v27 = vadd.f32 %v1310_v26, %v1302_v24  ;;  %v1785_v24 = vld [vmem:[%s3470_s1 + $0x18] sm:$0xff]  ;;  %v1783_v26 = vld [vmem:[%s3470_s1 + $0x8] sm:$0xff] }
 0xcb3   :  { %2794 = vtanh.f32 %v1312_v27  ;;  %v1456_v38 = vrot.slane %v1312_v27, %v3006_v56  ;;  %v1900_v27 = vld [vmem:[%s3471_s2 + $0x18] sm:$0xff] }
 0xcb4   :  { %v1428_v29 = vpop.permute.xlu1 %1427 }
 0xcb5   :  { %v1430_v30 = vadd.f32 %v1428_v29, %v1420_v28  ;;  %v1899_v28 = vld [vmem:[%s3471_s2 + $0x10] sm:$0xff]  ;;  %v1782_v29 = vld [vmem:[%s3470_s1] sm:$0xff] }
 0xcb7   :  { %2796 = vtanh.f32 %v1430_v30  ;;  %v1480_v40 = vrot.slane %v1430_v30, %v3006_v56 }
 0xcc0   :  { %v2795_v31 = vpop.eup %2794 }
 0xcc1   :  { %1315 = vrot.lane.b32.xlu0 %v2795_v31, %s2849_s28  ;;  %v1898_v31 = vld [vmem:[%s3471_s2 + $0x8] sm:$0xff] }
 0xcc4   :  { %v2797_v32 = vpop.eup %2796 }
 0xcc5   :  { %1433 = vrot.lane.b32.xlu1 %v2797_v32, %s2849_s28  ;;  %v1897_v32 = vld [vmem:[%s3471_s2] sm:$0xff] }
 0xd33   :  { %v1316_v33 = vpop.permute.xlu0 %1315 }
 0xd34   :  { %v1318_v34 = vmul.f32 %v2791_v17, %v1316_v33 }
 0xd36   :  { %v1444_v35 = vrot.slane %v1318_v34, %v3006_v56 }
 0xd37   :  { %v1434_v36 = vpop.permute.xlu1 %1433 }
 0xd38   :  { %v1436_v37 = vmul.f32 %v2793_v20, %v1434_v36  ;;  %1445 = vrot.lane.b32.xlu0 %v1444_v35, %s2848_s23 }
 0xd3a   :  { %v3232_v39 = vrot.slane %v1436_v37, %v3006_v56 }
 0xd3c   :  { %1469 = vrot.lane.b32.xlu1 %v3232_v39, %s2848_s23  ;;  %1457 = vrot.lane.b32.xlu0 %v1456_v38, %s2851_s29 }
 0xd40   :  { %1481 = vrot.lane.b32.xlu1 %v1480_v40, %s2851_s29 }
 0xdaa   :  { %v3239_v41 = vpop.permute.xlu0 %1445 }
 0xdab   :  { %1448 = vst.msk [vmem:[#allocation2] sm:$0x3] %vm24_vm0, %v3239_v41 }
 0xdae   :  { %v1470_v42 = vpop.permute.xlu1 %1469  ;;  %v1458_v43 = vpop.permute.xlu0 %1457 }
 0xdaf   :  { %1472 = vst.msk [vmem:[#allocation4] sm:$0x3] %vm24_vm0, %v1470_v42  ;;  %1460 = vst.msk [vmem:[#allocation3] sm:$0x3] %vm24_vm0, %v1458_v43 }
 0xdb2   :  { %v1482_v44 = vpop.permute.xlu1 %1481  ;;  %v1492_v45 = vld [vmem:[#allocation2] sm:$0x3] }
 0xdb3   :  { %1484 = vst.msk [vmem:[#allocation5] sm:$0x3] %vm24_vm0, %v1482_v44  ;;  %2655 = vmatmul.mubr.msk.f32.vlgmr.msra.gmra.mxu0 %vm43_vm2, %v1492_v45 }
 0xdb4   :  { %2676 = vmatprep.mubr.msk.f32.mxu0 %vm2847_vm1, %v2846_v0  ;;  %2669 = vmatpush3.msra.mxu0 %v1785_v24 }
 0xdb5   :  { %2670 = vmatprep.subr.mxu0 %v2846_v0 }
 0xdb6   :  { %v1607_v46 = vld [vmem:[#allocation4] sm:$0x3]  ;;  %v2430_v3 = vld.sshfl [vmem:[#allocation3] sm:$0x3 pattern:$0x76325410]  ;;  %2671 = vmatpush3.msra.mxu0 %v1784_v25 }
 0xdb7   :  { %2666 = vmatmul.mubr.msk.f32.vlgmr.msra.gmra.mxu1 %vm43_vm2, %v1607_v46  ;;  %2672 = vmatprep.subr.mxu0 %v2846_v0 }
 0xdb8   :  { %2687 = vmatprep.mubr.msk.f32.mxu1 %vm2847_vm1, %v2846_v0  ;;  %2673 = vmatpush3.msra.mxu0 %v1783_v26 }
 0xdb9   :  { %2680 = vmatpush3.msra.mxu1 %v1900_v27  ;;  %2674 = vmatprep.subr.mxu0 %v2846_v0 }
 0xdba   :  { %v2433_v4 = vld.sshfl [vmem:[#allocation5] sm:$0x3 pattern:$0x76325410]  ;;  %2681 = vmatprep.subr.mxu1 %v2846_v0  ;;  %2675 = vmatpush3.msra.mxu0 %v1782_v29 }
 0xdbb   :  { %2682 = vmatpush3.msra.mxu1 %v1899_v28  ;;  %2690 = vmatprep.subr.mxu0 %v2846_v0 }
 0xdbc   :  { %2683 = vmatprep.subr.mxu1 %v2846_v0 }
 0xdbd   :  { %2684 = vmatpush3.msra.mxu1 %v1898_v31 }
 0xdbe   :  { %2685 = vmatprep.subr.mxu1 %v2846_v0 }
 0xdbf   :  { %2686 = vmatpush3.msra.mxu1 %v1897_v32 }
 0xdc0   :  { %2701 = vmatprep.subr.mxu1 %v2846_v0 }
 0xe73   :  { %v1567_v50 = vpop.f32.mrf.mxu0 }
 0xe74   :  { %v1571_v51 = vadd.f32 %v2426_v47, %v1567_v50  ;;  %v2437_v50 = vld [vmem:[%s3474_s0 + $0x4] sm:$0xf] }
 0xe75   :  { %v2656_v54 = vpop.f32.mrf.mxu0 }
 0xe76   :  { %2798 = vtanh.f32 %v1571_v51  ;;  %v2429_v5 = vmul.f32 -1.442695, %v1571_v51  ;;  %v1975_v54 = vrot.slane %v2437_v50, 2 }
 0xe77   :  { %v1682_v55 = vpop.f32.mrf.mxu1 }
 0xe78   :  { %v1689_v58 = vadd.f32 %v1687_v53, %v1682_v55 }
 0xe79   :  { %v2667_v59 = vpop.f32.mrf.mxu1 }
 0xe7a   :  { %2800 = vtanh.f32 %v1689_v58  ;;  %v2432_v6 = vmul.f32 -1.442695, %v1689_v58 }
 0xe7b   :  { %2802 = vpow2.f32 %v2429_v5 }
 0xe7c   :  { %2804 = vpow2.f32 %v2432_v6 }
 0xe83   :  { %v2799_v1 = vpop.eup %2798 }
 0xe84   :  { %1592 = vrot.lane.b32.xlu0 %v2799_v1, %s2849_s28 }
 0xe87   :  { %v2801_v2 = vpop.eup %2800 }
 0xe88   :  { %1710 = vrot.lane.b32.xlu1 %v2801_v2, %s2849_s28  ;;  %1587 = vrot.lane.b32.xlu0 %v2430_v3, %s2848_s23  ;;  %v2803_v11 = vpop.eup %2802 }
 0xe89   :  { %v1575_v60 = vadd.f32 1.0, %v2803_v11  ;;  %v2805_v61 = vpop.eup %2804 }
 0xe8a   :  { %v1693_v12 = vadd.f32 1.0, %v2805_v61 }
 0xe8b   :  { %2806 = vrcp.f32 %v1575_v60 }
 0xe8c   :  { %1705 = vrot.lane.b32.xlu1 %v2433_v4, %s2848_s23  ;;  %2808 = vrcp.f32 %v1693_v12 }
 0xe98   :  { %v2807_v63 = vpop.eup %2806 }
 0xe99   :  { %v2809_v9 = vpop.eup %2808 }
 0xef6   :  { %v1593_v7 = vpop.permute.xlu0 %1592 }
 0xef7   :  { %v1595_v8 = vmul.f32 %v2807_v63, %v1593_v7 }
 0xef9   :  { %1597 = vrot.lane.b32.xlu0 %v1595_v8, %s2848_s23 }
 0xefa   :  { %v1711_v10 = vpop.permute.xlu1 %1710  ;;  %v1588_v14 = vpop.permute.xlu0 %1587 }
 0xefb   :  { %v1713_v13 = vmul.f32 %v2809_v9, %v1711_v10  ;;  %v1590_v15 = vmul.f32 %v2807_v63, %v1588_v14 }
 0xefd   :  { %1715 = vrot.lane.b32.xlu1 %v1713_v13, %s2848_s23 }
 0xefe   :  { %v1706_v16 = vpop.permute.xlu1 %1705 }
 0xeff   :  { %v1708_v19 = vmul.f32 %v2809_v9, %v1706_v16 }
 0xf6b   :  { %v1598_v17 = vpop.permute.xlu0 %1597 }
 0xf6c   :  { %v1600_v18 = vadd.f32 %v1598_v17, %v1590_v15 }
 0xf6e   :  { %2810 = vtanh.f32 %v1600_v18  ;;  %v1744_v37 = vrot.slane %v1600_v18, %v3006_v56 }
 0xf6f   :  { %v1716_v20 = vpop.permute.xlu1 %1715 }
 0xf70   :  { %v1718_v21 = vadd.f32 %v1716_v20, %v1708_v19 }
 0xf72   :  { %2812 = vtanh.f32 %v1718_v21  ;;  %v1768_v40 = vrot.slane %v1718_v21, %v3006_v56 }
 0xf7b   :  { %v2811_v22 = vpop.eup %2810 }
 0xf7c   :  { %1603 = vrot.lane.b32.xlu0 %v2811_v22, %s2849_s28 }
 0xf7f   :  { %v2813_v23 = vpop.eup %2812 }
 0xf80   :  { %1721 = vrot.lane.b32.xlu1 %v2813_v23, %s2849_s28 }
 0xfee   :  { %v1604_v30 = vpop.permute.xlu0 %1603 }
 0xfef   :  { %v1606_v33 = vmul.f32 %v2807_v63, %v1604_v30 }
 0xff1   :  { %v1732_v34 = vrot.slane %v1606_v33, %v3006_v56 }
 0xff2   :  { %v1722_v35 = vpop.permute.xlu1 %1721 }
 0xff3   :  { %v1724_v36 = vmul.f32 %v2809_v9, %v1722_v35  ;;  %1733 = vrot.lane.b32.xlu0 %v1732_v34, %s2848_s23 }
 0xff5   :  { %v3302_v38 = vrot.slane %v1724_v36, %v3006_v56 }
 0xff7   :  { %1757 = vrot.lane.b32.xlu1 %v3302_v38, %s2848_s23  ;;  %1745 = vrot.lane.b32.xlu0 %v1744_v37, %s2851_s29 }
 0xffb   :  { %1769 = vrot.lane.b32.xlu1 %v1768_v40, %s2851_s29  ;;  %v2446_v40 = vld [vmem:[%s3474_s0 + $0x1c] sm:$0xf] }
0x1065   :  { %v3309_v42 = vpop.permute.xlu0 %1733 }
0x1066   :  { %1736 = vst.msk [vmem:[#allocation2] sm:$0x3] %vm24_vm0, %v3309_v42 }
0x1069   :  { %v1758_v43 = vpop.permute.xlu1 %1757  ;;  %v1746_v44 = vpop.permute.xlu0 %1745 }
0x106a   :  { %1760 = vst.msk [vmem:[#allocation4] sm:$0x3] %vm24_vm0, %v1758_v43  ;;  %1748 = vst.msk [vmem:[#allocation3] sm:$0x3] %vm24_vm0, %v1746_v44  ;;  %v2067_v43 = vld [vmem:[%s3474_s0] sm:$0xf] }
0x106d   :  { %v1770_v45 = vpop.permute.xlu1 %1769  ;;  %v1780_v46 = vld [vmem:[#allocation2] sm:$0x3] }
0x106e   :  { %1772 = vst.msk [vmem:[#allocation5] sm:$0x3] %vm24_vm0, %v1770_v45  ;;  %2677 = vmatmul.mubr.msk.f32.vlgmr.msra.gmra.mxu0 %vm43_vm2, %v1780_v46  ;;  %v2263_v46 = vrot.slane %v2067_v43, 2 }
0x106f   :  { %2691 = vmatpush3.msra.mxu0 %v1785_v24  ;;  %2698 = vmatprep.mubr.msk.f32.mxu0 %vm2847_vm1, %v2846_v0 }
0x1070   :  { %2692 = vmatprep.subr.mxu0 %v2846_v0 }
0x1071   :  { %v1895_v47 = vld [vmem:[#allocation4] sm:$0x3]  ;;  %2693 = vmatpush3.msra.mxu0 %v1784_v25  ;;  %v2440_v3 = vld.sshfl [vmem:[#allocation3] sm:$0x3 pattern:$0x76325410] }
0x1072   :  { %2688 = vmatmul.mubr.msk.f32.vlgmr.msra.gmra.mxu1 %vm43_vm2, %v1895_v47  ;;  %2694 = vmatprep.subr.mxu0 %v2846_v0 }
0x1073   :  { %2695 = vmatpush3.msra.mxu0 %v1783_v26  ;;  %2702 = vmatpush3.msra.mxu1 %v1900_v27 }
0x1074   :  { %2696 = vmatprep.subr.mxu0 %v2846_v0  ;;  %2703 = vmatprep.subr.mxu1 %v2846_v0 }
0x1075   :  { %2704 = vmatpush3.msra.mxu1 %v1899_v28  ;;  %2697 = vmatpush3.msra.mxu0 %v1782_v29  ;;  %v2443_v4 = vld.sshfl [vmem:[#allocation5] sm:$0x3 pattern:$0x76325410] }
0x1076   :  { %2705 = vmatprep.subr.mxu1 %v2846_v0  ;;  %2709 = vmatprep.mubr.msk.f32.mxu1 %vm2847_vm1, %v2846_v0 }
0x1077   :  { %2706 = vmatpush3.msra.mxu1 %v1898_v31 }
0x1078   :  { %2707 = vmatprep.subr.mxu1 %v2846_v0 }
0x1079   :  { %2708 = vmatpush3.msra.mxu1 %v1897_v32 }
0x112e   :  { %v1855_v51 = vpop.f32.mrf.mxu0 }
0x112f   :  { %v1859_v53 = vadd.f32 %v2436_v48, %v1855_v51 }
0x1130   :  { %v2678_v55 = vpop.f32.mrf.mxu0 }
0x1131   :  { %2814 = vtanh.f32 %v1859_v53  ;;  %v2439_v5 = vmul.f32 -1.442695, %v1859_v53 }
0x1132   :  { %v1970_v58 = vpop.f32.mrf.mxu1 }
0x1133   :  { %v1977_v59 = vadd.f32 %v1975_v54, %v1970_v58 }
0x1134   :  { %v2689_v1 = vpop.f32.mrf.mxu1 }
0x1135   :  { %2816 = vtanh.f32 %v1977_v59  ;;  %v2442_v6 = vmul.f32 -1.442695, %v1977_v59 }
0x1136   :  { %2818 = vpow2.f32 %v2439_v5 }
0x1137   :  { %2820 = vpow2.f32 %v2442_v6 }
0x113e   :  { %v2815_v2 = vpop.eup %2814 }
0x113f   :  { %1880 = vrot.lane.b32.xlu0 %v2815_v2, %s2849_s28 }
0x1142   :  { %v2817_v0 = vpop.eup %2816 }
0x1143   :  { %1998 = vrot.lane.b32.xlu1 %v2817_v0, %s2849_s28  ;;  %1875 = vrot.lane.b32.xlu0 %v2440_v3, %s2848_s23  ;;  %v2819_v11 = vpop.eup %2818 }
0x1144   :  { %v1863_v60 = vadd.f32 1.0, %v2819_v11  ;;  %v2821_v61 = vpop.eup %2820 }
0x1145   :  { %v1981_v12 = vadd.f32 1.0, %v2821_v61 }
0x1146   :  { %2822 = vrcp.f32 %v1863_v60 }
0x1147   :  { %1993 = vrot.lane.b32.xlu1 %v2443_v4, %s2848_s23  ;;  %2824 = vrcp.f32 %v1981_v12 }
0x1153   :  { %v2823_v63 = vpop.eup %2822 }
0x1154   :  { %v2825_v9 = vpop.eup %2824 }
0x11b1   :  { %v1881_v7 = vpop.permute.xlu0 %1880 }
0x11b2   :  { %v1883_v8 = vmul.f32 %v2823_v63, %v1881_v7 }
0x11b4   :  { %1885 = vrot.lane.b32.xlu0 %v1883_v8, %s2848_s23 }
0x11b5   :  { %v1999_v10 = vpop.permute.xlu1 %1998  ;;  %v1876_v14 = vpop.permute.xlu0 %1875 }
0x11b6   :  { %v2001_v13 = vmul.f32 %v2825_v9, %v1999_v10  ;;  %v1878_v15 = vmul.f32 %v2823_v63, %v1876_v14 }
0x11b8   :  { %2003 = vrot.lane.b32.xlu1 %v2001_v13, %s2848_s23 }
0x11b9   :  { %v1994_v16 = vpop.permute.xlu1 %1993 }
0x11ba   :  { %v1996_v19 = vmul.f32 %v2825_v9, %v1994_v16 }
0x1226   :  { %v1886_v17 = vpop.permute.xlu0 %1885 }
0x1227   :  { %v1888_v18 = vadd.f32 %v1886_v17, %v1878_v15 }
0x1229   :  { %2826 = vtanh.f32 %v1888_v18  ;;  %v2032_v29 = vrot.slane %v1888_v18, %v3006_v56 }
0x122a   :  { %v2004_v20 = vpop.permute.xlu1 %2003 }
0x122b   :  { %v2006_v21 = vadd.f32 %v2004_v20, %v1996_v19 }
0x122d   :  { %2828 = vtanh.f32 %v2006_v21  ;;  %v2056_v31 = vrot.slane %v2006_v21, %v3006_v56 }
0x1236   :  { %v2827_v22 = vpop.eup %2826 }
0x1237   :  { %1891 = vrot.lane.b32.xlu0 %v2827_v22, %s2849_s28 }
0x123a   :  { %v2829_v23 = vpop.eup %2828 }
0x123b   :  { %2009 = vrot.lane.b32.xlu1 %v2829_v23, %s2849_s28 }
0x12a9   :  { %v1892_v24 = vpop.permute.xlu0 %1891 }
0x12aa   :  { %v1894_v25 = vmul.f32 %v2823_v63, %v1892_v24 }
0x12ac   :  { %v2020_v26 = vrot.slane %v1894_v25, %v3006_v56 }
0x12ad   :  { %v2010_v27 = vpop.permute.xlu1 %2009 }
0x12ae   :  { %v2012_v28 = vmul.f32 %v2825_v9, %v2010_v27  ;;  %2021 = vrot.lane.b32.xlu0 %v2020_v26, %s2848_s23 }
0x12b0   :  { %v3346_v30 = vrot.slane %v2012_v28, %v3006_v56 }
0x12b2   :  { %2045 = vrot.lane.b32.xlu1 %v3346_v30, %s2848_s23  ;;  %2033 = vrot.lane.b32.xlu0 %v2032_v29, %s2851_s29 }
0x12b6   :  { %2057 = vrot.lane.b32.xlu1 %v2056_v31, %s2851_s29 }
0x1320   :  { %v3353_v32 = vpop.permute.xlu0 %2021 }
0x1321   :  { %2024 = vst.msk [vmem:[#allocation2] sm:$0x3] %vm24_vm0, %v3353_v32 }
0x1324   :  { %v2046_v33 = vpop.permute.xlu1 %2045  ;;  %v2034_v34 = vpop.permute.xlu0 %2033 }
0x1325   :  { %2048 = vst.msk [vmem:[#allocation4] sm:$0x3] %vm24_vm0, %v2046_v33  ;;  %2036 = vst.msk [vmem:[#allocation3] sm:$0x3] %vm24_vm0, %v2034_v34 }
0x1328   :  { %v2058_v35 = vpop.permute.xlu1 %2057  ;;  %v2068_v36 = vld [vmem:[#allocation2] sm:$0x3] }
0x1329   :  { %2060 = vst.msk [vmem:[#allocation5] sm:$0x3] %vm24_vm0, %v2058_v35  ;;  %2699 = vmatmul.mubr.msk.f32.vlgmr.msra.gmra.mxu0 %vm43_vm2, %v2068_v36 }
0x132c   :  { %v2183_v37 = vld [vmem:[#allocation4] sm:$0x3]  ;;  %v2449_v55 = vld.sshfl [vmem:[#allocation3] sm:$0x3 pattern:$0x76325410] }
0x132d   :  { %2710 = vmatmul.mubr.msk.f32.vlgmr.msra.gmra.mxu1 %vm43_vm2, %v2183_v37 }
0x1330   :  { %v2452_v58 = vld.sshfl [vmem:[#allocation5] sm:$0x3 pattern:$0x76325410] }
0x13e9   :  { %v2143_v44 = vpop.f32.mrf.mxu0 }
0x13ea   :  { %v2147_v45 = vadd.f32 %v2446_v40, %v2143_v44 }
0x13eb   :  { %v2700_v47 = vpop.f32.mrf.mxu0 }
0x13ec   :  { %2830 = vtanh.f32 %v2147_v45  ;;  %v2448_v59 = vmul.f32 -1.442695, %v2147_v45 }
0x13ed   :  { %v2258_v48 = vpop.f32.mrf.mxu1 }
0x13ee   :  { %v2265_v50 = vadd.f32 %v2263_v46, %v2258_v48 }
0x13ef   :  { %v2711_v51 = vpop.f32.mrf.mxu1 }
0x13f0   :  { %2832 = vtanh.f32 %v2265_v50  ;;  %v2451_v1 = vmul.f32 -1.442695, %v2265_v50 }
0x13f1   :  { %2834 = vpow2.f32 %v2448_v59 }
0x13f2   :  { %2836 = vpow2.f32 %v2451_v1 }
0x13f9   :  { %v2831_v53 = vpop.eup %2830 }
0x13fa   :  { %2168 = vrot.lane.b32.xlu0 %v2831_v53, %s2849_s28 }
0x13fd   :  { %v2833_v54 = vpop.eup %2832 }
0x13fe   :  { %2286 = vrot.lane.b32.xlu1 %v2833_v54, %s2849_s28  ;;  %2163 = vrot.lane.b32.xlu0 %v2449_v55, %s2848_s23  ;;  %v2835_v2 = vpop.eup %2834 }
0x13ff   :  { %v2151_v0 = vadd.f32 1.0, %v2835_v2  ;;  %v2837_v3 = vpop.eup %2836 }
0x1400   :  { %v2269_v4 = vadd.f32 1.0, %v2837_v3 }
0x1401   :  { %2838 = vrcp.f32 %v2151_v0 }
0x1402   :  { %2281 = vrot.lane.b32.xlu1 %v2452_v58, %s2848_s23  ;;  %2840 = vrcp.f32 %v2269_v4 }
0x140e   :  { %v2839_v5 = vpop.eup %2838 }
0x140f   :  { %v2841_v60 = vpop.eup %2840 }
0x146c   :  { %v2169_v6 = vpop.permute.xlu0 %2168 }
0x146d   :  { %v2171_v11 = vmul.f32 %v2839_v5, %v2169_v6 }
0x146f   :  { %2173 = vrot.lane.b32.xlu0 %v2171_v11, %s2848_s23 }
0x1470   :  { %v2287_v61 = vpop.permute.xlu1 %2286  ;;  %v2164_v63 = vpop.permute.xlu0 %2163 }
0x1471   :  { %v2289_v12 = vmul.f32 %v2841_v60, %v2287_v61  ;;  %v2166_v7 = vmul.f32 %v2839_v5, %v2164_v63 }
0x1473   :  { %2291 = vrot.lane.b32.xlu1 %v2289_v12, %s2848_s23 }
0x1474   :  { %v2282_v8 = vpop.permute.xlu1 %2281 }
0x1475   :  { %v2284_v13 = vmul.f32 %v2841_v60, %v2282_v8 }
0x14e1   :  { %v2174_v9 = vpop.permute.xlu0 %2173 }
0x14e2   :  { %v2176_v10 = vadd.f32 %v2174_v9, %v2166_v7 }
0x14e4   :  { %2842 = vtanh.f32 %v2176_v10  ;;  %v2320_v18 = vrot.slane %v2176_v10, %v3006_v56 }
0x14e5   :  { %v2292_v14 = vpop.permute.xlu1 %2291 }
0x14e6   :  { %v2294_v15 = vadd.f32 %v2292_v14, %v2284_v13 }
0x14e8   :  { %2844 = vtanh.f32 %v2294_v15  ;;  %v2344_v19 = vrot.slane %v2294_v15, %v3006_v56 }
0x14f1   :  { %v2843_v16 = vpop.eup %2842 }
0x14f2   :  { %2179 = vrot.lane.b32.xlu0 %v2843_v16, %s2849_s28 }
0x14f5   :  { %v2845_v17 = vpop.eup %2844 }
0x14f6   :  { %2297 = vrot.lane.b32.xlu1 %v2845_v17, %s2849_s28  ;;  %320 = vrot.lane.b32.xlu0 %v3012_v62, %s2849_s28 }
0x14fa   :  { %2321 = vrot.lane.b32.xlu1 %v2320_v18, %s2851_s29  ;;  %905 = vrot.lane.b32.xlu0 %v3122_v52, %s2849_s28 }
0x14fe   :  { %2345 = vrot.lane.b32.xlu1 %v2344_v19, %s2851_s29 }
0x1502   :  { %613 = vrot.lane.b32.xlu1 %v3067_v57, %s2849_s28 }
0x1506   :  { %1197 = vrot.lane.b32.xlu1 %v3177_v49, %s2849_s28 }
0x150a   :  { %1774 = vrot.lane.b32.xlu1 %v3302_v38, %s2849_s28 }
0x1564   :  { %v2180_v62 = vpop.permute.xlu0 %2179 }
0x1565   :  { %v2182_v20 = vmul.f32 %v2839_v5, %v2180_v62 }
0x1567   :  { %v2308_v21 = vrot.slane %v2182_v20, %v3006_v56 }
0x1568   :  { %v2298_v22 = vpop.permute.xlu1 %2297  ;;  %v321_v52 = vpop.permute.xlu0 %320 }
0x1569   :  { %v2300_v23 = vmul.f32 %v2841_v60, %v2298_v22  ;;  %2385 = vst.msk [vmem:[%s3475_s5 + $0xe] sm:$0x3] %vm324_vm3, %v321_v52  ;;  %2309 = vrot.lane.b32.xlu0 %v2308_v21, %s2848_s23 }
0x156b   :  { %v2332_v57 = vrot.slane %v2300_v23, %v3006_v56 }
0x156c   :  { %v2322_v49 = vpop.permute.xlu1 %2321  ;;  %v906_v24 = vpop.permute.xlu0 %905 }
0x156d   :  { %2324 = vst.msk [vmem:[#allocation3] sm:$0x3] %vm24_vm0, %v2322_v49  ;;  %2350 = vrot.lane.b32.xlu1 %v2332_v57, %s2849_s28  ;;  %2333 = vrot.lane.b32.xlu0 %v2332_v57, %s2848_s23 }
0x156e   :  { %2405 = vst.msk [vmem:[%s3475_s5 + $0xa] sm:$0x3] %vm324_vm3, %v906_v24 }
0x156f   :  { %2434 = vst.msk [vmem:[%s3475_s5 + $0xa] sm:$0x3] %vm24_vm0, %v3309_v42 }
0x1570   :  { %v2346_v56 = vpop.permute.xlu1 %2345 }
0x1571   :  { %2348 = vst.msk [vmem:[#allocation5] sm:$0x3] %vm24_vm0, %v2346_v56  ;;  %1486 = vrot.lane.b32.xlu0 %v3232_v39, %s2849_s28 }
0x1574   :  { %v2359_v38 = vld [vmem:[#allocation3] sm:$0x3]  ;;  %v614_v25 = vpop.permute.xlu1 %613 }
0x1575   :  { %2360 = vst.msk [vmem:[%s3476_s7] sm:$0x3] %vm24_vm0, %v2359_v38  ;;  %2062 = vrot.lane.b32.xlu0 %v3346_v30, %s2849_s28 }
0x1576   :  { %2395 = vst.msk [vmem:[%s3475_s5 + $0xc] sm:$0x3] %vm324_vm3, %v614_v25 }
0x1577   :  { %2444 = vst.msk [vmem:[%s3475_s5 + $0xc] sm:$0x3] %vm24_vm0, %v3353_v32 }
0x1578   :  { %v2361_v39 = vld [vmem:[#allocation5] sm:$0x3]  ;;  %v1198_v42 = vpop.permute.xlu1 %1197 }
0x1579   :  { %2455 = vst.msk [vmem:[%s3476_s7 + $0x2] sm:$0x3] %vm24_vm0, %v2361_v39 }
0x157a   :  { %2415 = vst.msk [vmem:[%s3475_s5 + $0x8] sm:$0x3] %vm324_vm3, %v1198_v42 }
0x157b   :  { %2424 = vst.msk [vmem:[%s3475_s5 + $0x8] sm:$0x3] %vm24_vm0, %v3239_v41 }
0x157c   :  { %v1775_v26 = vpop.permute.xlu1 %1774 }
0x157d   :  { %2435 = vst.msk [vmem:[%s3475_s5 + $0x4] sm:$0x3] %vm324_vm3, %v1775_v26 }
0x15db   :  { %v2310_v27 = vpop.permute.xlu0 %2309 }
0x15dc   :  { %2312 = vst.msk [vmem:[#allocation2] sm:$0x3] %vm24_vm0, %v2310_v27  ;;  %2453 = vst.msk [vmem:[%s3475_s5 + $0xe] sm:$0x3] %vm24_vm0, %v2310_v27 }
0x15df   :  { %v2351_v28 = vpop.permute.xlu1 %2350  ;;  %v2334_v29 = vpop.permute.xlu0 %2333 }
0x15e0   :  { %2353 = vst.msk [vmem:[%s3475_s5] sm:$0x3] %vm324_vm3, %v2351_v28 }
0x15e1   :  { %2336 = vst.msk [vmem:[#allocation4] sm:$0x3] %vm24_vm0, %v2334_v29 }
0x15e3   :  { %v2354_v41 = vld [vmem:[#allocation2] sm:$0x3]  ;;  %v1487_v30 = vpop.permute.xlu0 %1486 }
0x15e4   :  { %2355 = vst.msk [vmem:[%s3477_s6] sm:$0x3] %vm24_vm0, %v2354_v41 }
0x15e5   :  { %2425 = vst.msk [vmem:[%s3475_s5 + $0x6] sm:$0x3] %vm324_vm3, %v1487_v30 }
0x15e7   :  { %v2063_v32 = vpop.permute.xlu0 %2062 }
0x15e8   :  { %v2356_v31 = vld [vmem:[#allocation4] sm:$0x3]  ;;  %2445 = vst.msk [vmem:[%s3475_s5 + $0x2] sm:$0x3] %vm324_vm3, %v2063_v32 }
0x15e9   :  { %2454 = vst.msk [vmem:[%s3477_s6 + $0x2] sm:$0x3] %vm24_vm0, %v2356_v31 }

</bundles_post_ra>
